<compile_context>
chip_gen: v7x
topology: tpu7x:2x2x1
jax: 0.10.0
libtpu: 0.0.40
codegen_flags: <defaults>
</compile_context>

<pallas_src>
import jax
import jax.numpy as jnp
from jax import lax
from jax.experimental import pallas as pl
from jax.experimental.pallas import tpu as pltpu


def _round_up(x, m):
    return ((x + m - 1) // m) * m


def _pick_block_tv(Tv, cap):
    """Largest divisor of Tv <= cap that is 8-aligned (or the full Tv)."""
    cap = max(1, min(cap, Tv))
    for d in range(cap, 0, -1):
        if Tv % d == 0 and (d % 8 == 0 or d == Tv):
            return d
    # TODO(synk): masked last Tv tile for ragged Tv; fall back to one full block.
    return Tv


def _make_kernel(E, H, Tl, Tl_pad, mm_dtype):
    hd = E // H
    eps = 1e-5  # torch.nn.LayerNorm default

    def layernorm(x, g, b):
        x = x.astype(jnp.float32)
        mu = jnp.mean(x, axis=-1, keepdims=True)
        xc = x - mu
        var = jnp.mean(xc * xc, axis=-1, keepdims=True)
        return xc * lax.rsqrt(var + eps) * g + b

    def kernel(v_ref, l_ref, lnv_g, lnv_b, lnl_g, lnl_b,
               wq, bq, wkv, bkv, wo, bo, gamma,
               out_ref, k_sc, v_sc, o_sc):
        # ---- K/V projection: once per batch (Tv-tile index 0), cached in VMEM ----
        # Scratch legally carries across Tv tiles because the t axis is "arbitrary".
        @pl.when(pl.program_id(1) == 0)
        def _():
            ln = layernorm(l_ref[0], lnl_g[...], lnl_b[...])             # (Tl_pad, Dl) f32
            kv = jnp.dot(ln.astype(mm_dtype), wkv[...],
                         preferred_element_type=jnp.float32) + bkv[...]  # (Tl_pad, 2E) f32
            kv = kv.astype(mm_dtype)
            for h in range(H):                                           # once per batch
                k_sc[h] = kv[:, h * hd:(h + 1) * hd]
                v_sc[h] = kv[:, E + h * hd:E + (h + 1) * hd]

        # ---- per (batch, Tv-tile) work ----
        vn = layernorm(v_ref[0], lnv_g[...], lnv_b[...])                 # (tTv, Dv) f32
        vn_mm = vn.astype(mm_dtype)

        if Tl_pad != Tl:  # hoisted out of the head loop (broadcasts are not CSE'd)
            pad_mask = lax.broadcasted_iota(jnp.int32, (vn.shape[0], Tl_pad), 1) >= Tl

        for h in range(H):  # static unroll; all head indexing on leading ref dims
            # per-head q projection straight from head-major weights (scale already
            # folded into wq/bq); no lane-offset slicing of a fused (tTv, E) q.
            q = jnp.dot(vn_mm, wq[h], preferred_element_type=jnp.float32) + bq[h]
            # logits: contract the head dims directly (no k transpose relayout).
            s = lax.dot_general(q.astype(mm_dtype), k_sc[h],
                                (((1,), (1,)), ((), ())),
                                preferred_element_type=jnp.float32)       # (tTv, Tl_pad)
            if Tl_pad != Tl:
                s = jnp.where(pad_mask, -1e30, s)                         # mask padded keys
            # Reference subtracts a *global* max then clamps to [-5e4, 5e4]; the
            # per-row max shift is softmax-equivalent and makes both clamps dead,
            # so they are dropped.
            s = s - jnp.max(s, axis=-1, keepdims=True)
            e = jnp.exp(s)
            p = e * pl.reciprocal(jnp.sum(e, axis=-1, keepdims=True), approx=True)
            # dropout: identity (inference)
            o_sc[:, h * hd:(h + 1) * hd] = jnp.dot(
                p.astype(mm_dtype), v_sc[h],
                preferred_element_type=jnp.float32).astype(mm_dtype)      # (tTv, hd)

        # single E-wide output projection over the concat-free head buffer
        delta = jnp.dot(o_sc[...], wo[...],
                        preferred_element_type=jnp.float32) + bo[...]
        # residual on the *normalized* v (the torch forward rebinds v = LN(v)
        # before the residual add), delta scaled by gamma_v.
        out_ref[0] = (vn + gamma[...] * delta).astype(out_ref.dtype)

    return kernel


def cross_attention_block(v, l, params, num_heads, *, block_tv=None,
                          matmul_dtype=jnp.bfloat16):
    B, Tv, Dv = v.shape
    _, Tl, Dl = l.shape
    E = params["wq"].shape[1]
    H = num_heads
    hd = E // H
    assert hd * H == E
    scale = hd ** (-0.5)

    # ---- lane-dense keys: pad Tl to a multiple of 128, mask in-kernel ----
    Tl_pad = _round_up(Tl, 128)
    if Tl_pad != Tl:
        l = jnp.pad(l, ((0, 0), (0, Tl_pad - Tl), (0, 0)))

    # ---- generation-aware VMEM budget / Tv-tile selection ----
    try:
        vmem_cap = int(getattr(pltpu.get_tpu_info(), "vmem_capacity_bytes",
                               64 * 1024 * 1024))
    except Exception:
        vmem_cap = 64 * 1024 * 1024                       # conservative (v7x per-TC)
    budget = max(min(int(vmem_cap * 0.8), 100 * 1024 * 1024), 32 * 1024 * 1024)

    mm_bytes = jnp.dtype(matmul_dtype).itemsize
    hd_pad = _round_up(hd, 128)

    def est_vmem(btv, weight_bufs):
        f32 = 4
        weights = ((H * Dv * hd_pad + Dl * 2 * E + E * Dv) * mm_bytes
                   + (H * hd_pad + 2 * E + 4 * Dv + 2 * Dl) * f32) * weight_bufs
        l_bytes = Tl_pad * Dl * l.dtype.itemsize * weight_bufs
        io = 2 * 2 * btv * Dv * v.dtype.itemsize            # v tile + out tile, 2 bufs
        scratch = (2 * H * Tl_pad * hd_pad + btv * _round_up(E, 128)) * mm_bytes
        return weights + l_bytes + io + scratch + (2 << 20)  # + compiler slack

    if block_tv is None:
        cap_rows = 512 if vmem_cap > 96 * 1024 * 1024 else 256   # v5e/v6e vs v7x
        btv = min(cap_rows, Tv)
        while btv > 64 and est_vmem(btv, 2) > budget:
            btv //= 2
        block_tv = btv
    block_tv = _pick_block_tv(Tv, block_tv)
    n_tv = Tv // block_tv
    # TODO(synk): flash-style Tl tiling (online softmax) for very long text; the
    # cached K/V + full-Tl logits layout assumes Tl_pad * E fits in VMEM.

    kernel = _make_kernel(E, H, Tl, Tl_pad, matmul_dtype)

    # ---- one-time weight transforms (scale folded into wq/bq, head-major q) ----
    wq3 = (params["wq"] * scale).reshape(Dv, H, hd).transpose(1, 0, 2).astype(matmul_dtype)
    bq3 = (params["bq"] * scale).reshape(H, 1, hd).astype(jnp.float32)
    wkv = jnp.concatenate([params["wk"], params["wv"]], axis=1).astype(matmul_dtype)
    bkv = jnp.concatenate([params["bk"], params["bv"]]).reshape(1, 2 * E).astype(jnp.float32)
    wo = params["wo"].astype(matmul_dtype)

    args = [
        v, l,
        params["lnv_g"].reshape(1, Dv).astype(jnp.float32),
        params["lnv_b"].reshape(1, Dv).astype(jnp.float32),
        params["lnl_g"].reshape(1, Dl).astype(jnp.float32),
        params["lnl_b"].reshape(1, Dl).astype(jnp.float32),
        wq3, bq3, wkv, bkv, wo,
        params["bo"].reshape(1, Dv).astype(jnp.float32),
        params["gamma_v"].reshape(1, Dv).astype(jnp.float32),
    ]
    inv_shapes = [(1, Dv), (1, Dv), (1, Dl), (1, Dl),
                  (H, Dv, hd), (H, 1, hd), (Dl, 2 * E), (1, 2 * E),
                  (E, Dv), (1, Dv), (1, Dv)]

    def build(single_buffer_invariants):
        def inv(shape):
            zeros = (0,) * len(shape)

            def imap(b, t):
                return zeros
            if single_buffer_invariants:
                # grid-invariant: fetched once, no second pipeline buffer needed
                return pl.BlockSpec(shape, imap, pipeline_mode=pl.Buffered(1))
            return pl.BlockSpec(shape, imap)

        l_kwargs = ({"pipeline_mode": pl.Buffered(1)}
                    if single_buffer_invariants else {})
        in_specs = [
            pl.BlockSpec((1, block_tv, Dv), lambda b, t: (b, t, 0)),        # v tile
            pl.BlockSpec((1, Tl_pad, Dl), lambda b, t: (b, 0, 0), **l_kwargs),
        ] + [inv(s) for s in inv_shapes]
        out_specs = pl.BlockSpec((1, block_tv, Dv), lambda b, t: (b, t, 0))

        return pl.pallas_call(
            kernel,
            out_shape=jax.ShapeDtypeStruct((B, Tv, Dv), v.dtype),
            grid=(B, n_tv),
            in_specs=in_specs,
            out_specs=out_specs,
            scratch_shapes=[
                pltpu.VMEM((H, Tl_pad, hd), matmul_dtype),   # cached K (head-major)
                pltpu.VMEM((H, Tl_pad, hd), matmul_dtype),   # cached V (head-major)
                pltpu.VMEM((block_tv, E), matmul_dtype),     # concat-free head outputs
            ],
            compiler_params=pltpu.CompilerParams(
                # b parallel (megacore sharding); t "arbitrary" so the cached K/V
                # scratch legally carries across Tv tiles of the same batch.
                dimension_semantics=("parallel", "arbitrary"),
                vmem_limit_bytes=budget,
            ),
        )

    try:
        return build(True)(*args)
    except Exception:
        # pl.Buffered(1) single-buffering unsupported on this jax version:
        # fall back to default double-buffered invariants (identical results).
        return build(False)(*args)


def _xavier_uniform(key, fan_in, fan_out):
    bound = (6.0 / (fan_in + fan_out)) ** 0.5
    return jax.random.uniform(key, (fan_in, fan_out), jnp.float32, -bound, bound)


def init_params(key, v_dim, l_dim, embed_dim, init_values=1e-4):
    ks = jax.random.split(key, 4)
    return {
        "lnv_g": jnp.ones((v_dim,), jnp.float32),
        "lnv_b": jnp.zeros((v_dim,), jnp.float32),
        "lnl_g": jnp.ones((l_dim,), jnp.float32),
        "lnl_b": jnp.zeros((l_dim,), jnp.float32),
        "wq": _xavier_uniform(ks[0], v_dim, embed_dim),
        "bq": jnp.zeros((embed_dim,), jnp.float32),
        "wk": _xavier_uniform(ks[1], l_dim, embed_dim),
        "bk": jnp.zeros((embed_dim,), jnp.float32),
        "wv": _xavier_uniform(ks[2], l_dim, embed_dim),
        "bv": jnp.zeros((embed_dim,), jnp.float32),
        "wo": _xavier_uniform(ks[3], embed_dim, v_dim),
        "bo": jnp.zeros((v_dim,), jnp.float32),
        "gamma_v": init_values * jnp.ones((v_dim,), jnp.float32),
    }


def reference(v, l, p, H):
    # Faithful f32 re-implementation of the torch module (None-mask, eval mode).
    def ln(x, g, b):
        mu = x.mean(-1, keepdims=True)
        var = ((x - mu) ** 2).mean(-1, keepdims=True)
        return (x - mu) / jnp.sqrt(var + 1e-5) * g + b

    B, Tv, Dv = v.shape
    Tl = l.shape[1]
    E = p["wq"].shape[1]
    hd = E // H
    scale = hd ** (-0.5)
    vn = ln(v, p["lnv_g"], p["lnv_b"])
    lnn = ln(l, p["lnl_g"], p["lnl_b"])
    q = (vn @ p["wq"] + p["bq"]) * scale
    k = lnn @ p["wk"] + p["bk"]
    val = lnn @ p["wv"] + p["bv"]
    qh = q.reshape(B, Tv, H, hd).transpose(0, 2, 1, 3)
    kh = k.reshape(B, Tl, H, hd).transpose(0, 2, 1, 3)
    vh = val.reshape(B, Tl, H, hd).transpose(0, 2, 1, 3)
    attn = jnp.einsum("bhtd,bhsd->bhts", qh, kh)
    attn = jnp.clip(attn - attn.max(), -50000.0, 50000.0)   # stable_softmax_2d + clamps
    pw = jax.nn.softmax(attn, axis=-1)
    o = jnp.einsum("bhts,bhsd->bhtd", pw, vh).transpose(0, 2, 1, 3).reshape(B, Tv, E)
    delta = o @ p["wo"] + p["bo"]
    return vn + p["gamma_v"] * delta


if __name__ == "__main__":
    B, Tv, Tl = 2, 16, 8
    v_dim, l_dim, embed_dim, num_heads = 32, 32, 32, 4

    key = jax.random.PRNGKey(0)
    k_v, k_l, k_p = jax.random.split(key, 3)
    v = jax.random.normal(k_v, (B, Tv, v_dim), jnp.float32)
    l = jax.random.normal(k_l, (B, Tl, l_dim), jnp.float32)
    params = init_params(k_p, v_dim, l_dim, embed_dim)

    # 1) default gamma_v = 1e-4, auto Tv tile, bf16 MXU operands
    out = jax.block_until_ready(cross_attention_block(v, l, params, num_heads))
    exp = reference(v, l, params, num_heads)
    assert out.shape == (B, Tv, v_dim)
    assert jnp.allclose(out, exp, atol=1e-3, rtol=1e-3), (
        float(jnp.max(jnp.abs(out - exp))))

    # 2) gamma_v = 1.0 (tolerance not hidden by tiny gamma), small Tv tile so the
    #    cached-K/V reuse across Tv tiles is exercised; f32 MXU operands.
    params1 = dict(params, gamma_v=jnp.ones((v_dim,), jnp.float32))
    exp1 = reference(v, l, params1, num_heads)
    out1 = jax.block_until_ready(cross_attention_block(
        v, l, params1, num_heads, block_tv=8, matmul_dtype=jnp.float32))
    assert jnp.allclose(out1, exp1, atol=5e-2, rtol=5e-2), (
        float(jnp.max(jnp.abs(out1 - exp1))))

    # 3) gamma_v = 1.0, bf16 MXU path (looser tolerance for bf16 rounding through
    #    two chained matmuls; structural errors would be O(1)).
    out2 = jax.block_until_ready(cross_attention_block(
        v, l, params1, num_heads, block_tv=8, matmul_dtype=jnp.bfloat16))
    assert jnp.allclose(out2, exp1, atol=1e-1, rtol=1e-1), (
        float(jnp.max(jnp.abs(out2 - exp1))))

    print("KERNEL_OK")
</pallas_src>

<mosaic_0001>
module attributes {stable_mosaic.version = 11 : i64} {
  func.func @kernel(%arg0: i32, %arg1: i32, %arg2: memref<1x16x32xf32, #tpu.memory_space<vmem>>, %arg3: memref<1x128x32xf32, #tpu.memory_space<vmem>>, %arg4: memref<1x32xf32, #tpu.memory_space<vmem>>, %arg5: memref<1x32xf32, #tpu.memory_space<vmem>>, %arg6: memref<1x32xf32, #tpu.memory_space<vmem>>, %arg7: memref<1x32xf32, #tpu.memory_space<vmem>>, %arg8: memref<4x32x8xbf16, #tpu.memory_space<vmem>>, %arg9: memref<4x1x8xf32, #tpu.memory_space<vmem>>, %arg10: memref<32x64xbf16, #tpu.memory_space<vmem>>, %arg11: memref<1x64xf32, #tpu.memory_space<vmem>>, %arg12: memref<32x32xbf16, #tpu.memory_space<vmem>>, %arg13: memref<1x32xf32, #tpu.memory_space<vmem>>, %arg14: memref<1x32xf32, #tpu.memory_space<vmem>>, %arg15: memref<1x16x32xf32, #tpu.memory_space<vmem>>, %arg16: memref<4x128x8xbf16, #tpu.memory_space<vmem>>, %arg17: memref<4x128x8xbf16, #tpu.memory_space<vmem>>, %arg18: memref<16x32xbf16, #tpu.memory_space<vmem>>) attributes {dimension_semantics = [#tpu.dimension_semantics<parallel>, #tpu.dimension_semantics<arbitrary>], iteration_bounds = array<i64: 2, 1>, scalar_prefetch = 0 : i64, scratch_operands = 3 : i64, tpu.core_type = #tpu.core_type<tc>, window_params = [{transform_indices = @transform_0, window_bounds = array<i64: 1, 16, 32>}, {pipeline_mode = #tpu.pipeline_mode<synchronous>, transform_indices = @transform_1, window_bounds = array<i64: 1, 128, 32>}, {pipeline_mode = #tpu.pipeline_mode<synchronous>, transform_indices = @transform_2, window_bounds = array<i64: 1, 32>}, {pipeline_mode = #tpu.pipeline_mode<synchronous>, transform_indices = @transform_3, window_bounds = array<i64: 1, 32>}, {pipeline_mode = #tpu.pipeline_mode<synchronous>, transform_indices = @transform_4, window_bounds = array<i64: 1, 32>}, {pipeline_mode = #tpu.pipeline_mode<synchronous>, transform_indices = @transform_5, window_bounds = array<i64: 1, 32>}, {pipeline_mode = #tpu.pipeline_mode<synchronous>, transform_indices = @transform_6, window_bounds = array<i64: 4, 32, 8>}, {pipeline_mode = #tpu.pipeline_mode<synchronous>, transform_indices = @transform_7, window_bounds = array<i64: 4, 1, 8>}, {pipeline_mode = #tpu.pipeline_mode<synchronous>, transform_indices = @transform_8, window_bounds = array<i64: 32, 64>}, {pipeline_mode = #tpu.pipeline_mode<synchronous>, transform_indices = @transform_9, window_bounds = array<i64: 1, 64>}, {pipeline_mode = #tpu.pipeline_mode<synchronous>, transform_indices = @transform_10, window_bounds = array<i64: 32, 32>}, {pipeline_mode = #tpu.pipeline_mode<synchronous>, transform_indices = @transform_11, window_bounds = array<i64: 1, 32>}, {pipeline_mode = #tpu.pipeline_mode<synchronous>, transform_indices = @transform_12, window_bounds = array<i64: 1, 32>}, {transform_indices = @transform_13, window_bounds = array<i64: 1, 16, 32>}]} {
    %c0_i32 = arith.constant 0 : i32
    %0 = arith.cmpi eq, %arg1, %c0_i32 : i32
    %1 = arith.extui %0 : i1 to i32
    %c0_i32_0 = arith.constant 0 : i32
    %2 = arith.cmpi ne, %1, %c0_i32_0 : i32
    scf.if %2 {
      %c0_97 = arith.constant 0 : index
      %c0_98 = arith.constant 0 : index
      %c0_99 = arith.constant 0 : index
      %160 = vector.load %arg3[%c0_97, %c0_98, %c0_99] : memref<1x128x32xf32, #tpu.memory_space<vmem>>, vector<1x128x32xf32>
      %161 = vector.shape_cast %160 : vector<1x128x32xf32> to vector<128x32xf32>
      %c0_100 = arith.constant 0 : index
      %c0_101 = arith.constant 0 : index
      %162 = vector.load %arg6[%c0_100, %c0_101] : memref<1x32xf32, #tpu.memory_space<vmem>>, vector<1x32xf32>
      %c0_102 = arith.constant 0 : index
      %c0_103 = arith.constant 0 : index
      %163 = vector.load %arg7[%c0_102, %c0_103] : memref<1x32xf32, #tpu.memory_space<vmem>>, vector<1x32xf32>
      %cst_104 = arith.constant dense<0.000000e+00> : vector<128xf32>
      %164 = vector.multi_reduction <add>, %161, %cst_104 [1] : vector<128x32xf32> to vector<128xf32>
      %165 = vector.shape_cast %164 : vector<128xf32> to vector<128x1xf32>
      %cst_105 = arith.constant 3.200000e+01 : f32
      %166 = vector.broadcast %cst_105 : f32 to vector<128x1xf32>
      %167 = arith.divf %165, %166 : vector<128x1xf32>
      %168 = vector.broadcast %167 : vector<128x1xf32> to vector<128x32xf32>
      %169 = arith.subf %161, %168 : vector<128x32xf32>
      %170 = arith.mulf %169, %169 : vector<128x32xf32>
      %cst_106 = arith.constant dense<0.000000e+00> : vector<128xf32>
      %171 = vector.multi_reduction <add>, %170, %cst_106 [1] : vector<128x32xf32> to vector<128xf32>
      %172 = vector.shape_cast %171 : vector<128xf32> to vector<128x1xf32>
      %cst_107 = arith.constant 3.200000e+01 : f32
      %173 = vector.broadcast %cst_107 : f32 to vector<128x1xf32>
      %174 = arith.divf %172, %173 : vector<128x1xf32>
      %cst_108 = arith.constant 9.99999974E-6 : f32
      %175 = vector.broadcast %cst_108 : f32 to vector<128x1xf32>
      %176 = arith.addf %174, %175 : vector<128x1xf32>
      %177 = math.rsqrt %176 : vector<128x1xf32>
      %178 = vector.broadcast %177 : vector<128x1xf32> to vector<128x32xf32>
      %179 = arith.mulf %169, %178 : vector<128x32xf32>
      %180 = vector.broadcast %162 : vector<1x32xf32> to vector<128x32xf32>
      %181 = arith.mulf %179, %180 : vector<128x32xf32>
      %182 = vector.broadcast %163 : vector<1x32xf32> to vector<128x32xf32>
      %183 = arith.addf %181, %182 : vector<128x32xf32>
      %184 = arith.truncf %183 : vector<128x32xf32> to vector<128x32xbf16>
      %c0_109 = arith.constant 0 : index
      %c0_110 = arith.constant 0 : index
      %185 = vector.load %arg10[%c0_109, %c0_110] : memref<32x64xbf16, #tpu.memory_space<vmem>>, vector<32x64xbf16>
      %cst_111 = arith.constant dense<0.000000e+00> : vector<128x64xf32>
      %186 = tpu.matmul %184, %185, %cst_111 {dimension_numbers = #tpu.dot_dimension_numbers<[1], [0], [0], [1], [0, 0, 1, 1], [], []>} : vector<128x32xbf16>, vector<32x64xbf16>, vector<128x64xf32> -> vector<128x64xf32>
      %c0_112 = arith.constant 0 : index
      %c0_113 = arith.constant 0 : index
      %187 = vector.load %arg11[%c0_112, %c0_113] : memref<1x64xf32, #tpu.memory_space<vmem>>, vector<1x64xf32>
      %188 = vector.broadcast %187 : vector<1x64xf32> to vector<128x64xf32>
      %189 = arith.addf %186, %188 : vector<128x64xf32>
      %190 = arith.truncf %189 : vector<128x64xf32> to vector<128x64xbf16>
      %191 = vector.extract_strided_slice %190 {offsets = [0, 0], sizes = [128, 8], strides = [1, 1]} : vector<128x64xbf16> to vector<128x8xbf16>
      %c0_114 = arith.constant 0 : index
      %c0_115 = arith.constant 0 : index
      %c0_116 = arith.constant 0 : index
      %192 = vector.load %arg16[%c0_114, %c0_115, %c0_116] : memref<4x128x8xbf16, #tpu.memory_space<vmem>>, vector<1x128x8xbf16>
      %193 = vector.shape_cast %192 : vector<1x128x8xbf16> to vector<128x8xbf16>
      %194 = vector.shape_cast %191 : vector<128x8xbf16> to vector<1x128x8xbf16>
      tpu.vector_store %arg16[%c0_114, %c0_115, %c0_116], %194 {strides = array<i32>} : memref<4x128x8xbf16, #tpu.memory_space<vmem>>, vector<1x128x8xbf16>,
      %195 = vector.extract_strided_slice %190 {offsets = [0, 32], sizes = [128, 8], strides = [1, 1]} : vector<128x64xbf16> to vector<128x8xbf16>
      %c0_117 = arith.constant 0 : index
      %c0_118 = arith.constant 0 : index
      %c0_119 = arith.constant 0 : index
      %196 = vector.load %arg17[%c0_117, %c0_118, %c0_119] : memref<4x128x8xbf16, #tpu.memory_space<vmem>>, vector<1x128x8xbf16>
      %197 = vector.shape_cast %196 : vector<1x128x8xbf16> to vector<128x8xbf16>
      %198 = vector.shape_cast %195 : vector<128x8xbf16> to vector<1x128x8xbf16>
      tpu.vector_store %arg17[%c0_117, %c0_118, %c0_119], %198 {strides = array<i32>} : memref<4x128x8xbf16, #tpu.memory_space<vmem>>, vector<1x128x8xbf16>,
      %199 = vector.extract_strided_slice %190 {offsets = [0, 8], sizes = [128, 8], strides = [1, 1]} : vector<128x64xbf16> to vector<128x8xbf16>
      %c1_120 = arith.constant 1 : index
      %c0_121 = arith.constant 0 : index
      %c0_122 = arith.constant 0 : index
      %200 = vector.load %arg16[%c1_120, %c0_121, %c0_122] : memref<4x128x8xbf16, #tpu.memory_space<vmem>>, vector<1x128x8xbf16>
      %201 = vector.shape_cast %200 : vector<1x128x8xbf16> to vector<128x8xbf16>
      %202 = vector.shape_cast %199 : vector<128x8xbf16> to vector<1x128x8xbf16>
      tpu.vector_store %arg16[%c1_120, %c0_121, %c0_122], %202 {strides = array<i32>} : memref<4x128x8xbf16, #tpu.memory_space<vmem>>, vector<1x128x8xbf16>,
      %203 = vector.extract_strided_slice %190 {offsets = [0, 40], sizes = [128, 8], strides = [1, 1]} : vector<128x64xbf16> to vector<128x8xbf16>
      %c1_123 = arith.constant 1 : index
      %c0_124 = arith.constant 0 : index
      %c0_125 = arith.constant 0 : index
      %204 = vector.load %arg17[%c1_123, %c0_124, %c0_125] : memref<4x128x8xbf16, #tpu.memory_space<vmem>>, vector<1x128x8xbf16>
      %205 = vector.shape_cast %204 : vector<1x128x8xbf16> to vector<128x8xbf16>
      %206 = vector.shape_cast %203 : vector<128x8xbf16> to vector<1x128x8xbf16>
      tpu.vector_store %arg17[%c1_123, %c0_124, %c0_125], %206 {strides = array<i32>} : memref<4x128x8xbf16, #tpu.memory_space<vmem>>, vector<1x128x8xbf16>,
      %207 = vector.extract_strided_slice %190 {offsets = [0, 16], sizes = [128, 8], strides = [1, 1]} : vector<128x64xbf16> to vector<128x8xbf16>
      %c2_126 = arith.constant 2 : index
      %c0_127 = arith.constant 0 : index
      %c0_128 = arith.constant 0 : index
      %208 = vector.load %arg16[%c2_126, %c0_127, %c0_128] : memref<4x128x8xbf16, #tpu.memory_space<vmem>>, vector<1x128x8xbf16>
      %209 = vector.shape_cast %208 : vector<1x128x8xbf16> to vector<128x8xbf16>
      %210 = vector.shape_cast %207 : vector<128x8xbf16> to vector<1x128x8xbf16>
      tpu.vector_store %arg16[%c2_126, %c0_127, %c0_128], %210 {strides = array<i32>} : memref<4x128x8xbf16, #tpu.memory_space<vmem>>, vector<1x128x8xbf16>,
      %211 = vector.extract_strided_slice %190 {offsets = [0, 48], sizes = [128, 8], strides = [1, 1]} : vector<128x64xbf16> to vector<128x8xbf16>
      %c2_129 = arith.constant 2 : index
      %c0_130 = arith.constant 0 : index
      %c0_131 = arith.constant 0 : index
      %212 = vector.load %arg17[%c2_129, %c0_130, %c0_131] : memref<4x128x8xbf16, #tpu.memory_space<vmem>>, vector<1x128x8xbf16>
      %213 = vector.shape_cast %212 : vector<1x128x8xbf16> to vector<128x8xbf16>
      %214 = vector.shape_cast %211 : vector<128x8xbf16> to vector<1x128x8xbf16>
      tpu.vector_store %arg17[%c2_129, %c0_130, %c0_131], %214 {strides = array<i32>} : memref<4x128x8xbf16, #tpu.memory_space<vmem>>, vector<1x128x8xbf16>,
      %215 = vector.extract_strided_slice %190 {offsets = [0, 24], sizes = [128, 8], strides = [1, 1]} : vector<128x64xbf16> to vector<128x8xbf16>
      %c3_132 = arith.constant 3 : index
      %c0_133 = arith.constant 0 : index
      %c0_134 = arith.constant 0 : index
      %216 = vector.load %arg16[%c3_132, %c0_133, %c0_134] : memref<4x128x8xbf16, #tpu.memory_space<vmem>>, vector<1x128x8xbf16>
      %217 = vector.shape_cast %216 : vector<1x128x8xbf16> to vector<128x8xbf16>
      %218 = vector.shape_cast %215 : vector<128x8xbf16> to vector<1x128x8xbf16>
      tpu.vector_store %arg16[%c3_132, %c0_133, %c0_134], %218 {strides = array<i32>} : memref<4x128x8xbf16, #tpu.memory_space<vmem>>, vector<1x128x8xbf16>,
      %219 = vector.extract_strided_slice %190 {offsets = [0, 56], sizes = [128, 8], strides = [1, 1]} : vector<128x64xbf16> to vector<128x8xbf16>
      %c3_135 = arith.constant 3 : index
      %c0_136 = arith.constant 0 : index
      %c0_137 = arith.constant 0 : index
      %220 = vector.load %arg17[%c3_135, %c0_136, %c0_137] : memref<4x128x8xbf16, #tpu.memory_space<vmem>>, vector<1x128x8xbf16>
      %221 = vector.shape_cast %220 : vector<1x128x8xbf16> to vector<128x8xbf16>
      %222 = vector.shape_cast %219 : vector<128x8xbf16> to vector<1x128x8xbf16>
      tpu.vector_store %arg17[%c3_135, %c0_136, %c0_137], %222 {strides = array<i32>} : memref<4x128x8xbf16, #tpu.memory_space<vmem>>, vector<1x128x8xbf16>,
    } else {
    }
    %c0 = arith.constant 0 : index
    %c0_1 = arith.constant 0 : index
    %c0_2 = arith.constant 0 : index
    %3 = vector.load %arg2[%c0, %c0_1, %c0_2] : memref<1x16x32xf32, #tpu.memory_space<vmem>>, vector<1x16x32xf32>
    %4 = vector.shape_cast %3 : vector<1x16x32xf32> to vector<16x32xf32>
    %c0_3 = arith.constant 0 : index
    %c0_4 = arith.constant 0 : index
    %5 = vector.load %arg4[%c0_3, %c0_4] : memref<1x32xf32, #tpu.memory_space<vmem>>, vector<1x32xf32>
    %c0_5 = arith.constant 0 : index
    %c0_6 = arith.constant 0 : index
    %6 = vector.load %arg5[%c0_5, %c0_6] : memref<1x32xf32, #tpu.memory_space<vmem>>, vector<1x32xf32>
    %cst = arith.constant dense<0.000000e+00> : vector<16xf32>
    %7 = vector.multi_reduction <add>, %4, %cst [1] : vector<16x32xf32> to vector<16xf32>
    %8 = vector.shape_cast %7 : vector<16xf32> to vector<16x1xf32>
    %cst_7 = arith.constant 3.200000e+01 : f32
    %9 = vector.broadcast %cst_7 : f32 to vector<16x1xf32>
    %10 = arith.divf %8, %9 : vector<16x1xf32>
    %11 = vector.broadcast %10 : vector<16x1xf32> to vector<16x32xf32>
    %12 = arith.subf %4, %11 : vector<16x32xf32>
    %13 = arith.mulf %12, %12 : vector<16x32xf32>
    %cst_8 = arith.constant dense<0.000000e+00> : vector<16xf32>
    %14 = vector.multi_reduction <add>, %13, %cst_8 [1] : vector<16x32xf32> to vector<16xf32>
    %15 = vector.shape_cast %14 : vector<16xf32> to vector<16x1xf32>
    %cst_9 = arith.constant 3.200000e+01 : f32
    %16 = vector.broadcast %cst_9 : f32 to vector<16x1xf32>
    %17 = arith.divf %15, %16 : vector<16x1xf32>
    %cst_10 = arith.constant 9.99999974E-6 : f32
    %18 = vector.broadcast %cst_10 : f32 to vector<16x1xf32>
    %19 = arith.addf %17, %18 : vector<16x1xf32>
    %20 = math.rsqrt %19 : vector<16x1xf32>
    %21 = vector.broadcast %20 : vector<16x1xf32> to vector<16x32xf32>
    %22 = arith.mulf %12, %21 : vector<16x32xf32>
    %23 = vector.broadcast %5 : vector<1x32xf32> to vector<16x32xf32>
    %24 = arith.mulf %22, %23 : vector<16x32xf32>
    %25 = vector.broadcast %6 : vector<1x32xf32> to vector<16x32xf32>
    %26 = arith.addf %24, %25 : vector<16x32xf32>
    %27 = arith.truncf %26 : vector<16x32xf32> to vector<16x32xbf16>
    %28 = tpu.iota {dimensions = array<i32: 1>} : vector<16x128xi32>
    %c8_i32 = arith.constant 8 : i32
    %29 = vector.broadcast %c8_i32 : i32 to vector<16x128xi32>
    %30 = arith.cmpi sge, %28, %29 : vector<16x128xi32>
    %c0_11 = arith.constant 0 : index
    %c0_12 = arith.constant 0 : index
    %c0_13 = arith.constant 0 : index
    %31 = vector.load %arg8[%c0_11, %c0_12, %c0_13] : memref<4x32x8xbf16, #tpu.memory_space<vmem>>, vector<1x32x8xbf16>
    %32 = vector.shape_cast %31 : vector<1x32x8xbf16> to vector<32x8xbf16>
    %cst_14 = arith.constant dense<0.000000e+00> : vector<16x8xf32>
    %33 = tpu.matmul %27, %32, %cst_14 {dimension_numbers = #tpu.dot_dimension_numbers<[1], [0], [0], [1], [0, 0, 1, 1], [], []>} : vector<16x32xbf16>, vector<32x8xbf16>, vector<16x8xf32> -> vector<16x8xf32>
    %c0_15 = arith.constant 0 : index
    %c0_16 = arith.constant 0 : index
    %c0_17 = arith.constant 0 : index
    %34 = vector.load %arg9[%c0_15, %c0_16, %c0_17] : memref<4x1x8xf32, #tpu.memory_space<vmem>>, vector<1x1x8xf32>
    %35 = vector.shape_cast %34 : vector<1x1x8xf32> to vector<1x8xf32>
    %36 = vector.broadcast %35 : vector<1x8xf32> to vector<16x8xf32>
    %37 = arith.addf %33, %36 : vector<16x8xf32>
    %38 = arith.truncf %37 : vector<16x8xf32> to vector<16x8xbf16>
    %c0_18 = arith.constant 0 : index
    %c0_19 = arith.constant 0 : index
    %c0_20 = arith.constant 0 : index
    %39 = vector.load %arg16[%c0_18, %c0_19, %c0_20] : memref<4x128x8xbf16, #tpu.memory_space<vmem>>, vector<1x128x8xbf16>
    %40 = vector.shape_cast %39 : vector<1x128x8xbf16> to vector<128x8xbf16>
    %cst_21 = arith.constant dense<0.000000e+00> : vector<16x128xf32>
    %41 = tpu.matmul %38, %40, %cst_21 {dimension_numbers = #tpu.dot_dimension_numbers<[1], [1], [0], [0], [0, 0, 1, 0], [], []>} : vector<16x8xbf16>, vector<128x8xbf16>, vector<16x128xf32> -> vector<16x128xf32>
    %cst_22 = arith.constant -1.000000e+30 : f32
    %42 = vector.broadcast %cst_22 : f32 to vector<16x128xf32>
    %43 = arith.select %30, %42, %41 : vector<16x128xi1>, vector<16x128xf32>
    %cst_23 = arith.constant dense<0xFF800000> : vector<16xf32>
    %44 = vector.multi_reduction <maximumf>, %43, %cst_23 [1] : vector<16x128xf32> to vector<16xf32>
    %45 = vector.shape_cast %44 : vector<16xf32> to vector<16x1xf32>
    %46 = vector.broadcast %45 : vector<16x1xf32> to vector<16x128xf32>
    %47 = arith.subf %43, %46 : vector<16x128xf32>
    %48 = math.exp %47 : vector<16x128xf32>
    %cst_24 = arith.constant dense<0.000000e+00> : vector<16xf32>
    %49 = vector.multi_reduction <add>, %48, %cst_24 [1] : vector<16x128xf32> to vector<16xf32>
    %50 = vector.shape_cast %49 : vector<16xf32> to vector<16x1xf32>
    %51 = tpu.reciprocal %50 {approx = true} : vector<16x1xf32> -> vector<16x1xf32>
    %52 = vector.broadcast %51 : vector<16x1xf32> to vector<16x128xf32>
    %53 = arith.mulf %48, %52 : vector<16x128xf32>
    %54 = arith.truncf %53 : vector<16x128xf32> to vector<16x128xbf16>
    %c0_25 = arith.constant 0 : index
    %c0_26 = arith.constant 0 : index
    %c0_27 = arith.constant 0 : index
    %55 = vector.load %arg17[%c0_25, %c0_26, %c0_27] : memref<4x128x8xbf16, #tpu.memory_space<vmem>>, vector<1x128x8xbf16>
    %56 = vector.shape_cast %55 : vector<1x128x8xbf16> to vector<128x8xbf16>
    %cst_28 = arith.constant dense<0.000000e+00> : vector<16x8xf32>
    %57 = tpu.matmul %54, %56, %cst_28 {dimension_numbers = #tpu.dot_dimension_numbers<[1], [0], [0], [1], [0, 0, 1, 1], [], []>} : vector<16x128xbf16>, vector<128x8xbf16>, vector<16x8xf32> -> vector<16x8xf32>
    %58 = arith.truncf %57 : vector<16x8xf32> to vector<16x8xbf16>
    %c0_29 = arith.constant 0 : index
    %c0_30 = arith.constant 0 : index
    %59 = vector.load %arg18[%c0_29, %c0_30] : memref<16x32xbf16, #tpu.memory_space<vmem>>, vector<16x8xbf16>
    tpu.vector_store %arg18[%c0_29, %c0_30], %58 {strides = array<i32>} : memref<16x32xbf16, #tpu.memory_space<vmem>>, vector<16x8xbf16>,
    %c1 = arith.constant 1 : index
    %c0_31 = arith.constant 0 : index
    %c0_32 = arith.constant 0 : index
    %60 = vector.load %arg8[%c1, %c0_31, %c0_32] : memref<4x32x8xbf16, #tpu.memory_space<vmem>>, vector<1x32x8xbf16>
    %61 = vector.shape_cast %60 : vector<1x32x8xbf16> to vector<32x8xbf16>
    %cst_33 = arith.constant dense<0.000000e+00> : vector<16x8xf32>
    %62 = tpu.matmul %27, %61, %cst_33 {dimension_numbers = #tpu.dot_dimension_numbers<[1], [0], [0], [1], [0, 0, 1, 1], [], []>} : vector<16x32xbf16>, vector<32x8xbf16>, vector<16x8xf32> -> vector<16x8xf32>
    %c1_34 = arith.constant 1 : index
    %c0_35 = arith.constant 0 : index
    %c0_36 = arith.constant 0 : index
    %63 = vector.load %arg9[%c1_34, %c0_35, %c0_36] : memref<4x1x8xf32, #tpu.memory_space<vmem>>, vector<1x1x8xf32>
    %64 = vector.shape_cast %63 : vector<1x1x8xf32> to vector<1x8xf32>
    %65 = vector.broadcast %64 : vector<1x8xf32> to vector<16x8xf32>
    %66 = arith.addf %62, %65 : vector<16x8xf32>
    %67 = arith.truncf %66 : vector<16x8xf32> to vector<16x8xbf16>
    %c1_37 = arith.constant 1 : index
    %c0_38 = arith.constant 0 : index
    %c0_39 = arith.constant 0 : index
    %68 = vector.load %arg16[%c1_37, %c0_38, %c0_39] : memref<4x128x8xbf16, #tpu.memory_space<vmem>>, vector<1x128x8xbf16>
    %69 = vector.shape_cast %68 : vector<1x128x8xbf16> to vector<128x8xbf16>
    %cst_40 = arith.constant dense<0.000000e+00> : vector<16x128xf32>
    %70 = tpu.matmul %67, %69, %cst_40 {dimension_numbers = #tpu.dot_dimension_numbers<[1], [1], [0], [0], [0, 0, 1, 0], [], []>} : vector<16x8xbf16>, vector<128x8xbf16>, vector<16x128xf32> -> vector<16x128xf32>
    %cst_41 = arith.constant -1.000000e+30 : f32
    %71 = vector.broadcast %cst_41 : f32 to vector<16x128xf32>
    %72 = arith.select %30, %71, %70 : vector<16x128xi1>, vector<16x128xf32>
    %cst_42 = arith.constant dense<0xFF800000> : vector<16xf32>
    %73 = vector.multi_reduction <maximumf>, %72, %cst_42 [1] : vector<16x128xf32> to vector<16xf32>
    %74 = vector.shape_cast %73 : vector<16xf32> to vector<16x1xf32>
    %75 = vector.broadcast %74 : vector<16x1xf32> to vector<16x128xf32>
    %76 = arith.subf %72, %75 : vector<16x128xf32>
    %77 = math.exp %76 : vector<16x128xf32>
    %cst_43 = arith.constant dense<0.000000e+00> : vector<16xf32>
    %78 = vector.multi_reduction <add>, %77, %cst_43 [1] : vector<16x128xf32> to vector<16xf32>
    %79 = vector.shape_cast %78 : vector<16xf32> to vector<16x1xf32>
    %80 = tpu.reciprocal %79 {approx = true} : vector<16x1xf32> -> vector<16x1xf32>
    %81 = vector.broadcast %80 : vector<16x1xf32> to vector<16x128xf32>
    %82 = arith.mulf %77, %81 : vector<16x128xf32>
    %83 = arith.truncf %82 : vector<16x128xf32> to vector<16x128xbf16>
    %c1_44 = arith.constant 1 : index
    %c0_45 = arith.constant 0 : index
    %c0_46 = arith.constant 0 : index
    %84 = vector.load %arg17[%c1_44, %c0_45, %c0_46] : memref<4x128x8xbf16, #tpu.memory_space<vmem>>, vector<1x128x8xbf16>
    %85 = vector.shape_cast %84 : vector<1x128x8xbf16> to vector<128x8xbf16>
    %cst_47 = arith.constant dense<0.000000e+00> : vector<16x8xf32>
    %86 = tpu.matmul %83, %85, %cst_47 {dimension_numbers = #tpu.dot_dimension_numbers<[1], [0], [0], [1], [0, 0, 1, 1], [], []>} : vector<16x128xbf16>, vector<128x8xbf16>, vector<16x8xf32> -> vector<16x8xf32>
    %87 = arith.truncf %86 : vector<16x8xf32> to vector<16x8xbf16>
    %c0_48 = arith.constant 0 : index
    %c8 = arith.constant 8 : index
    %88 = vector.load %arg18[%c0_48, %c8] : memref<16x32xbf16, #tpu.memory_space<vmem>>, vector<16x8xbf16>
    tpu.vector_store %arg18[%c0_48, %c8], %87 {strides = array<i32>} : memref<16x32xbf16, #tpu.memory_space<vmem>>, vector<16x8xbf16>,
    %c2 = arith.constant 2 : index
    %c0_49 = arith.constant 0 : index
    %c0_50 = arith.constant 0 : index
    %89 = vector.load %arg8[%c2, %c0_49, %c0_50] : memref<4x32x8xbf16, #tpu.memory_space<vmem>>, vector<1x32x8xbf16>
    %90 = vector.shape_cast %89 : vector<1x32x8xbf16> to vector<32x8xbf16>
    %cst_51 = arith.constant dense<0.000000e+00> : vector<16x8xf32>
    %91 = tpu.matmul %27, %90, %cst_51 {dimension_numbers = #tpu.dot_dimension_numbers<[1], [0], [0], [1], [0, 0, 1, 1], [], []>} : vector<16x32xbf16>, vector<32x8xbf16>, vector<16x8xf32> -> vector<16x8xf32>
    %c2_52 = arith.constant 2 : index
    %c0_53 = arith.constant 0 : index
    %c0_54 = arith.constant 0 : index
    %92 = vector.load %arg9[%c2_52, %c0_53, %c0_54] : memref<4x1x8xf32, #tpu.memory_space<vmem>>, vector<1x1x8xf32>
    %93 = vector.shape_cast %92 : vector<1x1x8xf32> to vector<1x8xf32>
    %94 = vector.broadcast %93 : vector<1x8xf32> to vector<16x8xf32>
    %95 = arith.addf %91, %94 : vector<16x8xf32>
    %96 = arith.truncf %95 : vector<16x8xf32> to vector<16x8xbf16>
    %c2_55 = arith.constant 2 : index
    %c0_56 = arith.constant 0 : index
    %c0_57 = arith.constant 0 : index
    %97 = vector.load %arg16[%c2_55, %c0_56, %c0_57] : memref<4x128x8xbf16, #tpu.memory_space<vmem>>, vector<1x128x8xbf16>
    %98 = vector.shape_cast %97 : vector<1x128x8xbf16> to vector<128x8xbf16>
    %cst_58 = arith.constant dense<0.000000e+00> : vector<16x128xf32>
    %99 = tpu.matmul %96, %98, %cst_58 {dimension_numbers = #tpu.dot_dimension_numbers<[1], [1], [0], [0], [0, 0, 1, 0], [], []>} : vector<16x8xbf16>, vector<128x8xbf16>, vector<16x128xf32> -> vector<16x128xf32>
    %cst_59 = arith.constant -1.000000e+30 : f32
    %100 = vector.broadcast %cst_59 : f32 to vector<16x128xf32>
    %101 = arith.select %30, %100, %99 : vector<16x128xi1>, vector<16x128xf32>
    %cst_60 = arith.constant dense<0xFF800000> : vector<16xf32>
    %102 = vector.multi_reduction <maximumf>, %101, %cst_60 [1] : vector<16x128xf32> to vector<16xf32>
    %103 = vector.shape_cast %102 : vector<16xf32> to vector<16x1xf32>
    %104 = vector.broadcast %103 : vector<16x1xf32> to vector<16x128xf32>
    %105 = arith.subf %101, %104 : vector<16x128xf32>
    %106 = math.exp %105 : vector<16x128xf32>
    %cst_61 = arith.constant dense<0.000000e+00> : vector<16xf32>
    %107 = vector.multi_reduction <add>, %106, %cst_61 [1] : vector<16x128xf32> to vector<16xf32>
    %108 = vector.shape_cast %107 : vector<16xf32> to vector<16x1xf32>
    %109 = tpu.reciprocal %108 {approx = true} : vector<16x1xf32> -> vector<16x1xf32>
    %110 = vector.broadcast %109 : vector<16x1xf32> to vector<16x128xf32>
    %111 = arith.mulf %106, %110 : vector<16x128xf32>
    %112 = arith.truncf %111 : vector<16x128xf32> to vector<16x128xbf16>
    %c2_62 = arith.constant 2 : index
    %c0_63 = arith.constant 0 : index
    %c0_64 = arith.constant 0 : index
    %113 = vector.load %arg17[%c2_62, %c0_63, %c0_64] : memref<4x128x8xbf16, #tpu.memory_space<vmem>>, vector<1x128x8xbf16>
    %114 = vector.shape_cast %113 : vector<1x128x8xbf16> to vector<128x8xbf16>
    %cst_65 = arith.constant dense<0.000000e+00> : vector<16x8xf32>
    %115 = tpu.matmul %112, %114, %cst_65 {dimension_numbers = #tpu.dot_dimension_numbers<[1], [0], [0], [1], [0, 0, 1, 1], [], []>} : vector<16x128xbf16>, vector<128x8xbf16>, vector<16x8xf32> -> vector<16x8xf32>
    %116 = arith.truncf %115 : vector<16x8xf32> to vector<16x8xbf16>
    %c0_66 = arith.constant 0 : index
    %c16 = arith.constant 16 : index
    %117 = vector.load %arg18[%c0_66, %c16] : memref<16x32xbf16, #tpu.memory_space<vmem>>, vector<16x8xbf16>
    tpu.vector_store %arg18[%c0_66, %c16], %116 {strides = array<i32>} : memref<16x32xbf16, #tpu.memory_space<vmem>>, vector<16x8xbf16>,
    %c3 = arith.constant 3 : index
    %c0_67 = arith.constant 0 : index
    %c0_68 = arith.constant 0 : index
    %118 = vector.load %arg8[%c3, %c0_67, %c0_68] : memref<4x32x8xbf16, #tpu.memory_space<vmem>>, vector<1x32x8xbf16>
    %119 = vector.shape_cast %118 : vector<1x32x8xbf16> to vector<32x8xbf16>
    %cst_69 = arith.constant dense<0.000000e+00> : vector<16x8xf32>
    %120 = tpu.matmul %27, %119, %cst_69 {dimension_numbers = #tpu.dot_dimension_numbers<[1], [0], [0], [1], [0, 0, 1, 1], [], []>} : vector<16x32xbf16>, vector<32x8xbf16>, vector<16x8xf32> -> vector<16x8xf32>
    %c3_70 = arith.constant 3 : index
    %c0_71 = arith.constant 0 : index
    %c0_72 = arith.constant 0 : index
    %121 = vector.load %arg9[%c3_70, %c0_71, %c0_72] : memref<4x1x8xf32, #tpu.memory_space<vmem>>, vector<1x1x8xf32>
    %122 = vector.shape_cast %121 : vector<1x1x8xf32> to vector<1x8xf32>
    %123 = vector.broadcast %122 : vector<1x8xf32> to vector<16x8xf32>
    %124 = arith.addf %120, %123 : vector<16x8xf32>
    %125 = arith.truncf %124 : vector<16x8xf32> to vector<16x8xbf16>
    %c3_73 = arith.constant 3 : index
    %c0_74 = arith.constant 0 : index
    %c0_75 = arith.constant 0 : index
    %126 = vector.load %arg16[%c3_73, %c0_74, %c0_75] : memref<4x128x8xbf16, #tpu.memory_space<vmem>>, vector<1x128x8xbf16>
    %127 = vector.shape_cast %126 : vector<1x128x8xbf16> to vector<128x8xbf16>
    %cst_76 = arith.constant dense<0.000000e+00> : vector<16x128xf32>
    %128 = tpu.matmul %125, %127, %cst_76 {dimension_numbers = #tpu.dot_dimension_numbers<[1], [1], [0], [0], [0, 0, 1, 0], [], []>} : vector<16x8xbf16>, vector<128x8xbf16>, vector<16x128xf32> -> vector<16x128xf32>
    %cst_77 = arith.constant -1.000000e+30 : f32
    %129 = vector.broadcast %cst_77 : f32 to vector<16x128xf32>
    %130 = arith.select %30, %129, %128 : vector<16x128xi1>, vector<16x128xf32>
    %cst_78 = arith.constant dense<0xFF800000> : vector<16xf32>
    %131 = vector.multi_reduction <maximumf>, %130, %cst_78 [1] : vector<16x128xf32> to vector<16xf32>
    %132 = vector.shape_cast %131 : vector<16xf32> to vector<16x1xf32>
    %133 = vector.broadcast %132 : vector<16x1xf32> to vector<16x128xf32>
    %134 = arith.subf %130, %133 : vector<16x128xf32>
    %135 = math.exp %134 : vector<16x128xf32>
    %cst_79 = arith.constant dense<0.000000e+00> : vector<16xf32>
    %136 = vector.multi_reduction <add>, %135, %cst_79 [1] : vector<16x128xf32> to vector<16xf32>
    %137 = vector.shape_cast %136 : vector<16xf32> to vector<16x1xf32>
    %138 = tpu.reciprocal %137 {approx = true} : vector<16x1xf32> -> vector<16x1xf32>
    %139 = vector.broadcast %138 : vector<16x1xf32> to vector<16x128xf32>
    %140 = arith.mulf %135, %139 : vector<16x128xf32>
    %141 = arith.truncf %140 : vector<16x128xf32> to vector<16x128xbf16>
    %c3_80 = arith.constant 3 : index
    %c0_81 = arith.constant 0 : index
    %c0_82 = arith.constant 0 : index
    %142 = vector.load %arg17[%c3_80, %c0_81, %c0_82] : memref<4x128x8xbf16, #tpu.memory_space<vmem>>, vector<1x128x8xbf16>
    %143 = vector.shape_cast %142 : vector<1x128x8xbf16> to vector<128x8xbf16>
    %cst_83 = arith.constant dense<0.000000e+00> : vector<16x8xf32>
    %144 = tpu.matmul %141, %143, %cst_83 {dimension_numbers = #tpu.dot_dimension_numbers<[1], [0], [0], [1], [0, 0, 1, 1], [], []>} : vector<16x128xbf16>, vector<128x8xbf16>, vector<16x8xf32> -> vector<16x8xf32>
    %145 = arith.truncf %144 : vector<16x8xf32> to vector<16x8xbf16>
    %c0_84 = arith.constant 0 : index
    %c24 = arith.constant 24 : index
    %146 = vector.load %arg18[%c0_84, %c24] : memref<16x32xbf16, #tpu.memory_space<vmem>>, vector<16x8xbf16>
    tpu.vector_store %arg18[%c0_84, %c24], %145 {strides = array<i32>} : memref<16x32xbf16, #tpu.memory_space<vmem>>, vector<16x8xbf16>,
    %c0_85 = arith.constant 0 : index
    %c0_86 = arith.constant 0 : index
    %147 = vector.load %arg18[%c0_85, %c0_86] : memref<16x32xbf16, #tpu.memory_space<vmem>>, vector<16x32xbf16>
    %c0_87 = arith.constant 0 : index
    %c0_88 = arith.constant 0 : index
    %148 = vector.load %arg12[%c0_87, %c0_88] : memref<32x32xbf16, #tpu.memory_space<vmem>>, vector<32x32xbf16>
    %cst_89 = arith.constant dense<0.000000e+00> : vector<16x32xf32>
    %149 = tpu.matmul %147, %148, %cst_89 {dimension_numbers = #tpu.dot_dimension_numbers<[1], [0], [0], [1], [0, 0, 1, 1], [], []>} : vector<16x32xbf16>, vector<32x32xbf16>, vector<16x32xf32> -> vector<16x32xf32>
    %c0_90 = arith.constant 0 : index
    %c0_91 = arith.constant 0 : index
    %150 = vector.load %arg13[%c0_90, %c0_91] : memref<1x32xf32, #tpu.memory_space<vmem>>, vector<1x32xf32>
    %151 = vector.broadcast %150 : vector<1x32xf32> to vector<16x32xf32>
    %152 = arith.addf %149, %151 : vector<16x32xf32>
    %c0_92 = arith.constant 0 : index
    %c0_93 = arith.constant 0 : index
    %153 = vector.load %arg14[%c0_92, %c0_93] : memref<1x32xf32, #tpu.memory_space<vmem>>, vector<1x32xf32>
    %154 = vector.broadcast %153 : vector<1x32xf32> to vector<16x32xf32>
    %155 = arith.mulf %154, %152 : vector<16x32xf32>
    %156 = arith.addf %26, %155 : vector<16x32xf32>
    %c0_94 = arith.constant 0 : index
    %c0_95 = arith.constant 0 : index
    %c0_96 = arith.constant 0 : index
    %157 = vector.load %arg15[%c0_94, %c0_95, %c0_96] : memref<1x16x32xf32, #tpu.memory_space<vmem>>, vector<1x16x32xf32>
    %158 = vector.shape_cast %157 : vector<1x16x32xf32> to vector<16x32xf32>
    %159 = vector.shape_cast %156 : vector<16x32xf32> to vector<1x16x32xf32>
    tpu.vector_store %arg15[%c0_94, %c0_95, %c0_96], %159 {strides = array<i32>} : memref<1x16x32xf32, #tpu.memory_space<vmem>>, vector<1x16x32xf32>,
    return
  }
  func.func @transform_0(%arg0: i32, %arg1: i32) -> (i32, i32, i32) {
    %c0_i32 = arith.constant 0 : i32
    %c0_i32_0 = arith.constant 0 : i32
    return %arg0, %arg1, %c0_i32 : i32, i32, i32
  }
  func.func @transform_1(%arg0: i32, %arg1: i32) -> (i32, i32, i32) {
    %c0_i32 = arith.constant 0 : i32
    %c0_i32_0 = arith.constant 0 : i32
    %c0_i32_1 = arith.constant 0 : i32
    return %arg0, %c0_i32, %c0_i32_0 : i32, i32, i32
  }
  func.func @transform_2(%arg0: i32, %arg1: i32) -> (i32, i32) {
    %c0_i32 = arith.constant 0 : i32
    %c0_i32_0 = arith.constant 0 : i32
    %c0_i32_1 = arith.constant 0 : i32
    return %c0_i32, %c0_i32_0 : i32, i32
  }
  func.func @transform_3(%arg0: i32, %arg1: i32) -> (i32, i32) {
    %c0_i32 = arith.constant 0 : i32
    %c0_i32_0 = arith.constant 0 : i32
    %c0_i32_1 = arith.constant 0 : i32
    return %c0_i32, %c0_i32_0 : i32, i32
  }
  func.func @transform_4(%arg0: i32, %arg1: i32) -> (i32, i32) {
    %c0_i32 = arith.constant 0 : i32
    %c0_i32_0 = arith.constant 0 : i32
    %c0_i32_1 = arith.constant 0 : i32
    return %c0_i32, %c0_i32_0 : i32, i32
  }
  func.func @transform_5(%arg0: i32, %arg1: i32) -> (i32, i32) {
    %c0_i32 = arith.constant 0 : i32
    %c0_i32_0 = arith.constant 0 : i32
    %c0_i32_1 = arith.constant 0 : i32
    return %c0_i32, %c0_i32_0 : i32, i32
  }
  func.func @transform_6(%arg0: i32, %arg1: i32) -> (i32, i32, i32) {
    %c0_i32 = arith.constant 0 : i32
    %c0_i32_0 = arith.constant 0 : i32
    %c0_i32_1 = arith.constant 0 : i32
    %c0_i32_2 = arith.constant 0 : i32
    return %c0_i32, %c0_i32_0, %c0_i32_1 : i32, i32, i32
  }
  func.func @transform_7(%arg0: i32, %arg1: i32) -> (i32, i32, i32) {
    %c0_i32 = arith.constant 0 : i32
    %c0_i32_0 = arith.constant 0 : i32
    %c0_i32_1 = arith.constant 0 : i32
    %c0_i32_2 = arith.constant 0 : i32
    return %c0_i32, %c0_i32_0, %c0_i32_1 : i32, i32, i32
  }
  func.func @transform_8(%arg0: i32, %arg1: i32) -> (i32, i32) {
    %c0_i32 = arith.constant 0 : i32
    %c0_i32_0 = arith.constant 0 : i32
    %c0_i32_1 = arith.constant 0 : i32
    return %c0_i32, %c0_i32_0 : i32, i32
  }
  func.func @transform_9(%arg0: i32, %arg1: i32) -> (i32, i32) {
    %c0_i32 = arith.constant 0 : i32
    %c0_i32_0 = arith.constant 0 : i32
    %c0_i32_1 = arith.constant 0 : i32
    return %c0_i32, %c0_i32_0 : i32, i32
  }
  func.func @transform_10(%arg0: i32, %arg1: i32) -> (i32, i32) {
    %c0_i32 = arith.constant 0 : i32
    %c0_i32_0 = arith.constant 0 : i32
    %c0_i32_1 = arith.constant 0 : i32
    return %c0_i32, %c0_i32_0 : i32, i32
  }
  func.func @transform_11(%arg0: i32, %arg1: i32) -> (i32, i32) {
    %c0_i32 = arith.constant 0 : i32
    %c0_i32_0 = arith.constant 0 : i32
    %c0_i32_1 = arith.constant 0 : i32
    return %c0_i32, %c0_i32_0 : i32, i32
  }
  func.func @transform_12(%arg0: i32, %arg1: i32) -> (i32, i32) {
    %c0_i32 = arith.constant 0 : i32
    %c0_i32_0 = arith.constant 0 : i32
    %c0_i32_1 = arith.constant 0 : i32
    return %c0_i32, %c0_i32_0 : i32, i32
  }
  func.func @transform_13(%arg0: i32, %arg1: i32) -> (i32, i32, i32) {
    %c0_i32 = arith.constant 0 : i32
    %c0_i32_0 = arith.constant 0 : i32
    return %arg0, %arg1, %c0_i32 : i32, i32, i32
  }
}

module attributes {stable_mosaic.version = 11 : i64} {
  func.func @kernel(%arg0: i32, %arg1: i32, %arg2: memref<1x16x32xf32, #tpu.memory_space<vmem>>, %arg3: memref<1x128x32xf32, #tpu.memory_space<vmem>>, %arg4: memref<1x32xf32, #tpu.memory_space<vmem>>, %arg5: memref<1x32xf32, #tpu.memory_space<vmem>>, %arg6: memref<1x32xf32, #tpu.memory_space<vmem>>, %arg7: memref<1x32xf32, #tpu.memory_space<vmem>>, %arg8: memref<4x32x8xbf16, #tpu.memory_space<vmem>>, %arg9: memref<4x1x8xf32, #tpu.memory_space<vmem>>, %arg10: memref<32x64xbf16, #tpu.memory_space<vmem>>, %arg11: memref<1x64xf32, #tpu.memory_space<vmem>>, %arg12: memref<32x32xbf16, #tpu.memory_space<vmem>>, %arg13: memref<1x32xf32, #tpu.memory_space<vmem>>, %arg14: memref<1x32xf32, #tpu.memory_space<vmem>>, %arg15: memref<1x16x32xf32, #tpu.memory_space<vmem>>, %arg16: memref<4x128x8xbf16, #tpu.memory_space<vmem>>, %arg17: memref<4x128x8xbf16, #tpu.memory_space<vmem>>, %arg18: memref<16x32xbf16, #tpu.memory_space<vmem>>) attributes {dimension_semantics = [#tpu.dimension_semantics<parallel>, #tpu.dimension_semantics<arbitrary>], iteration_bounds = array<i64: 2, 1>, scalar_prefetch = 0 : i64, scratch_operands = 3 : i64, tpu.core_type = #tpu.core_type<tc>, window_params = [{transform_indices = @transform_0, window_bounds = array<i64: 1, 16, 32>}, {transform_indices = @transform_1, window_bounds = array<i64: 1, 128, 32>}, {pipeline_mode = #tpu.pipeline_mode<synchronous>, transform_indices = @transform_2, window_bounds = array<i64: 1, 32>}, {pipeline_mode = #tpu.pipeline_mode<synchronous>, transform_indices = @transform_3, window_bounds = array<i64: 1, 32>}, {pipeline_mode = #tpu.pipeline_mode<synchronous>, transform_indices = @transform_4, window_bounds = array<i64: 1, 32>}, {pipeline_mode = #tpu.pipeline_mode<synchronous>, transform_indices = @transform_5, window_bounds = array<i64: 1, 32>}, {pipeline_mode = #tpu.pipeline_mode<synchronous>, transform_indices = @transform_6, window_bounds = array<i64: 4, 32, 8>}, {pipeline_mode = #tpu.pipeline_mode<synchronous>, transform_indices = @transform_7, window_bounds = array<i64: 4, 1, 8>}, {pipeline_mode = #tpu.pipeline_mode<synchronous>, transform_indices = @transform_8, window_bounds = array<i64: 32, 64>}, {pipeline_mode = #tpu.pipeline_mode<synchronous>, transform_indices = @transform_9, window_bounds = array<i64: 1, 64>}, {pipeline_mode = #tpu.pipeline_mode<synchronous>, transform_indices = @transform_10, window_bounds = array<i64: 32, 32>}, {pipeline_mode = #tpu.pipeline_mode<synchronous>, transform_indices = @transform_11, window_bounds = array<i64: 1, 32>}, {pipeline_mode = #tpu.pipeline_mode<synchronous>, transform_indices = @transform_12, window_bounds = array<i64: 1, 32>}, {transform_indices = @transform_13, window_bounds = array<i64: 1, 16, 32>}]} {
    %c0_i32 = arith.constant 0 : i32
    %0 = arith.cmpi eq, %arg1, %c0_i32 : i32
    %1 = arith.extui %0 : i1 to i32
    %c0_i32_0 = arith.constant 0 : i32
    %2 = arith.cmpi ne, %1, %c0_i32_0 : i32
    scf.if %2 {
      %c0_97 = arith.constant 0 : index
      %c0_98 = arith.constant 0 : index
      %c0_99 = arith.constant 0 : index
      %160 = vector.load %arg3[%c0_97, %c0_98, %c0_99] : memref<1x128x32xf32, #tpu.memory_space<vmem>>, vector<1x128x32xf32>
      %161 = vector.shape_cast %160 : vector<1x128x32xf32> to vector<128x32xf32>
      %c0_100 = arith.constant 0 : index
      %c0_101 = arith.constant 0 : index
      %162 = vector.load %arg6[%c0_100, %c0_101] : memref<1x32xf32, #tpu.memory_space<vmem>>, vector<1x32xf32>
      %c0_102 = arith.constant 0 : index
      %c0_103 = arith.constant 0 : index
      %163 = vector.load %arg7[%c0_102, %c0_103] : memref<1x32xf32, #tpu.memory_space<vmem>>, vector<1x32xf32>
      %cst_104 = arith.constant dense<0.000000e+00> : vector<128xf32>
      %164 = vector.multi_reduction <add>, %161, %cst_104 [1] : vector<128x32xf32> to vector<128xf32>
      %165 = vector.shape_cast %164 : vector<128xf32> to vector<128x1xf32>
      %cst_105 = arith.constant 3.200000e+01 : f32
      %166 = vector.broadcast %cst_105 : f32 to vector<128x1xf32>
      %167 = arith.divf %165, %166 : vector<128x1xf32>
      %168 = vector.broadcast %167 : vector<128x1xf32> to vector<128x32xf32>
      %169 = arith.subf %161, %168 : vector<128x32xf32>
      %170 = arith.mulf %169, %169 : vector<128x32xf32>
      %cst_106 = arith.constant dense<0.000000e+00> : vector<128xf32>
      %171 = vector.multi_reduction <add>, %170, %cst_106 [1] : vector<128x32xf32> to vector<128xf32>
      %172 = vector.shape_cast %171 : vector<128xf32> to vector<128x1xf32>
      %cst_107 = arith.constant 3.200000e+01 : f32
      %173 = vector.broadcast %cst_107 : f32 to vector<128x1xf32>
      %174 = arith.divf %172, %173 : vector<128x1xf32>
      %cst_108 = arith.constant 9.99999974E-6 : f32
      %175 = vector.broadcast %cst_108 : f32 to vector<128x1xf32>
      %176 = arith.addf %174, %175 : vector<128x1xf32>
      %177 = math.rsqrt %176 : vector<128x1xf32>
      %178 = vector.broadcast %177 : vector<128x1xf32> to vector<128x32xf32>
      %179 = arith.mulf %169, %178 : vector<128x32xf32>
      %180 = vector.broadcast %162 : vector<1x32xf32> to vector<128x32xf32>
      %181 = arith.mulf %179, %180 : vector<128x32xf32>
      %182 = vector.broadcast %163 : vector<1x32xf32> to vector<128x32xf32>
      %183 = arith.addf %181, %182 : vector<128x32xf32>
      %184 = arith.truncf %183 : vector<128x32xf32> to vector<128x32xbf16>
      %c0_109 = arith.constant 0 : index
      %c0_110 = arith.constant 0 : index
      %185 = vector.load %arg10[%c0_109, %c0_110] : memref<32x64xbf16, #tpu.memory_space<vmem>>, vector<32x64xbf16>
      %cst_111 = arith.constant dense<0.000000e+00> : vector<128x64xf32>
      %186 = tpu.matmul %184, %185, %cst_111 {dimension_numbers = #tpu.dot_dimension_numbers<[1], [0], [0], [1], [0, 0, 1, 1], [], []>} : vector<128x32xbf16>, vector<32x64xbf16>, vector<128x64xf32> -> vector<128x64xf32>
      %c0_112 = arith.constant 0 : index
      %c0_113 = arith.constant 0 : index
      %187 = vector.load %arg11[%c0_112, %c0_113] : memref<1x64xf32, #tpu.memory_space<vmem>>, vector<1x64xf32>
      %188 = vector.broadcast %187 : vector<1x64xf32> to vector<128x64xf32>
      %189 = arith.addf %186, %188 : vector<128x64xf32>
      %190 = arith.truncf %189 : vector<128x64xf32> to vector<128x64xbf16>
      %191 = vector.extract_strided_slice %190 {offsets = [0, 0], sizes = [128, 8], strides = [1, 1]} : vector<128x64xbf16> to vector<128x8xbf16>
      %c0_114 = arith.constant 0 : index
      %c0_115 = arith.constant 0 : index
      %c0_116 = arith.constant 0 : index
      %192 = vector.load %arg16[%c0_114, %c0_115, %c0_116] : memref<4x128x8xbf16, #tpu.memory_space<vmem>>, vector<1x128x8xbf16>
      %193 = vector.shape_cast %192 : vector<1x128x8xbf16> to vector<128x8xbf16>
      %194 = vector.shape_cast %191 : vector<128x8xbf16> to vector<1x128x8xbf16>
      tpu.vector_store %arg16[%c0_114, %c0_115, %c0_116], %194 {strides = array<i32>} : memref<4x128x8xbf16, #tpu.memory_space<vmem>>, vector<1x128x8xbf16>,
      %195 = vector.extract_strided_slice %190 {offsets = [0, 32], sizes = [128, 8], strides = [1, 1]} : vector<128x64xbf16> to vector<128x8xbf16>
      %c0_117 = arith.constant 0 : index
      %c0_118 = arith.constant 0 : index
      %c0_119 = arith.constant 0 : index
      %196 = vector.load %arg17[%c0_117, %c0_118, %c0_119] : memref<4x128x8xbf16, #tpu.memory_space<vmem>>, vector<1x128x8xbf16>
      %197 = vector.shape_cast %196 : vector<1x128x8xbf16> to vector<128x8xbf16>
      %198 = vector.shape_cast %195 : vector<128x8xbf16> to vector<1x128x8xbf16>
      tpu.vector_store %arg17[%c0_117, %c0_118, %c0_119], %198 {strides = array<i32>} : memref<4x128x8xbf16, #tpu.memory_space<vmem>>, vector<1x128x8xbf16>,
      %199 = vector.extract_strided_slice %190 {offsets = [0, 8], sizes = [128, 8], strides = [1, 1]} : vector<128x64xbf16> to vector<128x8xbf16>
      %c1_120 = arith.constant 1 : index
      %c0_121 = arith.constant 0 : index
      %c0_122 = arith.constant 0 : index
      %200 = vector.load %arg16[%c1_120, %c0_121, %c0_122] : memref<4x128x8xbf16, #tpu.memory_space<vmem>>, vector<1x128x8xbf16>
      %201 = vector.shape_cast %200 : vector<1x128x8xbf16> to vector<128x8xbf16>
      %202 = vector.shape_cast %199 : vector<128x8xbf16> to vector<1x128x8xbf16>
      tpu.vector_store %arg16[%c1_120, %c0_121, %c0_122], %202 {strides = array<i32>} : memref<4x128x8xbf16, #tpu.memory_space<vmem>>, vector<1x128x8xbf16>,
      %203 = vector.extract_strided_slice %190 {offsets = [0, 40], sizes = [128, 8], strides = [1, 1]} : vector<128x64xbf16> to vector<128x8xbf16>
      %c1_123 = arith.constant 1 : index
      %c0_124 = arith.constant 0 : index
      %c0_125 = arith.constant 0 : index
      %204 = vector.load %arg17[%c1_123, %c0_124, %c0_125] : memref<4x128x8xbf16, #tpu.memory_space<vmem>>, vector<1x128x8xbf16>
      %205 = vector.shape_cast %204 : vector<1x128x8xbf16> to vector<128x8xbf16>
      %206 = vector.shape_cast %203 : vector<128x8xbf16> to vector<1x128x8xbf16>
      tpu.vector_store %arg17[%c1_123, %c0_124, %c0_125], %206 {strides = array<i32>} : memref<4x128x8xbf16, #tpu.memory_space<vmem>>, vector<1x128x8xbf16>,
      %207 = vector.extract_strided_slice %190 {offsets = [0, 16], sizes = [128, 8], strides = [1, 1]} : vector<128x64xbf16> to vector<128x8xbf16>
      %c2_126 = arith.constant 2 : index
      %c0_127 = arith.constant 0 : index
      %c0_128 = arith.constant 0 : index
      %208 = vector.load %arg16[%c2_126, %c0_127, %c0_128] : memref<4x128x8xbf16, #tpu.memory_space<vmem>>, vector<1x128x8xbf16>
      %209 = vector.shape_cast %208 : vector<1x128x8xbf16> to vector<128x8xbf16>
      %210 = vector.shape_cast %207 : vector<128x8xbf16> to vector<1x128x8xbf16>
      tpu.vector_store %arg16[%c2_126, %c0_127, %c0_128], %210 {strides = array<i32>} : memref<4x128x8xbf16, #tpu.memory_space<vmem>>, vector<1x128x8xbf16>,
      %211 = vector.extract_strided_slice %190 {offsets = [0, 48], sizes = [128, 8], strides = [1, 1]} : vector<128x64xbf16> to vector<128x8xbf16>
      %c2_129 = arith.constant 2 : index
      %c0_130 = arith.constant 0 : index
      %c0_131 = arith.constant 0 : index
      %212 = vector.load %arg17[%c2_129, %c0_130, %c0_131] : memref<4x128x8xbf16, #tpu.memory_space<vmem>>, vector<1x128x8xbf16>
      %213 = vector.shape_cast %212 : vector<1x128x8xbf16> to vector<128x8xbf16>
      %214 = vector.shape_cast %211 : vector<128x8xbf16> to vector<1x128x8xbf16>
      tpu.vector_store %arg17[%c2_129, %c0_130, %c0_131], %214 {strides = array<i32>} : memref<4x128x8xbf16, #tpu.memory_space<vmem>>, vector<1x128x8xbf16>,
      %215 = vector.extract_strided_slice %190 {offsets = [0, 24], sizes = [128, 8], strides = [1, 1]} : vector<128x64xbf16> to vector<128x8xbf16>
      %c3_132 = arith.constant 3 : index
      %c0_133 = arith.constant 0 : index
      %c0_134 = arith.constant 0 : index
      %216 = vector.load %arg16[%c3_132, %c0_133, %c0_134] : memref<4x128x8xbf16, #tpu.memory_space<vmem>>, vector<1x128x8xbf16>
      %217 = vector.shape_cast %216 : vector<1x128x8xbf16> to vector<128x8xbf16>
      %218 = vector.shape_cast %215 : vector<128x8xbf16> to vector<1x128x8xbf16>
      tpu.vector_store %arg16[%c3_132, %c0_133, %c0_134], %218 {strides = array<i32>} : memref<4x128x8xbf16, #tpu.memory_space<vmem>>, vector<1x128x8xbf16>,
      %219 = vector.extract_strided_slice %190 {offsets = [0, 56], sizes = [128, 8], strides = [1, 1]} : vector<128x64xbf16> to vector<128x8xbf16>
      %c3_135 = arith.constant 3 : index
      %c0_136 = arith.constant 0 : index
      %c0_137 = arith.constant 0 : index
      %220 = vector.load %arg17[%c3_135, %c0_136, %c0_137] : memref<4x128x8xbf16, #tpu.memory_space<vmem>>, vector<1x128x8xbf16>
      %221 = vector.shape_cast %220 : vector<1x128x8xbf16> to vector<128x8xbf16>
      %222 = vector.shape_cast %219 : vector<128x8xbf16> to vector<1x128x8xbf16>
      tpu.vector_store %arg17[%c3_135, %c0_136, %c0_137], %222 {strides = array<i32>} : memref<4x128x8xbf16, #tpu.memory_space<vmem>>, vector<1x128x8xbf16>,
    } else {
    }
    %c0 = arith.constant 0 : index
    %c0_1 = arith.constant 0 : index
    %c0_2 = arith.constant 0 : index
    %3 = vector.load %arg2[%c0, %c0_1, %c0_2] : memref<1x16x32xf32, #tpu.memory_space<vmem>>, vector<1x16x32xf32>
    %4 = vector.shape_cast %3 : vector<1x16x32xf32> to vector<16x32xf32>
    %c0_3 = arith.constant 0 : index
    %c0_4 = arith.constant 0 : index
    %5 = vector.load %arg4[%c0_3, %c0_4] : memref<1x32xf32, #tpu.memory_space<vmem>>, vector<1x32xf32>
    %c0_5 = arith.constant 0 : index
    %c0_6 = arith.constant 0 : index
    %6 = vector.load %arg5[%c0_5, %c0_6] : memref<1x32xf32, #tpu.memory_space<vmem>>, vector<1x32xf32>
    %cst = arith.constant dense<0.000000e+00> : vector<16xf32>
    %7 = vector.multi_reduction <add>, %4, %cst [1] : vector<16x32xf32> to vector<16xf32>
    %8 = vector.shape_cast %7 : vector<16xf32> to vector<16x1xf32>
    %cst_7 = arith.constant 3.200000e+01 : f32
    %9 = vector.broadcast %cst_7 : f32 to vector<16x1xf32>
    %10 = arith.divf %8, %9 : vector<16x1xf32>
    %11 = vector.broadcast %10 : vector<16x1xf32> to vector<16x32xf32>
    %12 = arith.subf %4, %11 : vector<16x32xf32>
    %13 = arith.mulf %12, %12 : vector<16x32xf32>
    %cst_8 = arith.constant dense<0.000000e+00> : vector<16xf32>
    %14 = vector.multi_reduction <add>, %13, %cst_8 [1] : vector<16x32xf32> to vector<16xf32>
    %15 = vector.shape_cast %14 : vector<16xf32> to vector<16x1xf32>
    %cst_9 = arith.constant 3.200000e+01 : f32
    %16 = vector.broadcast %cst_9 : f32 to vector<16x1xf32>
    %17 = arith.divf %15, %16 : vector<16x1xf32>
    %cst_10 = arith.constant 9.99999974E-6 : f32
    %18 = vector.broadcast %cst_10 : f32 to vector<16x1xf32>
    %19 = arith.addf %17, %18 : vector<16x1xf32>
    %20 = math.rsqrt %19 : vector<16x1xf32>
    %21 = vector.broadcast %20 : vector<16x1xf32> to vector<16x32xf32>
    %22 = arith.mulf %12, %21 : vector<16x32xf32>
    %23 = vector.broadcast %5 : vector<1x32xf32> to vector<16x32xf32>
    %24 = arith.mulf %22, %23 : vector<16x32xf32>
    %25 = vector.broadcast %6 : vector<1x32xf32> to vector<16x32xf32>
    %26 = arith.addf %24, %25 : vector<16x32xf32>
    %27 = arith.truncf %26 : vector<16x32xf32> to vector<16x32xbf16>
    %28 = tpu.iota {dimensions = array<i32: 1>} : vector<16x128xi32>
    %c8_i32 = arith.constant 8 : i32
    %29 = vector.broadcast %c8_i32 : i32 to vector<16x128xi32>
    %30 = arith.cmpi sge, %28, %29 : vector<16x128xi32>
    %c0_11 = arith.constant 0 : index
    %c0_12 = arith.constant 0 : index
    %c0_13 = arith.constant 0 : index
    %31 = vector.load %arg8[%c0_11, %c0_12, %c0_13] : memref<4x32x8xbf16, #tpu.memory_space<vmem>>, vector<1x32x8xbf16>
    %32 = vector.shape_cast %31 : vector<1x32x8xbf16> to vector<32x8xbf16>
    %cst_14 = arith.constant dense<0.000000e+00> : vector<16x8xf32>
    %33 = tpu.matmul %27, %32, %cst_14 {dimension_numbers = #tpu.dot_dimension_numbers<[1], [0], [0], [1], [0, 0, 1, 1], [], []>} : vector<16x32xbf16>, vector<32x8xbf16>, vector<16x8xf32> -> vector<16x8xf32>
    %c0_15 = arith.constant 0 : index
    %c0_16 = arith.constant 0 : index
    %c0_17 = arith.constant 0 : index
    %34 = vector.load %arg9[%c0_15, %c0_16, %c0_17] : memref<4x1x8xf32, #tpu.memory_space<vmem>>, vector<1x1x8xf32>
    %35 = vector.shape_cast %34 : vector<1x1x8xf32> to vector<1x8xf32>
    %36 = vector.broadcast %35 : vector<1x8xf32> to vector<16x8xf32>
    %37 = arith.addf %33, %36 : vector<16x8xf32>
    %38 = arith.truncf %37 : vector<16x8xf32> to vector<16x8xbf16>
    %c0_18 = arith.constant 0 : index
    %c0_19 = arith.constant 0 : index
    %c0_20 = arith.constant 0 : index
    %39 = vector.load %arg16[%c0_18, %c0_19, %c0_20] : memref<4x128x8xbf16, #tpu.memory_space<vmem>>, vector<1x128x8xbf16>
    %40 = vector.shape_cast %39 : vector<1x128x8xbf16> to vector<128x8xbf16>
    %cst_21 = arith.constant dense<0.000000e+00> : vector<16x128xf32>
    %41 = tpu.matmul %38, %40, %cst_21 {dimension_numbers = #tpu.dot_dimension_numbers<[1], [1], [0], [0], [0, 0, 1, 0], [], []>} : vector<16x8xbf16>, vector<128x8xbf16>, vector<16x128xf32> -> vector<16x128xf32>
    %cst_22 = arith.constant -1.000000e+30 : f32
    %42 = vector.broadcast %cst_22 : f32 to vector<16x128xf32>
    %43 = arith.select %30, %42, %41 : vector<16x128xi1>, vector<16x128xf32>
    %cst_23 = arith.constant dense<0xFF800000> : vector<16xf32>
    %44 = vector.multi_reduction <maximumf>, %43, %cst_23 [1] : vector<16x128xf32> to vector<16xf32>
    %45 = vector.shape_cast %44 : vector<16xf32> to vector<16x1xf32>
    %46 = vector.broadcast %45 : vector<16x1xf32> to vector<16x128xf32>
    %47 = arith.subf %43, %46 : vector<16x128xf32>
    %48 = math.exp %47 : vector<16x128xf32>
    %cst_24 = arith.constant dense<0.000000e+00> : vector<16xf32>
    %49 = vector.multi_reduction <add>, %48, %cst_24 [1] : vector<16x128xf32> to vector<16xf32>
    %50 = vector.shape_cast %49 : vector<16xf32> to vector<16x1xf32>
    %51 = tpu.reciprocal %50 {approx = true} : vector<16x1xf32> -> vector<16x1xf32>
    %52 = vector.broadcast %51 : vector<16x1xf32> to vector<16x128xf32>
    %53 = arith.mulf %48, %52 : vector<16x128xf32>
    %54 = arith.truncf %53 : vector<16x128xf32> to vector<16x128xbf16>
    %c0_25 = arith.constant 0 : index
    %c0_26 = arith.constant 0 : index
    %c0_27 = arith.constant 0 : index
    %55 = vector.load %arg17[%c0_25, %c0_26, %c0_27] : memref<4x128x8xbf16, #tpu.memory_space<vmem>>, vector<1x128x8xbf16>
    %56 = vector.shape_cast %55 : vector<1x128x8xbf16> to vector<128x8xbf16>
    %cst_28 = arith.constant dense<0.000000e+00> : vector<16x8xf32>
    %57 = tpu.matmul %54, %56, %cst_28 {dimension_numbers = #tpu.dot_dimension_numbers<[1], [0], [0], [1], [0, 0, 1, 1], [], []>} : vector<16x128xbf16>, vector<128x8xbf16>, vector<16x8xf32> -> vector<16x8xf32>
    %58 = arith.truncf %57 : vector<16x8xf32> to vector<16x8xbf16>
    %c0_29 = arith.constant 0 : index
    %c0_30 = arith.constant 0 : index
    %59 = vector.load %arg18[%c0_29, %c0_30] : memref<16x32xbf16, #tpu.memory_space<vmem>>, vector<16x8xbf16>
    tpu.vector_store %arg18[%c0_29, %c0_30], %58 {strides = array<i32>} : memref<16x32xbf16, #tpu.memory_space<vmem>>, vector<16x8xbf16>,
    %c1 = arith.constant 1 : index
    %c0_31 = arith.constant 0 : index
    %c0_32 = arith.constant 0 : index
    %60 = vector.load %arg8[%c1, %c0_31, %c0_32] : memref<4x32x8xbf16, #tpu.memory_space<vmem>>, vector<1x32x8xbf16>
    %61 = vector.shape_cast %60 : vector<1x32x8xbf16> to vector<32x8xbf16>
    %cst_33 = arith.constant dense<0.000000e+00> : vector<16x8xf32>
    %62 = tpu.matmul %27, %61, %cst_33 {dimension_numbers = #tpu.dot_dimension_numbers<[1], [0], [0], [1], [0, 0, 1, 1], [], []>} : vector<16x32xbf16>, vector<32x8xbf16>, vector<16x8xf32> -> vector<16x8xf32>
    %c1_34 = arith.constant 1 : index
    %c0_35 = arith.constant 0 : index
    %c0_36 = arith.constant 0 : index
    %63 = vector.load %arg9[%c1_34, %c0_35, %c0_36] : memref<4x1x8xf32, #tpu.memory_space<vmem>>, vector<1x1x8xf32>
    %64 = vector.shape_cast %63 : vector<1x1x8xf32> to vector<1x8xf32>
    %65 = vector.broadcast %64 : vector<1x8xf32> to vector<16x8xf32>
    %66 = arith.addf %62, %65 : vector<16x8xf32>
    %67 = arith.truncf %66 : vector<16x8xf32> to vector<16x8xbf16>
    %c1_37 = arith.constant 1 : index
    %c0_38 = arith.constant 0 : index
    %c0_39 = arith.constant 0 : index
    %68 = vector.load %arg16[%c1_37, %c0_38, %c0_39] : memref<4x128x8xbf16, #tpu.memory_space<vmem>>, vector<1x128x8xbf16>
    %69 = vector.shape_cast %68 : vector<1x128x8xbf16> to vector<128x8xbf16>
    %cst_40 = arith.constant dense<0.000000e+00> : vector<16x128xf32>
    %70 = tpu.matmul %67, %69, %cst_40 {dimension_numbers = #tpu.dot_dimension_numbers<[1], [1], [0], [0], [0, 0, 1, 0], [], []>} : vector<16x8xbf16>, vector<128x8xbf16>, vector<16x128xf32> -> vector<16x128xf32>
    %cst_41 = arith.constant -1.000000e+30 : f32
    %71 = vector.broadcast %cst_41 : f32 to vector<16x128xf32>
    %72 = arith.select %30, %71, %70 : vector<16x128xi1>, vector<16x128xf32>
    %cst_42 = arith.constant dense<0xFF800000> : vector<16xf32>
    %73 = vector.multi_reduction <maximumf>, %72, %cst_42 [1] : vector<16x128xf32> to vector<16xf32>
    %74 = vector.shape_cast %73 : vector<16xf32> to vector<16x1xf32>
    %75 = vector.broadcast %74 : vector<16x1xf32> to vector<16x128xf32>
    %76 = arith.subf %72, %75 : vector<16x128xf32>
    %77 = math.exp %76 : vector<16x128xf32>
    %cst_43 = arith.constant dense<0.000000e+00> : vector<16xf32>
    %78 = vector.multi_reduction <add>, %77, %cst_43 [1] : vector<16x128xf32> to vector<16xf32>
    %79 = vector.shape_cast %78 : vector<16xf32> to vector<16x1xf32>
    %80 = tpu.reciprocal %79 {approx = true} : vector<16x1xf32> -> vector<16x1xf32>
    %81 = vector.broadcast %80 : vector<16x1xf32> to vector<16x128xf32>
    %82 = arith.mulf %77, %81 : vector<16x128xf32>
    %83 = arith.truncf %82 : vector<16x128xf32> to vector<16x128xbf16>
    %c1_44 = arith.constant 1 : index
    %c0_45 = arith.constant 0 : index
    %c0_46 = arith.constant 0 : index
    %84 = vector.load %arg17[%c1_44, %c0_45, %c0_46] : memref<4x128x8xbf16, #tpu.memory_space<vmem>>, vector<1x128x8xbf16>
    %85 = vector.shape_cast %84 : vector<1x128x8xbf16> to vector<128x8xbf16>
    %cst_47 = arith.constant dense<0.000000e+00> : vector<16x8xf32>
    %86 = tpu.matmul %83, %85, %cst_47 {dimension_numbers = #tpu.dot_dimension_numbers<[1], [0], [0], [1], [0, 0, 1, 1], [], []>} : vector<16x128xbf16>, vector<128x8xbf16>, vector<16x8xf32> -> vector<16x8xf32>
    %87 = arith.truncf %86 : vector<16x8xf32> to vector<16x8xbf16>
    %c0_48 = arith.constant 0 : index
    %c8 = arith.constant 8 : index
    %88 = vector.load %arg18[%c0_48, %c8] : memref<16x32xbf16, #tpu.memory_space<vmem>>, vector<16x8xbf16>
    tpu.vector_store %arg18[%c0_48, %c8], %87 {strides = array<i32>} : memref<16x32xbf16, #tpu.memory_space<vmem>>, vector<16x8xbf16>,
    %c2 = arith.constant 2 : index
    %c0_49 = arith.constant 0 : index
    %c0_50 = arith.constant 0 : index
    %89 = vector.load %arg8[%c2, %c0_49, %c0_50] : memref<4x32x8xbf16, #tpu.memory_space<vmem>>, vector<1x32x8xbf16>
    %90 = vector.shape_cast %89 : vector<1x32x8xbf16> to vector<32x8xbf16>
    %cst_51 = arith.constant dense<0.000000e+00> : vector<16x8xf32>
    %91 = tpu.matmul %27, %90, %cst_51 {dimension_numbers = #tpu.dot_dimension_numbers<[1], [0], [0], [1], [0, 0, 1, 1], [], []>} : vector<16x32xbf16>, vector<32x8xbf16>, vector<16x8xf32> -> vector<16x8xf32>
    %c2_52 = arith.constant 2 : index
    %c0_53 = arith.constant 0 : index
    %c0_54 = arith.constant 0 : index
    %92 = vector.load %arg9[%c2_52, %c0_53, %c0_54] : memref<4x1x8xf32, #tpu.memory_space<vmem>>, vector<1x1x8xf32>
    %93 = vector.shape_cast %92 : vector<1x1x8xf32> to vector<1x8xf32>
    %94 = vector.broadcast %93 : vector<1x8xf32> to vector<16x8xf32>
    %95 = arith.addf %91, %94 : vector<16x8xf32>
    %96 = arith.truncf %95 : vector<16x8xf32> to vector<16x8xbf16>
    %c2_55 = arith.constant 2 : index
    %c0_56 = arith.constant 0 : index
    %c0_57 = arith.constant 0 : index
    %97 = vector.load %arg16[%c2_55, %c0_56, %c0_57] : memref<4x128x8xbf16, #tpu.memory_space<vmem>>, vector<1x128x8xbf16>
    %98 = vector.shape_cast %97 : vector<1x128x8xbf16> to vector<128x8xbf16>
    %cst_58 = arith.constant dense<0.000000e+00> : vector<16x128xf32>
    %99 = tpu.matmul %96, %98, %cst_58 {dimension_numbers = #tpu.dot_dimension_numbers<[1], [1], [0], [0], [0, 0, 1, 0], [], []>} : vector<16x8xbf16>, vector<128x8xbf16>, vector<16x128xf32> -> vector<16x128xf32>
    %cst_59 = arith.constant -1.000000e+30 : f32
    %100 = vector.broadcast %cst_59 : f32 to vector<16x128xf32>
    %101 = arith.select %30, %100, %99 : vector<16x128xi1>, vector<16x128xf32>
    %cst_60 = arith.constant dense<0xFF800000> : vector<16xf32>
    %102 = vector.multi_reduction <maximumf>, %101, %cst_60 [1] : vector<16x128xf32> to vector<16xf32>
    %103 = vector.shape_cast %102 : vector<16xf32> to vector<16x1xf32>
    %104 = vector.broadcast %103 : vector<16x1xf32> to vector<16x128xf32>
    %105 = arith.subf %101, %104 : vector<16x128xf32>
    %106 = math.exp %105 : vector<16x128xf32>
    %cst_61 = arith.constant dense<0.000000e+00> : vector<16xf32>
    %107 = vector.multi_reduction <add>, %106, %cst_61 [1] : vector<16x128xf32> to vector<16xf32>
    %108 = vector.shape_cast %107 : vector<16xf32> to vector<16x1xf32>
    %109 = tpu.reciprocal %108 {approx = true} : vector<16x1xf32> -> vector<16x1xf32>
    %110 = vector.broadcast %109 : vector<16x1xf32> to vector<16x128xf32>
    %111 = arith.mulf %106, %110 : vector<16x128xf32>
    %112 = arith.truncf %111 : vector<16x128xf32> to vector<16x128xbf16>
    %c2_62 = arith.constant 2 : index
    %c0_63 = arith.constant 0 : index
    %c0_64 = arith.constant 0 : index
    %113 = vector.load %arg17[%c2_62, %c0_63, %c0_64] : memref<4x128x8xbf16, #tpu.memory_space<vmem>>, vector<1x128x8xbf16>
    %114 = vector.shape_cast %113 : vector<1x128x8xbf16> to vector<128x8xbf16>
    %cst_65 = arith.constant dense<0.000000e+00> : vector<16x8xf32>
    %115 = tpu.matmul %112, %114, %cst_65 {dimension_numbers = #tpu.dot_dimension_numbers<[1], [0], [0], [1], [0, 0, 1, 1], [], []>} : vector<16x128xbf16>, vector<128x8xbf16>, vector<16x8xf32> -> vector<16x8xf32>
    %116 = arith.truncf %115 : vector<16x8xf32> to vector<16x8xbf16>
    %c0_66 = arith.constant 0 : index
    %c16 = arith.constant 16 : index
    %117 = vector.load %arg18[%c0_66, %c16] : memref<16x32xbf16, #tpu.memory_space<vmem>>, vector<16x8xbf16>
    tpu.vector_store %arg18[%c0_66, %c16], %116 {strides = array<i32>} : memref<16x32xbf16, #tpu.memory_space<vmem>>, vector<16x8xbf16>,
    %c3 = arith.constant 3 : index
    %c0_67 = arith.constant 0 : index
    %c0_68 = arith.constant 0 : index
    %118 = vector.load %arg8[%c3, %c0_67, %c0_68] : memref<4x32x8xbf16, #tpu.memory_space<vmem>>, vector<1x32x8xbf16>
    %119 = vector.shape_cast %118 : vector<1x32x8xbf16> to vector<32x8xbf16>
    %cst_69 = arith.constant dense<0.000000e+00> : vector<16x8xf32>
    %120 = tpu.matmul %27, %119, %cst_69 {dimension_numbers = #tpu.dot_dimension_numbers<[1], [0], [0], [1], [0, 0, 1, 1], [], []>} : vector<16x32xbf16>, vector<32x8xbf16>, vector<16x8xf32> -> vector<16x8xf32>
    %c3_70 = arith.constant 3 : index
    %c0_71 = arith.constant 0 : index
    %c0_72 = arith.constant 0 : index
    %121 = vector.load %arg9[%c3_70, %c0_71, %c0_72] : memref<4x1x8xf32, #tpu.memory_space<vmem>>, vector<1x1x8xf32>
    %122 = vector.shape_cast %121 : vector<1x1x8xf32> to vector<1x8xf32>
    %123 = vector.broadcast %122 : vector<1x8xf32> to vector<16x8xf32>
    %124 = arith.addf %120, %123 : vector<16x8xf32>
    %125 = arith.truncf %124 : vector<16x8xf32> to vector<16x8xbf16>
    %c3_73 = arith.constant 3 : index
    %c0_74 = arith.constant 0 : index
    %c0_75 = arith.constant 0 : index
    %126 = vector.load %arg16[%c3_73, %c0_74, %c0_75] : memref<4x128x8xbf16, #tpu.memory_space<vmem>>, vector<1x128x8xbf16>
    %127 = vector.shape_cast %126 : vector<1x128x8xbf16> to vector<128x8xbf16>
    %cst_76 = arith.constant dense<0.000000e+00> : vector<16x128xf32>
    %128 = tpu.matmul %125, %127, %cst_76 {dimension_numbers = #tpu.dot_dimension_numbers<[1], [1], [0], [0], [0, 0, 1, 0], [], []>} : vector<16x8xbf16>, vector<128x8xbf16>, vector<16x128xf32> -> vector<16x128xf32>
    %cst_77 = arith.constant -1.000000e+30 : f32
    %129 = vector.broadcast %cst_77 : f32 to vector<16x128xf32>
    %130 = arith.select %30, %129, %128 : vector<16x128xi1>, vector<16x128xf32>
    %cst_78 = arith.constant dense<0xFF800000> : vector<16xf32>
    %131 = vector.multi_reduction <maximumf>, %130, %cst_78 [1] : vector<16x128xf32> to vector<16xf32>
    %132 = vector.shape_cast %131 : vector<16xf32> to vector<16x1xf32>
    %133 = vector.broadcast %132 : vector<16x1xf32> to vector<16x128xf32>
    %134 = arith.subf %130, %133 : vector<16x128xf32>
    %135 = math.exp %134 : vector<16x128xf32>
    %cst_79 = arith.constant dense<0.000000e+00> : vector<16xf32>
    %136 = vector.multi_reduction <add>, %135, %cst_79 [1] : vector<16x128xf32> to vector<16xf32>
    %137 = vector.shape_cast %136 : vector<16xf32> to vector<16x1xf32>
    %138 = tpu.reciprocal %137 {approx = true} : vector<16x1xf32> -> vector<16x1xf32>
    %139 = vector.broadcast %138 : vector<16x1xf32> to vector<16x128xf32>
    %140 = arith.mulf %135, %139 : vector<16x128xf32>
    %141 = arith.truncf %140 : vector<16x128xf32> to vector<16x128xbf16>
    %c3_80 = arith.constant 3 : index
    %c0_81 = arith.constant 0 : index
    %c0_82 = arith.constant 0 : index
    %142 = vector.load %arg17[%c3_80, %c0_81, %c0_82] : memref<4x128x8xbf16, #tpu.memory_space<vmem>>, vector<1x128x8xbf16>
    %143 = vector.shape_cast %142 : vector<1x128x8xbf16> to vector<128x8xbf16>
    %cst_83 = arith.constant dense<0.000000e+00> : vector<16x8xf32>
    %144 = tpu.matmul %141, %143, %cst_83 {dimension_numbers = #tpu.dot_dimension_numbers<[1], [0], [0], [1], [0, 0, 1, 1], [], []>} : vector<16x128xbf16>, vector<128x8xbf16>, vector<16x8xf32> -> vector<16x8xf32>
    %145 = arith.truncf %144 : vector<16x8xf32> to vector<16x8xbf16>
    %c0_84 = arith.constant 0 : index
    %c24 = arith.constant 24 : index
    %146 = vector.load %arg18[%c0_84, %c24] : memref<16x32xbf16, #tpu.memory_space<vmem>>, vector<16x8xbf16>
    tpu.vector_store %arg18[%c0_84, %c24], %145 {strides = array<i32>} : memref<16x32xbf16, #tpu.memory_space<vmem>>, vector<16x8xbf16>,
    %c0_85 = arith.constant 0 : index
    %c0_86 = arith.constant 0 : index
    %147 = vector.load %arg18[%c0_85, %c0_86] : memref<16x32xbf16, #tpu.memory_space<vmem>>, vector<16x32xbf16>
    %c0_87 = arith.constant 0 : index
    %c0_88 = arith.constant 0 : index
    %148 = vector.load %arg12[%c0_87, %c0_88] : memref<32x32xbf16, #tpu.memory_space<vmem>>, vector<32x32xbf16>
    %cst_89 = arith.constant dense<0.000000e+00> : vector<16x32xf32>
    %149 = tpu.matmul %147, %148, %cst_89 {dimension_numbers = #tpu.dot_dimension_numbers<[1], [0], [0], [1], [0, 0, 1, 1], [], []>} : vector<16x32xbf16>, vector<32x32xbf16>, vector<16x32xf32> -> vector<16x32xf32>
    %c0_90 = arith.constant 0 : index
    %c0_91 = arith.constant 0 : index
    %150 = vector.load %arg13[%c0_90, %c0_91] : memref<1x32xf32, #tpu.memory_space<vmem>>, vector<1x32xf32>
    %151 = vector.broadcast %150 : vector<1x32xf32> to vector<16x32xf32>
    %152 = arith.addf %149, %151 : vector<16x32xf32>
    %c0_92 = arith.constant 0 : index
    %c0_93 = arith.constant 0 : index
    %153 = vector.load %arg14[%c0_92, %c0_93] : memref<1x32xf32, #tpu.memory_space<vmem>>, vector<1x32xf32>
    %154 = vector.broadcast %153 : vector<1x32xf32> to vector<16x32xf32>
    %155 = arith.mulf %154, %152 : vector<16x32xf32>
    %156 = arith.addf %26, %155 : vector<16x32xf32>
    %c0_94 = arith.constant 0 : index
    %c0_95 = arith.constant 0 : index
    %c0_96 = arith.constant 0 : index
    %157 = vector.load %arg15[%c0_94, %c0_95, %c0_96] : memref<1x16x32xf32, #tpu.memory_space<vmem>>, vector<1x16x32xf32>
    %158 = vector.shape_cast %157 : vector<1x16x32xf32> to vector<16x32xf32>
    %159 = vector.shape_cast %156 : vector<16x32xf32> to vector<1x16x32xf32>
    tpu.vector_store %arg15[%c0_94, %c0_95, %c0_96], %159 {strides = array<i32>} : memref<1x16x32xf32, #tpu.memory_space<vmem>>, vector<1x16x32xf32>,
    return
  }
  func.func @transform_0(%arg0: i32, %arg1: i32) -> (i32, i32, i32) {
    %c0_i32 = arith.constant 0 : i32
    %c0_i32_0 = arith.constant 0 : i32
    return %arg0, %arg1, %c0_i32 : i32, i32, i32
  }
  func.func @transform_1(%arg0: i32, %arg1: i32) -> (i32, i32, i32) {
    %c0_i32 = arith.constant 0 : i32
    %c0_i32_0 = arith.constant 0 : i32
    %c0_i32_1 = arith.constant 0 : i32
    return %arg0, %c0_i32, %c0_i32_0 : i32, i32, i32
  }
  func.func @transform_2(%arg0: i32, %arg1: i32) -> (i32, i32) {
    %c0_i32 = arith.constant 0 : i32
    %c0_i32_0 = arith.constant 0 : i32
    %c0_i32_1 = arith.constant 0 : i32
    return %c0_i32, %c0_i32_0 : i32, i32
  }
  func.func @transform_3(%arg0: i32, %arg1: i32) -> (i32, i32) {
    %c0_i32 = arith.constant 0 : i32
    %c0_i32_0 = arith.constant 0 : i32
    %c0_i32_1 = arith.constant 0 : i32
    return %c0_i32, %c0_i32_0 : i32, i32
  }
  func.func @transform_4(%arg0: i32, %arg1: i32) -> (i32, i32) {
    %c0_i32 = arith.constant 0 : i32
    %c0_i32_0 = arith.constant 0 : i32
    %c0_i32_1 = arith.constant 0 : i32
    return %c0_i32, %c0_i32_0 : i32, i32
  }
  func.func @transform_5(%arg0: i32, %arg1: i32) -> (i32, i32) {
    %c0_i32 = arith.constant 0 : i32
    %c0_i32_0 = arith.constant 0 : i32
    %c0_i32_1 = arith.constant 0 : i32
    return %c0_i32, %c0_i32_0 : i32, i32
  }
  func.func @transform_6(%arg0: i32, %arg1: i32) -> (i32, i32, i32) {
    %c0_i32 = arith.constant 0 : i32
    %c0_i32_0 = arith.constant 0 : i32
    %c0_i32_1 = arith.constant 0 : i32
    %c0_i32_2 = arith.constant 0 : i32
    return %c0_i32, %c0_i32_0, %c0_i32_1 : i32, i32, i32
  }
  func.func @transform_7(%arg0: i32, %arg1: i32) -> (i32, i32, i32) {
    %c0_i32 = arith.constant 0 : i32
    %c0_i32_0 = arith.constant 0 : i32
    %c0_i32_1 = arith.constant 0 : i32
    %c0_i32_2 = arith.constant 0 : i32
    return %c0_i32, %c0_i32_0, %c0_i32_1 : i32, i32, i32
  }
  func.func @transform_8(%arg0: i32, %arg1: i32) -> (i32, i32) {
    %c0_i32 = arith.constant 0 : i32
    %c0_i32_0 = arith.constant 0 : i32
    %c0_i32_1 = arith.constant 0 : i32
    return %c0_i32, %c0_i32_0 : i32, i32
  }
  func.func @transform_9(%arg0: i32, %arg1: i32) -> (i32, i32) {
    %c0_i32 = arith.constant 0 : i32
    %c0_i32_0 = arith.constant 0 : i32
    %c0_i32_1 = arith.constant 0 : i32
    return %c0_i32, %c0_i32_0 : i32, i32
  }
  func.func @transform_10(%arg0: i32, %arg1: i32) -> (i32, i32) {
    %c0_i32 = arith.constant 0 : i32
    %c0_i32_0 = arith.constant 0 : i32
    %c0_i32_1 = arith.constant 0 : i32
    return %c0_i32, %c0_i32_0 : i32, i32
  }
  func.func @transform_11(%arg0: i32, %arg1: i32) -> (i32, i32) {
    %c0_i32 = arith.constant 0 : i32
    %c0_i32_0 = arith.constant 0 : i32
    %c0_i32_1 = arith.constant 0 : i32
    return %c0_i32, %c0_i32_0 : i32, i32
  }
  func.func @transform_12(%arg0: i32, %arg1: i32) -> (i32, i32) {
    %c0_i32 = arith.constant 0 : i32
    %c0_i32_0 = arith.constant 0 : i32
    %c0_i32_1 = arith.constant 0 : i32
    return %c0_i32, %c0_i32_0 : i32, i32
  }
  func.func @transform_13(%arg0: i32, %arg1: i32) -> (i32, i32, i32) {
    %c0_i32 = arith.constant 0 : i32
    %c0_i32_0 = arith.constant 0 : i32
    return %arg0, %arg1, %c0_i32 : i32, i32, i32
  }
}

</mosaic_0001>

<bundles_post_ra>
// kernel: tpu_custom_call.1
= control target key start
LH: loop header
LB: loop body
LE: loop exit
PB: predicated region body
PF: predicated region fallthrough
CT: control target
= control target key end

     0   :  { %s3818_s0 = inlined_call_operand.vmem [shape: f32[2,16,32], index: 0, kind: input, shape index: {}]   ;;  %s3819_s1 = inlined_call_operand.vmem [shape: f32[2,128,32], index: 1, kind: input, shape index: {}]   ;;  %s3820_s2 = inlined_call_operand.vmem [shape: f32[1,32], index: 2, kind: input, shape index: {}]   ;;  %s3821_s3 = inlined_call_operand.vmem [shape: f32[1,32], index: 3, kind: input, shape index: {}]   ;;  %s3822_s4 = inlined_call_operand.vmem [shape: f32[1,32], index: 4, kind: input, shape index: {}]   ;;  %s3823_s5 = inlined_call_operand.vmem [shape: f32[1,32], index: 5, kind: input, shape index: {}]   ;;  %s3824_s6 = inlined_call_operand.vmem [shape: bf16[4,32,8], index: 6, kind: input, shape index: {}]   ;;  %s3825_s7 = inlined_call_operand.vmem [shape: f32[4,1,8], index: 7, kind: input, shape index: {}]   ;;  %s3826_s8 = inlined_call_operand.vmem [shape: bf16[32,64], index: 8, kind: input, shape index: {}]   ;;  %s3827_s9 = inlined_call_operand.vmem [shape: f32[1,64], index: 9, kind: input, shape index: {}]   ;;  %s3828_s10 = inlined_call_operand.vmem [shape: bf16[32,32], index: 10, kind: input, shape index: {}]   ;;  %s3829_s11 = inlined_call_operand.vmem [shape: f32[1,32], index: 11, kind: input, shape index: {}]   ;;  %s3830_s12 = inlined_call_operand.vmem [shape: f32[1,32], index: 12, kind: input, shape index: {}]   ;;  %s3831_s13 = inlined_call_operand.hbm [shape: f32[2,16,32], index: 13, kind: output, shape index: {}]  }
   0x1   :  { %3833 = sst [smem:[#allocation8_spill]] %s3818_s0 }
   0x2   :  { %3834 = sst [smem:[#allocation9_spill]] %s3819_s1 }
   0x3   :  { %3835 = sst [smem:[#allocation10_spill]] %s3820_s2 }
   0x4   :  { %18 = vsyncpa [#allocation6], 0 }
   0x5   :  { %20 = vsyncpa [#allocation6 + $0x1], 0  ;;  %s3002_s25 = smov 0   ;;  %s3004_s26 = smov 0  }
   0x6   :  { %s3006_s27 = smov 0   ;;  %s3008_s28 = smov 0  }
   0x7   :  { %s3010_s29 = smov 0   ;;  %s3012_s30 = smov 0  }
   0x8 LB: > { %s2300_s14 = sadd.s32 4294967295, %s2916_s30   ;;  %s2301_s15 = sadd.s32 4294967294, %s2916_s30   ;;  %s2916_s30 = sphi %s3012_s30, %s26_s30   ;;  %s2912_s29 = sphi %s3010_s29, %s3846_s29   ;;  %s2908_s28 = sphi %s3008_s28, %s3845_s28   ;;  %s2904_s27 = sphi %s3006_s27, %s3844_s27   ;;  %s2900_s26 = sphi %s3004_s26, %s3843_s26   ;;  %s2896_s25 = sphi %s3002_s25, %s3842_s25  }
   0x9   : > { %s38_s16 = sadd.s32 1, %s2912_s29  ;;  %s332_s17 = sadd.s32 1, %s2904_s27 }
   0xa   : > { %p40_p0 = scmp.ge.s32.totalorder %s38_s16, 2  ;;  %p342_p1 = scmp.ne.s32.totalorder %s2904_s27, %s2900_s26 }
   0xb   : > { %p343_p2 = scmp.eq.s32.totalorder %s2300_s14, 1  ;;  %p348_p3 = scmp.ne.s32.totalorder %s2900_s26, %s2896_s25 }
   0xc   : > { %s3848_s16 = smov (%p40_p0, %s38_s16), 0  ;;  %p349_p5 = scmp.eq.s32.totalorder %s2301_s15, 1 }
   0xd   : > { %p3042_p4 = por %p343_p2, %p342_p1  ;;  %s327_s19 = ssub.s32 %s2912_s29, %s3848_s16 }
   0xe   : > { %p2304_p6 = scmp.ge.s32.totalorder %s2916_s30, 1  ;;  %p330_p7 = scmp.eq.s32.totalorder %s327_s19, 0 }
   0xf   : > { %p3049_p8 = por %p349_p5, %p348_p3  ;;  %p421_p9 = scmp.lt.s32.totalorder %s2916_s30, 3 }
  0x10   : > { %s3055_s21 = scalar_select %p330_p7, %s2904_s27, %s332_s17  }
  0x11   : > { %p422_p10 = pnand %p2304_p6, %p421_p9 }
  0x12   : > { %p475_p11 = scmp.lt.s32.totalorder (!%p422_p10), %s2908_s28, 1  ;;  %vm513_vm0 = vcmask (!%p422_p10), 261120   ;;  %s3838_s1 = sld [smem:[#allocation9_spill]] (!%p422_p10)  ;;  %vm2919_vm1 = vmmov (!%p422_p10), 0   ;;  %vm927_vm2 = vcmask (!%p422_p10), 64512   ;;  %vm1663_vm4 = vcmask (!%p422_p10), 130112  }
  0x13   : > { %425 = sbr.rel (%p422_p10) target bundleno = 4029 (0xfbd), region = 72  ;;  %s3839_s0 = sld [smem:[#allocation8_spill]] (!%p422_p10)  ;;  %vm1885_vm5 = vcmask (!%p422_p10), 195712   ;;  %vm2107_vm6 = vcmask (!%p422_p10), 261312  }
  0x14   : > { %s3840_s2 = sld [smem:[#allocation10_spill]] (!%p422_p10)  ;;  %s2923_s14 = smov (!%p422_p10), 112  }
  0x15   : > { %s3832_s19 = smov (!%p422_p10), 8  }
  0x1a   : > { %s3059_s22 = scalar_select %p475_p11, %s2908_s28, 1 }
  0x1c   : > { %s2371_s23 = sshll.u32 %s3059_s22, 7  ;;  %s2370_s17 = sshll.u32 %s3059_s22, 4 }
  0x1d   : > { %s3065_s15 = scalar_lea.vmem %s3838_s1, %s2371_s23  ;;  %s482_s24 = scalar_lea.vmem %s3839_s0, %s2370_s17 }
  0x1e   : > { %v495_v0 = vld [vmem:[%s3065_s15] sm:$0xff]  ;;  %v497_v1 = vld [vmem:[%s3065_s15 + $0x10] sm:$0xff]  ;;  %v3070_v2 = vld [vmem:[%s3065_s15 + $0x8] sm:$0xff]  ;;  %s2921_s22 = smov 120   ;;  %s2927_s17 = smov 16  }
  0x1f   : > { %v514_v3 = vsel %vm513_vm0, %v495_v0, 0.0  ;;  %v520_v4 = vsel %vm513_vm0, %v497_v1, 0.0  ;;  %v3075_v5 = vld [vmem:[%s3065_s15 + $0x18] sm:$0xff]  ;;  %v517_v6 = vsel %vm513_vm0, %v3070_v2, 0.0  ;;  %v3082_v8 = vld [vmem:[%s3065_s15 + $0x20] sm:$0xff]  ;;  %v3085_v9 = vld [vmem:[%s3065_s15 + $0x28] sm:$0xff] }
  0x20   : > { %515 = vadd.xlane.f32.xlu0 %v514_v3  ;;  %521 = vadd.xlane.f32.xlu1 %v520_v4  ;;  %v523_v7 = vsel %vm513_vm0, %v3075_v5, 0.0  ;;  %v526_v10 = vsel %vm513_vm0, %v3082_v8, 0.0  ;;  %v529_v11 = vsel %vm513_vm0, %v3085_v9, 0.0  ;;  %v3092_v12 = vld [vmem:[%s3065_s15 + $0x30] sm:$0xff]  ;;  %v3095_v13 = vld [vmem:[%s3065_s15 + $0x38] sm:$0xff]  ;;  %v3102_v16 = vld [vmem:[%s3065_s15 + $0x40] sm:$0xff] }
  0x21   : > { %v532_v14 = vsel %vm513_vm0, %v3092_v12, 0.0  ;;  %v535_v15 = vsel %vm513_vm0, %v3095_v13, 0.0  ;;  %v3105_v17 = vld [vmem:[%s3065_s15 + $0x48] sm:$0xff]  ;;  %v538_v18 = vsel %vm513_vm0, %v3102_v16, 0.0  ;;  %v3112_v20 = vld [vmem:[%s3065_s15 + $0x50] sm:$0xff]  ;;  %v3115_v21 = vld [vmem:[%s3065_s15 + $0x58] sm:$0xff] }
  0x22   : > { %v541_v19 = vsel %vm513_vm0, %v3105_v17, 0.0  ;;  %v544_v22 = vsel %vm513_vm0, %v3112_v20, 0.0  ;;  %v547_v23 = vsel %vm513_vm0, %v3115_v21, 0.0  ;;  %v3122_v24 = vld [vmem:[%s3065_s15 + $0x60] sm:$0xff]  ;;  %v3125_v25 = vld [vmem:[%s3065_s15 + $0x68] sm:$0xff]  ;;  %v3133_v28 = vld [vmem:[%s3065_s15 + $0x70] sm:$0xff] }
  0x23   : > { %v550_v26 = vsel %vm513_vm0, %v3122_v24, 0.0  ;;  %v553_v27 = vsel %vm513_vm0, %v3125_v25, 0.0  ;;  %v3136_v29 = vld [vmem:[%s3065_s15 + $0x78] sm:$0xff]  ;;  %v556_v30 = vsel %vm513_vm0, %v3133_v28, 0.0  ;;  %v3145_v32 = vld [vmem:[%s482_s24] sm:$0xff]  ;;  %v3147_v33 = vld [vmem:[%s482_s24 + $0x8] sm:$0xff] }
  0x24   : > { %518 = vadd.xlane.f32.xlu0 %v517_v6  ;;  %524 = vadd.xlane.f32.xlu1 %v523_v7  ;;  %v559_v31 = vsel %vm513_vm0, %v3136_v29, 0.0  ;;  %v1179_v34 = vsel %vm513_vm0, %v3145_v32, 0.0  ;;  %v1182_v35 = vsel %vm513_vm0, %v3147_v33, 0.0  ;;  %s2920_s24 = smov 96   ;;  %s2925_s15 = smov 104  }
  0x28   : > { %527 = vadd.xlane.f32.xlu0 %v526_v10  ;;  %530 = vadd.xlane.f32.xlu1 %v529_v11 }
  0x2c   : > { %533 = vadd.xlane.f32.xlu0 %v532_v14  ;;  %536 = vadd.xlane.f32.xlu1 %v535_v15 }
  0x30   : > { %539 = vadd.xlane.f32.xlu0 %v538_v18  ;;  %542 = vadd.xlane.f32.xlu1 %v541_v19 }
  0x34   : > { %545 = vadd.xlane.f32.xlu0 %v544_v22  ;;  %548 = vadd.xlane.f32.xlu1 %v547_v23 }
  0x38   : > { %551 = vadd.xlane.f32.xlu0 %v550_v26  ;;  %554 = vadd.xlane.f32.xlu1 %v553_v27 }
  0x3c   : > { %557 = vadd.xlane.f32.xlu0 %v556_v30  ;;  %560 = vadd.xlane.f32.xlu1 %v559_v31 }
  0x40   : > { %1180 = vadd.xlane.f32.xlu0 %v1179_v34  ;;  %1183 = vadd.xlane.f32.xlu1 %v1182_v35 }
  0xad   : > { %v516_v36 = vpop.xlane.xlu0 %515  ;;  %v522_v37 = vpop.xlane.xlu1 %521 }
  0xae   : > { %v563_v38 = vmul.f32 0.03125, %v516_v36  ;;  %v565_v39 = vmul.f32 0.03125, %v522_v37 }
  0xb0   : > { %v3153_v40 = vsub.f32 %v495_v0, %v563_v38  ;;  %v3155_v41 = vsub.f32 %v497_v1, %v565_v39 }
  0xb1   : > { %v519_v42 = vpop.xlane.xlu0 %518  ;;  %v525_v43 = vpop.xlane.xlu1 %524 }
  0xb2   : > { %v564_v44 = vmul.f32 0.03125, %v519_v42  ;;  %v566_v45 = vmul.f32 0.03125, %v525_v43  ;;  %v595_v46 = vmul.f32 %v3153_v40, %v3153_v40  ;;  %v597_v47 = vmul.f32 %v3155_v41, %v3155_v41 }
  0xb4   : > { %v3162_v48 = vsub.f32 %v3070_v2, %v564_v44  ;;  %v3165_v49 = vsub.f32 %v3075_v5, %v566_v45  ;;  %v611_v50 = vsel %vm513_vm0, %v595_v46, 0.0  ;;  %v617_v53 = vsel %vm513_vm0, %v597_v47, 0.0 }
  0xb5   : > { %v528_v51 = vpop.xlane.xlu0 %527  ;;  %612 = vadd.xlane.f32.xlu0 %v611_v50  ;;  %v531_v52 = vpop.xlane.xlu1 %530 }
  0xb6   : > { %v567_v54 = vmul.f32 0.03125, %v528_v51  ;;  %v568_v55 = vmul.f32 0.03125, %v531_v52  ;;  %v596_v56 = vmul.f32 %v3162_v48, %v3162_v48  ;;  %v598_v57 = vmul.f32 %v3165_v49, %v3165_v49 }
  0xb8   : > { %v3174_v58 = vsub.f32 %v3082_v8, %v567_v54  ;;  %v3177_v59 = vsub.f32 %v3085_v9, %v568_v55  ;;  %v614_v60 = vsel %vm513_vm0, %v596_v56, 0.0  ;;  %v620_v63 = vsel %vm513_vm0, %v598_v57, 0.0 }
  0xb9   : > { %v534_v61 = vpop.xlane.xlu0 %533  ;;  %615 = vadd.xlane.f32.xlu1 %v614_v60  ;;  %618 = vadd.xlane.f32.xlu0 %v617_v53  ;;  %v537_v62 = vpop.xlane.xlu1 %536 }
  0xba   : > { %v569_v0 = vmul.f32 0.03125, %v534_v61  ;;  %v570_v1 = vmul.f32 0.03125, %v537_v62  ;;  %v599_v2 = vmul.f32 %v3174_v58, %v3174_v58  ;;  %v600_v3 = vmul.f32 %v3177_v59, %v3177_v59 }
  0xbc   : > { %v3186_v4 = vsub.f32 %v3092_v12, %v569_v0  ;;  %v3189_v5 = vsub.f32 %v3095_v13, %v570_v1  ;;  %v623_v6 = vsel %vm513_vm0, %v599_v2, 0.0  ;;  %v626_v9 = vsel %vm513_vm0, %v600_v3, 0.0 }
  0xbd   : > { %v540_v7 = vpop.xlane.xlu0 %539  ;;  %621 = vadd.xlane.f32.xlu1 %v620_v63  ;;  %624 = vadd.xlane.f32.xlu0 %v623_v6  ;;  %v543_v8 = vpop.xlane.xlu1 %542 }
  0xbe   : > { %v571_v10 = vmul.f32 0.03125, %v540_v7  ;;  %v572_v11 = vmul.f32 0.03125, %v543_v8  ;;  %v601_v14 = vmul.f32 %v3186_v4, %v3186_v4  ;;  %v602_v12 = vmul.f32 %v3189_v5, %v3189_v5  ;;  %v2759_v7 = vld [vmem:[%s3826_s8 + $0x8] sm:$0xff]   ;;  %v2760_v8 = vld [vmem:[%s3824_s6] sm:$0xff]  }
  0xc0   : > { %v3198_v15 = vsub.f32 %v3102_v16, %v571_v10  ;;  %v3201_v13 = vsub.f32 %v3105_v17, %v572_v11  ;;  %v629_v18 = vsel %vm513_vm0, %v601_v14, 0.0  ;;  %v632_v23 = vsel %vm513_vm0, %v602_v12, 0.0  ;;  %v2761_v10 = vld [vmem:[%s3824_s6 + $0x8] sm:$0xff]  }
  0xc1   : > { %v546_v19 = vpop.xlane.xlu0 %545  ;;  %627 = vadd.xlane.f32.xlu1 %v626_v9  ;;  %630 = vadd.xlane.f32.xlu0 %v629_v18  ;;  %v549_v22 = vpop.xlane.xlu1 %548  ;;  %v2918_v9 = vmov 0.0  }
  0xc2   : > { %v573_v26 = vmul.f32 0.03125, %v546_v19  ;;  %v574_v27 = vmul.f32 0.03125, %v549_v22  ;;  %v603_v30 = vmul.f32 %v3198_v15, %v3198_v15  ;;  %v604_v16 = vmul.f32 %v3201_v13, %v3201_v13  ;;  %2490 = vmatprep.subr.bf16.mxu1 %v2918_v9  ;;  %2494 = vmatprep.mubr.msk.bf16.mxu1 %vm2919_vm1, %v2918_v9 }
  0xc3   : > { %2491 = vmatpush3.bf16.msra.mxu1 %v2760_v8 }
  0xc4   : > { %v3210_v31 = vsub.f32 %v3112_v20, %v573_v26  ;;  %v3213_v17 = vsub.f32 %v3115_v21, %v574_v27  ;;  %v635_v34 = vsel %vm513_vm0, %v603_v30, 0.0  ;;  %v638_v37 = vsel %vm513_vm0, %v604_v16, 0.0  ;;  %2492 = vmatprep.subr.bf16.mxu1 %v2918_v9 }
  0xc5   : > { %v552_v35 = vpop.xlane.xlu0 %551  ;;  %633 = vadd.xlane.f32.xlu1 %v632_v23  ;;  %636 = vadd.xlane.f32.xlu0 %v635_v34  ;;  %v555_v36 = vpop.xlane.xlu1 %554 }
  0xc6   : > { %v575_v38 = vmul.f32 0.03125, %v552_v35  ;;  %v576_v39 = vmul.f32 0.03125, %v555_v36  ;;  %v605_v42 = vmul.f32 %v3210_v31, %v3210_v31  ;;  %v606_v20 = vmul.f32 %v3213_v17, %v3213_v17 }
  0xc7   : > { %2493 = vmatpush3.bf16.msra.mxu1 %v2761_v10 }
  0xc8   : > { %v3222_v43 = vsub.f32 %v3122_v24, %v575_v38  ;;  %v3225_v21 = vsub.f32 %v3125_v25, %v576_v39  ;;  %v641_v44 = vsel %vm513_vm0, %v605_v42, 0.0  ;;  %v644_v47 = vsel %vm513_vm0, %v606_v20, 0.0  ;;  %2518 = vmatprep.subr.bf16.mxu1 %v2918_v9 }
  0xc9   : > { %v558_v45 = vpop.xlane.xlu0 %557  ;;  %639 = vadd.xlane.f32.xlu1 %v638_v37  ;;  %642 = vadd.xlane.f32.xlu0 %v641_v44  ;;  %v561_v46 = vpop.xlane.xlu1 %560 }
  0xca   : > { %v577_v50 = vmul.f32 0.03125, %v558_v45  ;;  %v578_v51 = vmul.f32 0.03125, %v561_v46  ;;  %v607_v52 = vmul.f32 %v3222_v43, %v3222_v43  ;;  %v608_v24 = vmul.f32 %v3225_v21, %v3225_v21 }
  0xcc   : > { %v3234_v53 = vsub.f32 %v3133_v28, %v577_v50  ;;  %v3237_v25 = vsub.f32 %v3136_v29, %v578_v51  ;;  %v647_v54 = vsel %vm513_vm0, %v607_v52, 0.0  ;;  %v650_v56 = vsel %vm513_vm0, %v608_v24, 0.0 }
  0xcd   : > { %645 = vadd.xlane.f32.xlu1 %v644_v47  ;;  %648 = vadd.xlane.f32.xlu0 %v647_v54  ;;  %v1181_v55 = vpop.xlane.xlu0 %1180  ;;  %v1184_v57 = vpop.xlane.xlu1 %1183  ;;  %v3281_v54 = vld [vmem:[%s3822_s4] ss:$0 sm:$0xff] }
  0xce   : > { %v1186_v60 = vmul.f32 0.03125, %v1181_v55  ;;  %v1187_v61 = vmul.f32 0.03125, %v1184_v57  ;;  %v609_v62 = vmul.f32 %v3234_v53, %v3234_v53  ;;  %v610_v28 = vmul.f32 %v3237_v25, %v3237_v25 }
  0xd0   : > { %v3246_v63 = vsub.f32 %v3145_v32, %v1186_v60  ;;  %v3249_v29 = vsub.f32 %v3147_v33, %v1187_v61  ;;  %v653_v0 = vsel %vm513_vm0, %v609_v62, 0.0  ;;  %v656_v1 = vsel %vm513_vm0, %v610_v28, 0.0  ;;  %v2758_v33 = vld [vmem:[%s3826_s8] sm:$0xff]  }
  0xd1   : > { %651 = vadd.xlane.f32.xlu1 %v650_v56  ;;  %654 = vadd.xlane.f32.xlu0 %v653_v0 }
  0xd2   : > { %v1190_v2 = vmul.f32 %v3246_v63, %v3246_v63  ;;  %v1191_v3 = vmul.f32 %v3249_v29, %v3249_v29  ;;  %2470 = vmatprep.subr.bf16.mxu0 %v2758_v33 }
  0xd3   : > { %2471 = vmatpush3.bf16.msra.mxu0 %v2758_v33 }
  0xd4   : > { %v1192_v6 = vsel %vm513_vm0, %v1190_v2, 0.0  ;;  %v1195_v32 = vsel %vm513_vm0, %v1191_v3, 0.0  ;;  %2472 = vmatprep.subr.bf16.mxu0 %v2759_v7  ;;  %v3289_v3 = vld [vmem:[%s3823_s5] ss:$0 sm:$0xff] }
  0xd5   : > { %657 = vadd.xlane.f32.xlu1 %v656_v1  ;;  %1193 = vadd.xlane.f32.xlu0 %v1192_v6 }
  0xd7   : > { %2473 = vmatpush3.bf16.msra.mxu0 %v2759_v7 }
  0xd8   : > { %2498 = vmatprep.subr.bf16.mxu0 %v2918_v9 }
  0xd9   : > { %1196 = vadd.xlane.f32.xlu1 %v1195_v32 }
 0x142   : > { %v613_v11 = vpop.xlane.xlu0 %612 }
 0x143   : > { %v659_v14 = vmul.f32 0.03125, %v613_v11 }
 0x145   : > { %v675_v12 = vadd.f32 1e-05, %v659_v14 }
 0x146   : > { %v616_v18 = vpop.xlane.xlu1 %615  ;;  %v619_v19 = vpop.xlane.xlu0 %618 }
 0x147   : > { %2770 = vrsqrt.f32 %v675_v12  ;;  %v660_v22 = vmul.f32 0.03125, %v616_v18  ;;  %v661_v23 = vmul.f32 0.03125, %v619_v19 }
 0x149   : > { %v676_v26 = vadd.f32 1e-05, %v660_v22  ;;  %v677_v27 = vadd.f32 1e-05, %v661_v23 }
 0x14a   : > { %v622_v30 = vpop.xlane.xlu1 %621  ;;  %v625_v16 = vpop.xlane.xlu0 %624 }
 0x14b   : > { %2772 = vrsqrt.f32 %v676_v26  ;;  %v662_v34 = vmul.f32 0.03125, %v622_v30  ;;  %v663_v35 = vmul.f32 0.03125, %v625_v16 }
 0x14c   : > { %2774 = vrsqrt.f32 %v677_v27 }
 0x14d   : > { %v678_v36 = vadd.f32 1e-05, %v662_v34  ;;  %v679_v37 = vadd.f32 1e-05, %v663_v35 }
 0x14e   : > { %v628_v38 = vpop.xlane.xlu1 %627  ;;  %v631_v39 = vpop.xlane.xlu0 %630 }
 0x14f   : > { %2776 = vrsqrt.f32 %v678_v36  ;;  %v664_v42 = vmul.f32 0.03125, %v628_v38  ;;  %v665_v20 = vmul.f32 0.03125, %v631_v39 }
 0x150   : > { %2778 = vrsqrt.f32 %v679_v37 }
 0x151   : > { %v2771_v44 = vpop.eup %2770  ;;  %v680_v45 = vadd.f32 1e-05, %v664_v42  ;;  %v681_v46 = vadd.f32 1e-05, %v665_v20 }
 0x152   : > { %v634_v47 = vpop.xlane.xlu1 %633  ;;  %v637_v50 = vpop.xlane.xlu0 %636  ;;  %v707_v51 = vmul.f32 %v2771_v44, %v3153_v40 }
 0x153   : > { %2780 = vrsqrt.f32 %v680_v45  ;;  %v666_v52 = vmul.f32 0.03125, %v634_v47  ;;  %v667_v24 = vmul.f32 0.03125, %v637_v50 }
 0x154   : > { %2782 = vrsqrt.f32 %v681_v46  ;;  %v729_v0 = vmul.f32 %v3281_v54, %v707_v51 }
 0x155   : > { %v2773_v55 = vpop.eup %2772  ;;  %v682_v56 = vadd.f32 1e-05, %v666_v52  ;;  %v683_v57 = vadd.f32 1e-05, %v667_v24 }
 0x156   : > { %v2775_v60 = vpop.eup %2774  ;;  %v640_v61 = vpop.xlane.xlu1 %639  ;;  %v708_v28 = vmul.f32 %v2773_v55, %v3162_v48 }
 0x157   : > { %v643_v62 = vpop.xlane.xlu0 %642  ;;  %v709_v40 = vmul.f32 %v2775_v60, %v3155_v41  ;;  %2784 = vrsqrt.f32 %v682_v56  ;;  %v668_v1 = vmul.f32 0.03125, %v640_v61  ;;  %v751_v41 = vadd.f32 %v3289_v3, %v729_v0 }
 0x158   : > { %v669_v2 = vmul.f32 0.03125, %v643_v62  ;;  %2786 = vrsqrt.f32 %v683_v57  ;;  %v730_v6 = vmul.f32 %v3281_v54, %v708_v28 }
 0x159   : > { %v2777_v32 = vpop.eup %2776  ;;  %v684_v33 = vadd.f32 1e-05, %v668_v1  ;;  %v731_v12 = vmul.f32 %v3281_v54, %v709_v40 }
 0x15a   : > { %v685_v7 = vadd.f32 1e-05, %v669_v2  ;;  %v2779_v8 = vpop.eup %2778  ;;  %v710_v48 = vmul.f32 %v2777_v32, %v3165_v49  ;;  %v646_v10 = vpop.xlane.xlu1 %645  ;;  %v752_v14 = vadd.f32 %v3289_v3, %v730_v6 }
 0x15b   : > { %v649_v11 = vpop.xlane.xlu0 %648  ;;  %v711_v18 = vmul.f32 %v2779_v8, %v3174_v58  ;;  %2788 = vrsqrt.f32 %v684_v33  ;;  %v670_v19 = vmul.f32 0.03125, %v646_v10  ;;  %v753_v37 = vadd.f32 %v3289_v3, %v731_v12 }
 0x15c   : > { %v671_v22 = vmul.f32 0.03125, %v649_v11  ;;  %2790 = vrsqrt.f32 %v685_v7  ;;  %v767_v23 = vpack.c.bf16 %v752_v14, %v751_v41  ;;  %v732_v26 = vmul.f32 %v3281_v54, %v710_v48 }
 0x15d   : > { %v2781_v27 = vpop.eup %2780  ;;  %v686_v30 = vadd.f32 1e-05, %v670_v19  ;;  %v733_v38 = vmul.f32 %v3281_v54, %v711_v18 }
 0x15e   : > { %v687_v49 = vadd.f32 1e-05, %v671_v22  ;;  %v2783_v16 = vpop.eup %2782  ;;  %v712_v34 = vmul.f32 %v2781_v27, %v3177_v59  ;;  %v652_v35 = vpop.xlane.xlu1 %651  ;;  %2474 = vmatprep.mubr.msk.bf16.mxu0 %vm513_vm0, %v767_v23  ;;  %v754_v58 = vadd.f32 %v3289_v3, %v732_v26 }
 0x15f   : > { %v655_v36 = vpop.xlane.xlu0 %654  ;;  %v713_v39 = vmul.f32 %v2783_v16, %v3186_v4  ;;  %2792 = vrsqrt.f32 %v686_v30  ;;  %v672_v42 = vmul.f32 0.03125, %v652_v35  ;;  %v755_v55 = vadd.f32 %v3289_v3, %v733_v38 }
 0x160   : > { %v673_v20 = vmul.f32 0.03125, %v655_v36  ;;  %2794 = vrsqrt.f32 %v687_v49  ;;  %v768_v44 = vpack.c.bf16 %v754_v58, %v753_v37  ;;  %v734_v45 = vmul.f32 %v3281_v54, %v712_v34 }
 0x161   : > { %v2785_v59 = vpop.eup %2784  ;;  %v688_v46 = vadd.f32 1e-05, %v672_v42  ;;  %v735_v56 = vmul.f32 %v3281_v54, %v713_v39 }
 0x162   : > { %v689_v47 = vadd.f32 1e-05, %v673_v20  ;;  %v2787_v50 = vpop.eup %2786  ;;  %v714_v51 = vmul.f32 %v2785_v59, %v3189_v5  ;;  %v658_v52 = vpop.xlane.xlu1 %657  ;;  %2475 = vmatmul.mubr.msk.bf16.vlgmr.msra.gmra.mrb[0].mxu0 %vm513_vm0, %v768_v44  ;;  %v756_v4 = vadd.f32 %v3289_v3, %v734_v45 }
 0x163   : > { %v1194_v24 = vpop.xlane.xlu0 %1193  ;;  %v715_v57 = vmul.f32 %v2787_v50, %v3198_v15  ;;  %2796 = vrsqrt.f32 %v688_v46  ;;  %v674_v60 = vmul.f32 0.03125, %v658_v52  ;;  %v757_v32 = vadd.f32 %v3289_v3, %v735_v56 }
 0x164   : > { %v1198_v61 = vmul.f32 0.03125, %v1194_v24  ;;  %2798 = vrsqrt.f32 %v689_v47  ;;  %v769_v62 = vpack.c.bf16 %v756_v4, %v755_v55  ;;  %v736_v28 = vmul.f32 %v3281_v54, %v714_v51  ;;  %v2312_v24 = vld [vmem:[%s3827_s9] ss:$0 sm:$0xff] }
 0x165   : > { %v2789_v5 = vpop.eup %2788  ;;  %v690_v0 = vadd.f32 1e-05, %v674_v60  ;;  %v737_v33 = vmul.f32 %v3281_v54, %v715_v57 }
 0x166   : > { %v1200_v40 = vadd.f32 1e-05, %v1198_v61  ;;  %v2791_v1 = vpop.eup %2790  ;;  %v716_v2 = vmul.f32 %v2789_v5, %v3201_v13  ;;  %v1197_v6 = vpop.xlane.xlu1 %1196  ;;  %2478 = vmatprep.mubr.msk.bf16.mxu0 %vm513_vm0, %v769_v62  ;;  %v758_v15 = vadd.f32 %v3289_v3, %v736_v28 }
 0x167   : > { %v717_v7 = vmul.f32 %v2791_v1, %v3210_v31  ;;  %2800 = vrsqrt.f32 %v690_v0  ;;  %v1199_v8 = vmul.f32 0.03125, %v1197_v6  ;;  %v759_v12 = vadd.f32 %v3289_v3, %v737_v33 }
 0x168   : > { %2802 = vrsqrt.f32 %v1200_v40  ;;  %v770_v48 = vpack.c.bf16 %v758_v15, %v757_v32  ;;  %v738_v10 = vmul.f32 %v3281_v54, %v716_v2 }
 0x169   : > { %v2793_v11 = vpop.eup %2792  ;;  %v1201_v41 = vadd.f32 1e-05, %v1199_v8  ;;  %v739_v19 = vmul.f32 %v3281_v54, %v717_v7 }
 0x16a   : > { %v2795_v13 = vpop.eup %2794  ;;  %v718_v14 = vmul.f32 %v2793_v11, %v3213_v17  ;;  %2479 = vmatmul.mubr.msk.bf16.gmra.mrb[4].mxu0 %vm513_vm0, %v770_v48  ;;  %v760_v18 = vadd.f32 %v3289_v3, %v738_v10 }
 0x16b   : > { %v719_v31 = vmul.f32 %v2795_v13, %v3222_v43  ;;  %2804 = vrsqrt.f32 %v1201_v41  ;;  %v761_v17 = vadd.f32 %v3289_v3, %v739_v19 }
 0x16c   : > { %v771_v22 = vpack.c.bf16 %v760_v18, %v759_v12  ;;  %v740_v23 = vmul.f32 %v3281_v54, %v718_v14 }
 0x16d   : > { %v2797_v26 = vpop.eup %2796  ;;  %v741_v16 = vmul.f32 %v3281_v54, %v719_v31 }
 0x16e   : > { %v2799_v27 = vpop.eup %2798  ;;  %v720_v30 = vmul.f32 %v2797_v26, %v3225_v21  ;;  %2482 = vmatprep.mubr.msk.bf16.mxu0 %vm513_vm0, %v771_v22  ;;  %v762_v49 = vadd.f32 %v3289_v3, %v740_v23 }
 0x16f   : > { %v721_v34 = vmul.f32 %v2799_v27, %v3234_v53  ;;  %v763_v21 = vadd.f32 %v3289_v3, %v741_v16  ;;  %v2323_v53 = vld [vmem:[%s3840_s2] ss:$0 sm:$0xff] }
 0x170   : > { %v772_v35 = vpack.c.bf16 %v762_v49, %v761_v17  ;;  %v742_v43 = vmul.f32 %v3281_v54, %v720_v30 }
 0x171   : > { %v2801_v36 = vpop.eup %2800  ;;  %v743_v39 = vmul.f32 %v3281_v54, %v721_v34 }
 0x172   : > { %v2803_v37 = vpop.eup %2802  ;;  %v722_v58 = vmul.f32 %v2801_v36, %v3237_v25  ;;  %2483 = vmatmul.mubr.msk.bf16.gmra.mrb[8].mxu0 %vm513_vm0, %v772_v35  ;;  %v764_v38 = vadd.f32 %v3289_v3, %v742_v43 }
 0x173   : > { %v1204_v42 = vmul.f32 %v2803_v37, %v3246_v63  ;;  %v765_v59 = vadd.f32 %v3289_v3, %v743_v39  ;;  %v2324_v63 = vld [vmem:[%s3821_s3] ss:$0 sm:$0xff] }
 0x174   : > { %v773_v20 = vpack.c.bf16 %v764_v38, %v763_v21  ;;  %v744_v44 = vmul.f32 %v3281_v54, %v722_v58  ;;  %v2325_v37 = vld [vmem:[%s3825_s7] ss:$0 sm:$0xff] }
 0x175   : > { %v2805_v45 = vpop.eup %2804  ;;  %v1212_v47 = vmul.f32 %v2323_v53, %v1204_v42 }
 0x176   : > { %v1205_v25 = vmul.f32 %v2805_v45, %v3249_v29  ;;  %2486 = vmatprep.mubr.msk.bf16.mxu0 %vm513_vm0, %v773_v20  ;;  %v766_v46 = vadd.f32 %v3289_v3, %v744_v44 }
 0x177   : > { %v3351_v52 = vadd.f32 %v2324_v63, %v1212_v47 }
 0x178   : > { %v774_v50 = vpack.c.bf16 %v766_v46, %v765_v59  ;;  %v1213_v51 = vmul.f32 %v2323_v53, %v1205_v25 }
 0x17a   : > { %2487 = vmatmul.mubr.msk.bf16.gmra.mrb[12].mxu0 %vm513_vm0, %v774_v50  ;;  %v3353_v54 = vadd.f32 %v2324_v63, %v1213_v51 }
 0x17b   : > { %2514 = vmatprep.mubr.msk.bf16.mxu0 %vm2919_vm1, %v2918_v9 }
 0x17c   : > { %v3359_v29 = vpack.c.bf16 %v3353_v54, %v3351_v52 }
 0x17e   : > { %2495 = vmatmul.mubr.msk.bf16.vlgmr.msra.gmra.mrb[0].mxu1 %vm513_vm0, %v3359_v29 }
 0x17f   : > { %2534 = vmatprep.mubr.msk.bf16.mxu1 %vm2919_vm1, %v2918_v9 }
 0x235   : > { %v2476_v3 = vpop.f32.mrb[0].mxu0 }
 0x236   : > { %v856_v55 = vpop.f32.mrb[1].mxu0  ;;  %v865_v56 = vadd.f32 %v2476_v3, %v2312_v24 }
 0x237   : > { %v2477_v4 = vpop.f32.mrb[2].mxu0  ;;  %v857_v61 = vadd.f32 %v2312_v24, %v856_v55 }
 0x238   : > { %v868_v57 = vadd.f32 %v2477_v4, %v2312_v24  ;;  %v859_v60 = vpop.f32.mrb[3].mxu0 }
 0x239   : > { %v860_v62 = vadd.f32 %v2312_v24, %v859_v60 }
 0x23a   : > { %v3368_v28 = vpack.c.bf16 %v868_v57, %v865_v56  ;;  %v1223_v57 = vlaneseq }
 0x23b   : > { %v3370_v5 = vpack.c.bf16 %v860_v62, %v857_v61 }
 0x23c   : > { %929 = vst.msk [vmem:[#allocation2 + $0x8] sm:$0xff] %vm927_vm2, %v3368_v28  ;;  %v3422_v60 = vand.u32 127, %v1223_v57 }
 0x23d   : > { %928 = vst.msk [vmem:[#allocation2] sm:$0xff] %vm927_vm2, %v3370_v5  ;;  %v2480_v0 = vpop.f32.mrb[4].mxu0 }
 0x23e   : > { %v872_v40 = vpop.f32.mrb[5].mxu0  ;;  %v881_v2 = vadd.f32 %v2480_v0, %v2312_v24  ;;  %vm1225_vm3 = vcmp.ge.s32.totalorder %v3422_v60, 8 }
 0x23f   : > { %v2481_v1 = vpop.f32.mrb[6].mxu0  ;;  %v873_v15 = vadd.f32 %v2312_v24, %v872_v40 }
 0x240   : > { %v884_v6 = vadd.f32 %v2481_v1, %v2312_v24  ;;  %v875_v32 = vpop.f32.mrb[7].mxu0 }
 0x241   : > { %v876_v33 = vadd.f32 %v2312_v24, %v875_v32 }
 0x242   : > { %v3376_v7 = vpack.c.bf16 %v884_v6, %v881_v2 }
 0x243   : > { %v3378_v8 = vpack.c.bf16 %v876_v33, %v873_v15  ;;  %v1295_v23 = vld [vmem:[#allocation2 + $0x8] sm:$0xff] }
 0x244   : > { %931 = vst.msk [vmem:[#allocation2 + $0x18] sm:$0xff] %vm927_vm2, %v3376_v7  ;;  %v1294_v48 = vld [vmem:[#allocation2] sm:$0xff]  ;;  %v1310_v30 = vsel %vm927_vm2, %v1295_v23, 0 }
 0x245   : > { %930 = vst.msk [vmem:[#allocation2 + $0x10] sm:$0xff] %vm927_vm2, %v3378_v8  ;;  %v2484_v10 = vpop.f32.mrb[8].mxu0  ;;  %v1307_v11 = vsel %vm927_vm2, %v1294_v48, 0 }
 0x246   : > { %v888_v41 = vpop.f32.mrb[9].mxu0  ;;  %2499 = vmatpush3.bf16.xpose.msra.mxu0 %v1307_v11  ;;  %v897_v14 = vadd.f32 %v2484_v10, %v2312_v24 }
 0x247   : > { %v2485_v13 = vpop.f32.mrb[10].mxu0  ;;  %2500 = vmatprep.subr.bf16.mxu0 %v2918_v9  ;;  %v889_v19 = vadd.f32 %v2312_v24, %v888_v41 }
 0x248   : > { %v900_v12 = vadd.f32 %v2485_v13, %v2312_v24  ;;  %v891_v18 = vpop.f32.mrb[11].mxu0 }
 0x249   : > { %v892_v31 = vadd.f32 %v2312_v24, %v891_v18 }
 0x24a   : > { %v3386_v22 = vpack.c.bf16 %v900_v12, %v897_v14 }
 0x24b   : > { %v3388_v26 = vpack.c.bf16 %v892_v31, %v889_v19  ;;  %v1297_v46 = vld [vmem:[#allocation2 + $0x18] sm:$0xff] }
 0x24c   : > { %933 = vst.msk [vmem:[#allocation2 + $0x28] sm:$0xff] %vm927_vm2, %v3386_v22  ;;  %v1296_v39 = vld [vmem:[#allocation2 + $0x10] sm:$0xff]  ;;  %v1316_v47 = vsel %vm927_vm2, %v1297_v46, 0 }
 0x24d   : > { %932 = vst.msk [vmem:[#allocation2 + $0x20] sm:$0xff] %vm927_vm2, %v3388_v26  ;;  %v2488_v27 = vpop.f32.mrb[12].mxu0  ;;  %v1313_v25 = vsel %vm927_vm2, %v1296_v39, 0 }
 0x24e   : > { %v904_v17 = vpop.f32.mrb[13].mxu0  ;;  %2501 = vmatpush3.bf16.xpose.msra.mxu0 %v1310_v30  ;;  %v913_v16 = vadd.f32 %v2488_v27, %v2312_v24 }
 0x24f   : > { %v2489_v49 = vpop.f32.mrb[14].mxu0  ;;  %2502 = vmatprep.subr.bf16.mxu0 %v2918_v9  ;;  %v905_v43 = vadd.f32 %v2312_v24, %v904_v17 }
 0x250   : > { %v916_v34 = vadd.f32 %v2489_v49, %v2312_v24  ;;  %v907_v35 = vpop.f32.mrb[15].mxu0 }
 0x251   : > { %v908_v36 = vadd.f32 %v2312_v24, %v907_v35  ;;  %v1286_v58 = vpop.f32.mrb[0].mxu1 }
 0x252   : > { %v3399_v21 = vpack.c.bf16 %v916_v34, %v913_v16  ;;  %v2496_v38 = vpop.f32.mrb[1].mxu1  ;;  %v1287_v20 = vadd.f32 %v2325_v37, %v1286_v58 }
 0x253   : > { %v3401_v42 = vpack.c.bf16 %v908_v36, %v905_v43  ;;  %v1289_v53 = vpop.f32.mrb[2].mxu1  ;;  %v1299_v51 = vld [vmem:[#allocation2 + $0x28] sm:$0xff] }
 0x254   : > { %935 = vst.msk [vmem:[#allocation2 + $0x38] sm:$0xff] %vm927_vm2, %v3399_v21  ;;  %v1290_v44 = vadd.f32 %v2325_v37, %v1289_v53  ;;  %v2497_v45 = vpop.f32.mrb[3].mxu1  ;;  %v1298_v63 = vld [vmem:[#allocation2 + $0x20] sm:$0xff]  ;;  %v1322_v3 = vsel %vm927_vm2, %v1299_v51, 0 }
 0x255   : > { %934 = vst.msk [vmem:[#allocation2 + $0x30] sm:$0xff] %vm927_vm2, %v3401_v42  ;;  %v1319_v50 = vsel %vm927_vm2, %v1298_v63, 0  ;;  %v2762_v63 = vld [vmem:[%s3824_s6 + $0x10] sm:$0xff]  }
 0x256   : > { %v1293_v59 = vpack.c.bf16 %v1290_v44, %v1287_v20  ;;  %2503 = vmatpush3.bf16.xpose.msra.mxu0 %v1313_v25 }
 0x257   : > { %2504 = vmatprep.subr.bf16.mxu0 %v2918_v9 }
 0x25b   : > { %v1301_v4 = vld [vmem:[#allocation2 + $0x38] sm:$0xff] }
 0x25c   : > { %v1300_v24 = vld [vmem:[#allocation2 + $0x30] sm:$0xff]  ;;  %v1328_v56 = vsel %vm927_vm2, %v1301_v4, 0 }
 0x25d   : > { %v1325_v55 = vsel %vm927_vm2, %v1300_v24, 0  ;;  %v2763_v24 = vld [vmem:[%s3824_s6 + $0x18] sm:$0xff]  }
 0x25e   : > { %2505 = vmatpush3.bf16.xpose.msra.mxu0 %v1316_v47 }
 0x25f   : > { %2506 = vmatprep.subr.bf16.mxu0 %v2918_v9 }
 0x266   : > { %2507 = vmatpush3.bf16.xpose.msra.mxu0 %v1319_v50 }
 0x267   : > { %2508 = vmatprep.subr.bf16.mxu0 %v2918_v9 }
 0x26e   : > { %2509 = vmatpush3.bf16.xpose.msra.mxu0 %v1322_v3 }
 0x26f   : > { %2510 = vmatprep.subr.bf16.mxu0 %v2918_v9 }
 0x276   : > { %2511 = vmatpush3.bf16.xpose.msra.mxu0 %v1325_v55 }
 0x277   : > { %2512 = vmatprep.subr.bf16.mxu0 %v2918_v9 }
 0x27e   : > { %2513 = vmatpush3.bf16.xpose.msra.mxu0 %v1328_v56 }
 0x27f   : > { %2566 = vmatprep.subr.bf16.mxu0 %v2918_v9 }
 0x285   : > { %2515 = vmatmul.mubr.msk.bf16.vlgmr.msra.gmra.mrb[16].mxu0 %vm927_vm2, %v1293_v59 }
 0x286   : > { %2582 = vmatprep.mubr.msk.bf16.mxu0 %vm2919_vm1, %v2918_v9 }
 0x358   : > { %v1364_v61 = vpop.f32.mrb[16].mxu0 }
 0x359   : > { %v2516_v62 = vpop.f32.mrb[17].mxu0  ;;  %v1371_v0 = vsel %vm1225_vm3, -1e+30, %v1364_v61 }
 0x35a   : > { %1373 = vmax.xlane.f32.xlu0 %v1371_v0  ;;  %v1367_v40 = vpop.f32.mrb[18].mxu0 }
 0x35b   : > { %v2517_v1 = vpop.f32.mrb[19].mxu0  ;;  %v1372_v2 = vsel %vm1225_vm3, -1e+30, %v1367_v40 }
 0x35c   : > { %1375 = vmax.xlane.f32.xlu1 %v1372_v2 }
 0x36d   : > { %946 = vrot.lane.b32.xlu1 %v3368_v28, %s2920_s24 }
 0x370   : > { %944 = vrot.lane.b32.xlu0 %v3370_v5, %s2920_s24 }
 0x371   : > { %948 = vrot.lane.b32.xlu1 %v3378_v8, %s2920_s24 }
 0x374   : > { %950 = vrot.lane.b32.xlu0 %v3376_v7, %s2920_s24 }
 0x375   : > { %952 = vrot.lane.b32.xlu1 %v3388_v26, %s2920_s24 }
 0x379   : > { %954 = vrot.lane.b32.xlu1 %v3386_v22, %s2920_s24 }
 0x3e7   : > { %v1374_v6 = vpop.xlane.xlu0 %1373 }
 0x3e8   : > { %v1377_v32 = vsub.f32 %v1371_v0, %v1374_v6 }
 0x3e9   : > { %v1376_v15 = vpop.xlane.xlu1 %1375 }
 0x3ea   : > { %v1379_v33 = vmul.f32 1.442695, %v1377_v32  ;;  %v1378_v48 = vsub.f32 %v1372_v2, %v1376_v15 }
 0x3eb   : > { %v945_v10 = vpop.permute.xlu0 %944 }
 0x3ec   : > { %2806 = vpow2.f32 %v1379_v33  ;;  %v1381_v11 = vmul.f32 1.442695, %v1378_v48  ;;  %968 = vst.msk [vmem:[#allocation3] sm:$0xff] %vm927_vm2, %v945_v10 }
 0x3ed   : > { %v947_v41 = vpop.permute.xlu1 %946 }
 0x3ee   : > { %2808 = vpow2.f32 %v1381_v11  ;;  %969 = vst.msk [vmem:[#allocation3 + $0x8] sm:$0xff] %vm927_vm2, %v947_v41 }
 0x3ef   : > { %v951_v13 = vpop.permute.xlu0 %950 }
 0x3f0   : > { %971 = vst.msk [vmem:[#allocation3 + $0x18] sm:$0xff] %vm927_vm2, %v951_v13 }
 0x3f1   : > { %v949_v14 = vpop.permute.xlu1 %948 }
 0x3f2   : > { %970 = vst.msk [vmem:[#allocation3 + $0x10] sm:$0xff] %vm927_vm2, %v949_v14 }
 0x3f3   : > { %v1392_v12 = vld [vmem:[#allocation3] sm:$0xff] }
 0x3f4   : > { %2519 = vmatpush3.bf16.msra.mxu1 %v1392_v12 }
 0x3f5   : > { %v953_v18 = vpop.permute.xlu1 %952  ;;  %2520 = vmatprep.subr.bf16.mxu1 %v2918_v9  ;;  %v1393_v31 = vld [vmem:[#allocation3 + $0x8] sm:$0xff] }
 0x3f6   : > { %v2807_v19 = vpop.eup %2806  ;;  %972 = vst.msk [vmem:[#allocation3 + $0x20] sm:$0xff] %vm927_vm2, %v953_v18  ;;  %v2335_v18 = vld [vmem:[%s3825_s7 + $0x1] ss:$0 sm:$0xff] }
 0x3f7   : > { %1383 = vadd.xlane.f32.xlu1 %v2807_v19  ;;  %v1395_v17 = vld [vmem:[#allocation3 + $0x18] sm:$0xff] }
 0x3f8   : > { %v2809_v23 = vpop.eup %2808  ;;  %2521 = vmatpush3.bf16.msra.mxu1 %v1393_v31 }
 0x3f9   : > { %1385 = vadd.xlane.f32.xlu0 %v2809_v23  ;;  %v955_v27 = vpop.permute.xlu1 %954  ;;  %2522 = vmatprep.subr.bf16.mxu1 %v2918_v9  ;;  %v1394_v30 = vld [vmem:[#allocation3 + $0x10] sm:$0xff] }
 0x3fa   : > { %973 = vst.msk [vmem:[#allocation3 + $0x28] sm:$0xff] %vm927_vm2, %v955_v27 }
 0x3fc   : > { %2523 = vmatpush3.bf16.msra.mxu1 %v1394_v30 }
 0x3fd   : > { %2524 = vmatprep.subr.bf16.mxu1 %v2918_v9  ;;  %v1396_v49 = vld [vmem:[#allocation3 + $0x20] sm:$0xff] }
 0x400   : > { %2525 = vmatpush3.bf16.msra.mxu1 %v1395_v17 }
 0x401   : > { %2526 = vmatprep.subr.bf16.mxu1 %v2918_v9  ;;  %v1397_v16 = vld [vmem:[#allocation3 + $0x28] sm:$0xff] }
 0x404   : > { %2527 = vmatpush3.bf16.msra.mxu1 %v1396_v49 }
 0x405   : > { %2528 = vmatprep.subr.bf16.mxu1 %v2918_v9 }
 0x408   : > { %958 = vrot.lane.b32.xlu1 %v3399_v21, %s2920_s24  ;;  %2529 = vmatpush3.bf16.msra.mxu1 %v1397_v16 }
 0x409   : > { %2530 = vmatprep.subr.bf16.mxu1 %v2918_v9 }
 0x40c   : > { %978 = vrot.lane.b32.xlu1 %v3368_v28, %s2921_s22 }
 0x40f   : > { %956 = vrot.lane.b32.xlu0 %v3401_v42, %s2920_s24 }
 0x410   : > { %982 = vrot.lane.b32.xlu1 %v3376_v7, %s2921_s22 }
 0x413   : > { %976 = vrot.lane.b32.xlu0 %v3370_v5, %s2921_s22 }
 0x414   : > { %986 = vrot.lane.b32.xlu1 %v3386_v22, %s2921_s22 }
 0x417   : > { %980 = vrot.lane.b32.xlu0 %v3378_v8, %s2921_s22 }
 0x418   : > { %990 = vrot.lane.b32.xlu1 %v3399_v21, %s2921_s22 }
 0x41b   : > { %984 = vrot.lane.b32.xlu0 %v3388_v26, %s2921_s22 }
 0x41f   : > { %988 = vrot.lane.b32.xlu0 %v3401_v42, %s2921_s22  ;;  %s2922_s22 = smov 88  }
 0x484   : > { %v1384_v34 = vpop.xlane.xlu1 %1383 }
 0x486   : > { %v1386_v35 = vpop.xlane.xlu0 %1385 }
 0x487   : > { %2810 = vrcp.f32 %v1386_v35 }
 0x488   : > { %v959_v43 = vpop.permute.xlu1 %958  ;;  %2812 = vrcp.f32 %v1384_v34 }
 0x489   : > { %975 = vst.msk [vmem:[#allocation3 + $0x38] sm:$0xff] %vm927_vm2, %v959_v43 }
 0x48a   : > { %v957_v36 = vpop.permute.xlu0 %956 }
 0x48b   : > { %974 = vst.msk [vmem:[#allocation3 + $0x30] sm:$0xff] %vm927_vm2, %v957_v36 }
 0x48c   : > { %v979_v37 = vpop.permute.xlu1 %978 }
 0x48d   : > { %1002 = vst.msk [vmem:[#allocation2 + $0x48] sm:$0xff] %vm927_vm2, %v979_v37 }
 0x48e   : > { %v977_v58 = vpop.permute.xlu0 %976 }
 0x48f   : > { %1001 = vst.msk [vmem:[#allocation2 + $0x40] sm:$0xff] %vm927_vm2, %v977_v58 }
 0x490   : > { %v983_v38 = vpop.permute.xlu1 %982  ;;  %v1399_v46 = vld [vmem:[#allocation3 + $0x38] sm:$0xff] }
 0x491   : > { %v2811_v39 = vpop.eup %2810  ;;  %1004 = vst.msk [vmem:[#allocation2 + $0x58] sm:$0xff] %vm927_vm2, %v983_v38 }
 0x492   : > { %v981_v53 = vpop.permute.xlu0 %980  ;;  %v1398_v20 = vld [vmem:[#allocation3 + $0x30] sm:$0xff]  ;;  %v2813_v44 = vpop.eup %2812  ;;  %v1390_v25 = vmul.f32 %v2811_v39, %v2809_v23 }
 0x493   : > { %1003 = vst.msk [vmem:[#allocation2 + $0x50] sm:$0xff] %vm927_vm2, %v981_v53  ;;  %2531 = vmatpush3.bf16.msra.mxu1 %v1398_v20  ;;  %v1389_v47 = vmul.f32 %v2813_v44, %v2807_v19 }
 0x494   : > { %v987_v45 = vpop.permute.xlu1 %986  ;;  %2532 = vmatprep.subr.bf16.mxu1 %v2918_v9  ;;  %v1512_v56 = vld [vmem:[#allocation2 + $0x48] sm:$0xff] }
 0x495   : > { %1006 = vst.msk [vmem:[#allocation2 + $0x68] sm:$0xff] %vm927_vm2, %v987_v45  ;;  %v1391_v51 = vpack.c.bf16 %v1390_v25, %v1389_v47  ;;  %v1526_v57 = vsel %vm927_vm2, %v1512_v56, 0 }
 0x496   : > { %v985_v59 = vpop.permute.xlu0 %984  ;;  %v1511_v55 = vld [vmem:[#allocation2 + $0x40] sm:$0xff] }
 0x497   : > { %1005 = vst.msk [vmem:[#allocation2 + $0x60] sm:$0xff] %vm927_vm2, %v985_v59  ;;  %2533 = vmatpush3.bf16.msra.mxu1 %v1399_v46  ;;  %v1523_v4 = vsel %vm927_vm2, %v1511_v55, 0 }
 0x498   : > { %v991_v50 = vpop.permute.xlu1 %990  ;;  %2538 = vmatprep.subr.bf16.mxu1 %v2918_v9  ;;  %v1514_v0 = vld [vmem:[#allocation2 + $0x58] sm:$0xff] }
 0x499   : > { %1008 = vst.msk [vmem:[#allocation2 + $0x78] sm:$0xff] %vm927_vm2, %v991_v50  ;;  %v1532_v40 = vsel %vm927_vm2, %v1514_v0, 0 }
 0x49a   : > { %v989_v3 = vpop.permute.xlu0 %988  ;;  %2535 = vmatmul.mubr.bf16.vlgmr.msra.gmra.mrb[4].mxu1 %v1391_v51  ;;  %v1513_v61 = vld [vmem:[#allocation2 + $0x50] sm:$0xff] }
 0x49b   : > { %1007 = vst.msk [vmem:[#allocation2 + $0x70] sm:$0xff] %vm927_vm2, %v989_v3  ;;  %2539 = vmatpush3.bf16.msra.mxu1 %v2762_v63  ;;  %2542 = vmatprep.mubr.msk.bf16.mxu1 %vm2919_vm1, %v2918_v9  ;;  %v1529_v62 = vsel %vm927_vm2, %v1513_v61, 0 }
 0x49c   : > { %2540 = vmatprep.subr.bf16.mxu1 %v2918_v9  ;;  %v1516_v6 = vld [vmem:[#allocation2 + $0x68] sm:$0xff] }
 0x49d   : > { %v1538_v32 = vsel %vm927_vm2, %v1516_v6, 0 }
 0x49e   : > { %v1515_v1 = vld [vmem:[#allocation2 + $0x60] sm:$0xff] }
 0x49f   : > { %2541 = vmatpush3.bf16.msra.mxu1 %v2763_v24  ;;  %v1535_v2 = vsel %vm927_vm2, %v1515_v1, 0 }
 0x4a0   : > { %2546 = vmatprep.subr.bf16.mxu1 %v2918_v9  ;;  %v1518_v48 = vld [vmem:[#allocation2 + $0x78] sm:$0xff] }
 0x4a1   : > { %v1544_v10 = vsel %vm927_vm2, %v1518_v48, 0 }
 0x4a2   : > { %2543 = vmatmul.mubr.msk.bf16.vlgmr.msra.gmra.mrb[8].mxu1 %vm513_vm0, %v3359_v29  ;;  %v1517_v15 = vld [vmem:[#allocation2 + $0x70] sm:$0xff] }
 0x4a3   : > { %2562 = vmatprep.mubr.msk.bf16.mxu1 %vm2919_vm1, %v2918_v9  ;;  %v1541_v33 = vsel %vm927_vm2, %v1517_v15, 0 }
 0x4a8   : > { %2547 = vmatpush3.bf16.xpose.msra.mxu1 %v1523_v4 }
 0x4a9   : > { %2548 = vmatprep.subr.bf16.mxu1 %v2918_v9 }
 0x4b0   : > { %2549 = vmatpush3.bf16.xpose.msra.mxu1 %v1526_v57 }
 0x4b1   : > { %2550 = vmatprep.subr.bf16.mxu1 %v2918_v9 }
 0x4b8   : > { %2551 = vmatpush3.bf16.xpose.msra.mxu1 %v1529_v62 }
 0x4b9   : > { %2552 = vmatprep.subr.bf16.mxu1 %v2918_v9 }
 0x4c0   : > { %2553 = vmatpush3.bf16.xpose.msra.mxu1 %v1532_v40 }
 0x4c1   : > { %2554 = vmatprep.subr.bf16.mxu1 %v2918_v9 }
 0x4c8   : > { %2555 = vmatpush3.bf16.xpose.msra.mxu1 %v1535_v2 }
 0x4c9   : > { %2556 = vmatprep.subr.bf16.mxu1 %v2918_v9 }
 0x4d0   : > { %2557 = vmatpush3.bf16.xpose.msra.mxu1 %v1538_v32 }
 0x4d1   : > { %2558 = vmatprep.subr.bf16.mxu1 %v2918_v9 }
 0x4d8   : > { %2559 = vmatpush3.bf16.xpose.msra.mxu1 %v1541_v33 }
 0x4d9   : > { %2560 = vmatprep.subr.bf16.mxu1 %v2918_v9 }
 0x4e0   : > { %2561 = vmatpush3.bf16.xpose.msra.mxu1 %v1544_v10 }
 0x4e1   : > { %2614 = vmatprep.subr.bf16.mxu1 %v2918_v9 }
 0x56d   : > { %v1434_v11 = vpop.f32.mrb[4].mxu1 }
 0x56e   : > { %v2536_v41 = vpop.f32.mrb[5].mxu1 }
 0x56f   : > { %v1437_v13 = vpop.f32.mrb[6].mxu1 }
 0x570   : > { %v1441_v14 = vpack.c.bf16 %v1437_v13, %v1434_v11  ;;  %v2537_v12 = vpop.f32.mrb[7].mxu1 }
 0x571   : > { %v2764_v12 = vld [vmem:[%s3824_s6 + $0x20] sm:$0xff]  }
 0x572   : > { %1442 = vst.msk [vmem:[#allocation4] sm:$0xff] %vm927_vm2, %v1441_v14 }
 0x575   : > { %v1502_v19 = vpop.f32.mrb[8].mxu1 }
 0x576   : > { %v2544_v31 = vpop.f32.mrb[9].mxu1  ;;  %v1503_v27 = vadd.f32 %v2335_v18, %v1502_v19 }
 0x577   : > { %v1505_v23 = vpop.f32.mrb[10].mxu1 }
 0x578   : > { %v1506_v30 = vadd.f32 %v2335_v18, %v1505_v23  ;;  %v2545_v17 = vpop.f32.mrb[11].mxu1  ;;  %v2765_v23 = vld [vmem:[%s3824_s6 + $0x28] sm:$0xff]  }
 0x57a   : > { %v1509_v49 = vpack.c.bf16 %v1506_v30, %v1503_v27 }
 0x57c   : > { %2563 = vmatmul.mubr.msk.bf16.vlgmr.msra.gmra.mrb[12].mxu1 %vm927_vm2, %v1509_v49 }
 0x57d   : > { %2630 = vmatprep.mubr.msk.bf16.mxu1 %vm2919_vm1, %v2918_v9 }
 0x64f   : > { %v1580_v16 = vpop.f32.mrb[12].mxu1 }
 0x650   : > { %v2564_v34 = vpop.f32.mrb[13].mxu1  ;;  %v1587_v35 = vsel %vm1225_vm3, -1e+30, %v1580_v16 }
 0x651   : > { %1589 = vmax.xlane.f32.xlu0 %v1587_v35  ;;  %v1583_v43 = vpop.f32.mrb[14].mxu1 }
 0x652   : > { %v2565_v36 = vpop.f32.mrb[15].mxu1  ;;  %v1588_v37 = vsel %vm1225_vm3, -1e+30, %v1583_v43 }
 0x653   : > { %1591 = vmax.xlane.f32.xlu1 %v1588_v37 }
 0x664   : > { %1011 = vrot.lane.b32.xlu1 %v3368_v28, %s2922_s22 }
 0x667   : > { %1009 = vrot.lane.b32.xlu0 %v3370_v5, %s2922_s22 }
 0x668   : > { %1017 = vrot.lane.b32.xlu1 %v3388_v26, %s2922_s22 }
 0x66b   : > { %1013 = vrot.lane.b32.xlu0 %v3378_v8, %s2922_s22 }
 0x66c   : > { %1019 = vrot.lane.b32.xlu1 %v3386_v22, %s2922_s22 }
 0x66f   : > { %1015 = vrot.lane.b32.xlu0 %v3376_v7, %s2922_s22 }
 0x6de   : > { %v1590_v58 = vpop.xlane.xlu0 %1589 }
 0x6df   : > { %v1593_v38 = vsub.f32 %v1587_v35, %v1590_v58 }
 0x6e0   : > { %v1592_v39 = vpop.xlane.xlu1 %1591 }
 0x6e1   : > { %v1595_v53 = vmul.f32 1.442695, %v1593_v38  ;;  %v1594_v20 = vsub.f32 %v1588_v37, %v1592_v39 }
 0x6e2   : > { %v1010_v44 = vpop.permute.xlu0 %1009 }
 0x6e3   : > { %2814 = vpow2.f32 %v1595_v53  ;;  %v1597_v45 = vmul.f32 1.442695, %v1594_v20  ;;  %1034 = vst.msk [vmem:[#allocation3 + $0x40] sm:$0xff] %vm927_vm2, %v1010_v44 }
 0x6e4   : > { %v1012_v25 = vpop.permute.xlu1 %1011 }
 0x6e5   : > { %2816 = vpow2.f32 %v1597_v45  ;;  %1035 = vst.msk [vmem:[#allocation3 + $0x48] sm:$0xff] %vm927_vm2, %v1012_v25 }
 0x6e6   : > { %v1014_v59 = vpop.permute.xlu0 %1013 }
 0x6e7   : > { %1036 = vst.msk [vmem:[#allocation3 + $0x50] sm:$0xff] %vm927_vm2, %v1014_v59 }
 0x6e8   : > { %v1018_v46 = vpop.permute.xlu1 %1017 }
 0x6e9   : > { %1038 = vst.msk [vmem:[#allocation3 + $0x60] sm:$0xff] %vm927_vm2, %v1018_v46 }
 0x6ea   : > { %v1016_v47 = vpop.permute.xlu0 %1015  ;;  %v1609_v63 = vld [vmem:[#allocation3 + $0x40] sm:$0xff] }
 0x6eb   : > { %1037 = vst.msk [vmem:[#allocation3 + $0x58] sm:$0xff] %vm927_vm2, %v1016_v47  ;;  %2567 = vmatpush3.bf16.msra.mxu0 %v1609_v63  ;;  %v2345_v63 = vld [vmem:[%s3825_s7 + $0x2] ss:$0 sm:$0xff] }
 0x6ec   : > { %v1020_v50 = vpop.permute.xlu1 %1019  ;;  %2568 = vmatprep.subr.bf16.mxu0 %v2918_v9  ;;  %v1610_v3 = vld [vmem:[#allocation3 + $0x48] sm:$0xff] }
 0x6ed   : > { %v2815_v51 = vpop.eup %2814  ;;  %1039 = vst.msk [vmem:[#allocation3 + $0x68] sm:$0xff] %vm927_vm2, %v1020_v50 }
 0x6ee   : > { %1599 = vadd.xlane.f32.xlu1 %v2815_v51  ;;  %v1611_v55 = vld [vmem:[#allocation3 + $0x50] sm:$0xff] }
 0x6ef   : > { %v2817_v24 = vpop.eup %2816  ;;  %2569 = vmatpush3.bf16.msra.mxu0 %v1610_v3 }
 0x6f0   : > { %1601 = vadd.xlane.f32.xlu0 %v2817_v24  ;;  %2570 = vmatprep.subr.bf16.mxu0 %v2918_v9  ;;  %v1613_v56 = vld [vmem:[#allocation3 + $0x60] sm:$0xff] }
 0x6f2   : > { %v1612_v4 = vld [vmem:[#allocation3 + $0x58] sm:$0xff] }
 0x6f3   : > { %2571 = vmatpush3.bf16.msra.mxu0 %v1611_v55 }
 0x6f4   : > { %2572 = vmatprep.subr.bf16.mxu0 %v2918_v9  ;;  %v1614_v57 = vld [vmem:[#allocation3 + $0x68] sm:$0xff] }
 0x6f7   : > { %2573 = vmatpush3.bf16.msra.mxu0 %v1612_v4 }
 0x6f8   : > { %2574 = vmatprep.subr.bf16.mxu0 %v2918_v9 }
 0x6fb   : > { %2575 = vmatpush3.bf16.msra.mxu0 %v1613_v56 }
 0x6fc   : > { %2576 = vmatprep.subr.bf16.mxu0 %v2918_v9 }
 0x6ff   : > { %1023 = vrot.lane.b32.xlu1 %v3399_v21, %s2922_s22  ;;  %2577 = vmatpush3.bf16.msra.mxu0 %v1614_v57 }
 0x700   : > { %2578 = vmatprep.subr.bf16.mxu0 %v2918_v9 }
 0x703   : > { %1044 = vrot.lane.b32.xlu1 %v3368_v28, %s2923_s14 }
 0x706   : > { %1021 = vrot.lane.b32.xlu0 %v3401_v42, %s2922_s22 }
 0x707   : > { %1048 = vrot.lane.b32.xlu1 %v3376_v7, %s2923_s14 }
 0x70a   : > { %1042 = vrot.lane.b32.xlu0 %v3370_v5, %s2923_s14 }
 0x70b   : > { %1052 = vrot.lane.b32.xlu1 %v3386_v22, %s2923_s14 }
 0x70e   : > { %1046 = vrot.lane.b32.xlu0 %v3378_v8, %s2923_s14 }
 0x70f   : > { %1056 = vrot.lane.b32.xlu1 %v3399_v21, %s2923_s14 }
 0x712   : > { %1050 = vrot.lane.b32.xlu0 %v3388_v26, %s2923_s14 }
 0x716   : > { %1054 = vrot.lane.b32.xlu0 %v3401_v42, %s2923_s14  ;;  %s2924_s14 = smov 80  }
 0x77b   : > { %v1600_v61 = vpop.xlane.xlu1 %1599 }
 0x77d   : > { %v1602_v62 = vpop.xlane.xlu0 %1601 }
 0x77e   : > { %2818 = vrcp.f32 %v1602_v62 }
 0x77f   : > { %v1024_v0 = vpop.permute.xlu1 %1023  ;;  %2820 = vrcp.f32 %v1600_v61 }
 0x780   : > { %1041 = vst.msk [vmem:[#allocation3 + $0x78] sm:$0xff] %vm927_vm2, %v1024_v0 }
 0x781   : > { %v1022_v40 = vpop.permute.xlu0 %1021 }
 0x782   : > { %1040 = vst.msk [vmem:[#allocation3 + $0x70] sm:$0xff] %vm927_vm2, %v1022_v40 }
 0x783   : > { %v1045_v1 = vpop.permute.xlu1 %1044 }
 0x784   : > { %1068 = vst.msk [vmem:[#allocation2 + $0x88] sm:$0xff] %vm927_vm2, %v1045_v1 }
 0x785   : > { %v1043_v2 = vpop.permute.xlu0 %1042 }
 0x786   : > { %1067 = vst.msk [vmem:[#allocation2 + $0x80] sm:$0xff] %vm927_vm2, %v1043_v2 }
 0x787   : > { %v1049_v6 = vpop.permute.xlu1 %1048  ;;  %v1616_v13 = vld [vmem:[#allocation3 + $0x78] sm:$0xff] }
 0x788   : > { %v2819_v32 = vpop.eup %2818  ;;  %1070 = vst.msk [vmem:[#allocation2 + $0x98] sm:$0xff] %vm927_vm2, %v1049_v6 }
 0x789   : > { %v1047_v15 = vpop.permute.xlu0 %1046  ;;  %v1615_v33 = vld [vmem:[#allocation3 + $0x70] sm:$0xff]  ;;  %v2821_v48 = vpop.eup %2820  ;;  %v1606_v11 = vmul.f32 %v2819_v32, %v2817_v24 }
 0x78a   : > { %1069 = vst.msk [vmem:[#allocation2 + $0x90] sm:$0xff] %vm927_vm2, %v1047_v15  ;;  %2579 = vmatpush3.bf16.msra.mxu0 %v1615_v33  ;;  %v1605_v14 = vmul.f32 %v2821_v48, %v2815_v51 }
 0x78b   : > { %v1053_v10 = vpop.permute.xlu1 %1052  ;;  %2580 = vmatprep.subr.bf16.mxu0 %v2918_v9  ;;  %v1734_v17 = vld [vmem:[#allocation2 + $0x88] sm:$0xff] }
 0x78c   : > { %1072 = vst.msk [vmem:[#allocation2 + $0xa8] sm:$0xff] %vm927_vm2, %v1053_v10  ;;  %v1607_v19 = vpack.c.bf16 %v1606_v11, %v1605_v14  ;;  %v1748_v49 = vsel %vm927_vm2, %v1734_v17, 0 }
 0x78d   : > { %v1051_v41 = vpop.permute.xlu0 %1050  ;;  %v1733_v27 = vld [vmem:[#allocation2 + $0x80] sm:$0xff] }
 0x78e   : > { %1071 = vst.msk [vmem:[#allocation2 + $0xa0] sm:$0xff] %vm927_vm2, %v1051_v41  ;;  %2581 = vmatpush3.bf16.msra.mxu0 %v1616_v13  ;;  %v1745_v30 = vsel %vm927_vm2, %v1733_v27, 0 }
 0x78f   : > { %v1057_v18 = vpop.permute.xlu1 %1056  ;;  %2586 = vmatprep.subr.bf16.mxu0 %v2918_v9  ;;  %v1736_v35 = vld [vmem:[#allocation2 + $0x98] sm:$0xff] }
 0x790   : > { %1074 = vst.msk [vmem:[#allocation2 + $0xb8] sm:$0xff] %vm927_vm2, %v1057_v18  ;;  %v1754_v43 = vsel %vm927_vm2, %v1736_v35, 0 }
 0x791   : > { %v1055_v31 = vpop.permute.xlu0 %1054  ;;  %2583 = vmatmul.mubr.bf16.vlgmr.msra.gmra.mrb[20].mxu0 %v1607_v19  ;;  %v1735_v16 = vld [vmem:[#allocation2 + $0x90] sm:$0xff] }
 0x792   : > { %1073 = vst.msk [vmem:[#allocation2 + $0xb0] sm:$0xff] %vm927_vm2, %v1055_v31  ;;  %2587 = vmatpush3.bf16.msra.mxu0 %v2764_v12  ;;  %2590 = vmatprep.mubr.msk.bf16.mxu0 %vm2919_vm1, %v2918_v9  ;;  %v1751_v34 = vsel %vm927_vm2, %v1735_v16, 0 }
 0x793   : > { %2588 = vmatprep.subr.bf16.mxu0 %v2918_v9  ;;  %v1738_v58 = vld [vmem:[#allocation2 + $0xa8] sm:$0xff] }
 0x794   : > { %v1760_v38 = vsel %vm927_vm2, %v1738_v58, 0 }
 0x795   : > { %v1737_v36 = vld [vmem:[#allocation2 + $0xa0] sm:$0xff] }
 0x796   : > { %2589 = vmatpush3.bf16.msra.mxu0 %v2765_v23  ;;  %v1757_v37 = vsel %vm927_vm2, %v1737_v36, 0 }
 0x797   : > { %2594 = vmatprep.subr.bf16.mxu0 %v2918_v9  ;;  %v1740_v20 = vld [vmem:[#allocation2 + $0xb8] sm:$0xff] }
 0x798   : > { %v1766_v44 = vsel %vm927_vm2, %v1740_v20, 0 }
 0x799   : > { %2591 = vmatmul.mubr.msk.bf16.vlgmr.msra.gmra.mrb[24].mxu0 %vm513_vm0, %v3359_v29  ;;  %v1739_v39 = vld [vmem:[#allocation2 + $0xb0] sm:$0xff] }
 0x79a   : > { %2610 = vmatprep.mubr.msk.bf16.mxu0 %vm2919_vm1, %v2918_v9  ;;  %v1763_v53 = vsel %vm927_vm2, %v1739_v39, 0 }
 0x79f   : > { %2595 = vmatpush3.bf16.xpose.msra.mxu0 %v1745_v30 }
 0x7a0   : > { %2596 = vmatprep.subr.bf16.mxu0 %v2918_v9 }
 0x7a7   : > { %2597 = vmatpush3.bf16.xpose.msra.mxu0 %v1748_v49 }
 0x7a8   : > { %2598 = vmatprep.subr.bf16.mxu0 %v2918_v9 }
 0x7af   : > { %2599 = vmatpush3.bf16.xpose.msra.mxu0 %v1751_v34 }
 0x7b0   : > { %2600 = vmatprep.subr.bf16.mxu0 %v2918_v9 }
 0x7b7   : > { %2601 = vmatpush3.bf16.xpose.msra.mxu0 %v1754_v43 }
 0x7b8   : > { %2602 = vmatprep.subr.bf16.mxu0 %v2918_v9 }
 0x7bf   : > { %2603 = vmatpush3.bf16.xpose.msra.mxu0 %v1757_v37 }
 0x7c0   : > { %2604 = vmatprep.subr.bf16.mxu0 %v2918_v9 }
 0x7c7   : > { %2605 = vmatpush3.bf16.xpose.msra.mxu0 %v1760_v38 }
 0x7c8   : > { %2606 = vmatprep.subr.bf16.mxu0 %v2918_v9 }
 0x7cf   : > { %2607 = vmatpush3.bf16.xpose.msra.mxu0 %v1763_v53 }
 0x7d0   : > { %2608 = vmatprep.subr.bf16.mxu0 %v2918_v9 }
 0x7d7   : > { %2609 = vmatpush3.bf16.xpose.msra.mxu0 %v1766_v44 }
 0x7d8   : > { %2662 = vmatprep.subr.bf16.mxu0 %v2918_v9 }
 0x864   : > { %v3596_v45 = vpop.f32.mrb[20].mxu0 }
 0x865   : > { %v2584_v25 = vpop.f32.mrb[21].mxu0 }
 0x866   : > { %v3598_v59 = vpop.f32.mrb[22].mxu0 }
 0x867   : > { %v1658_v46 = vpack.c.bf16 %v3598_v59, %v3596_v45  ;;  %v2585_v47 = vpop.f32.mrb[23].mxu0 }
 0x86c   : > { %v1724_v50 = vpop.f32.mrb[24].mxu0 }
 0x86d   : > { %v2592_v51 = vpop.f32.mrb[25].mxu0  ;;  %v1725_v24 = vadd.f32 %v2345_v63, %v1724_v50 }
 0x86e   : > { %v1727_v3 = vpop.f32.mrb[26].mxu0  ;;  %v2766_v51 = vld [vmem:[%s3824_s6 + $0x30] sm:$0xff]  }
 0x86f   : > { %v1728_v55 = vadd.f32 %v2345_v63, %v1727_v3  ;;  %v2593_v4 = vpop.f32.mrb[27].mxu0 }
 0x870   : > { %v2767_v4 = vld [vmem:[%s3824_s6 + $0x38] sm:$0xff]  }
 0x871   : > { %v1731_v56 = vpack.c.bf16 %v1728_v55, %v1725_v24 }
 0x873   : > { %2611 = vmatmul.mubr.msk.bf16.vlgmr.msra.gmra.mrb[28].mxu0 %vm927_vm2, %v1731_v56 }
 0x874   : > { %2678 = vmatprep.mubr.msk.bf16.mxu0 %vm2919_vm1, %v2918_v9 }
 0x946   : > { %v1802_v57 = vpop.f32.mrb[28].mxu0 }
 0x947   : > { %v2612_v61 = vpop.f32.mrb[29].mxu0  ;;  %v1809_v62 = vsel %vm1225_vm3, -1e+30, %v1802_v57 }
 0x948   : > { %1811 = vmax.xlane.f32.xlu0 %v1809_v62  ;;  %v1805_v0 = vpop.f32.mrb[30].mxu0 }
 0x949   : > { %v2613_v40 = vpop.f32.mrb[31].mxu0  ;;  %v1810_v1 = vsel %vm1225_vm3, -1e+30, %v1805_v0 }
 0x94a   : > { %1813 = vmax.xlane.f32.xlu1 %v1810_v1 }
 0x95b   : > { %1077 = vrot.lane.b32.xlu1 %v3368_v28, %s2924_s14 }
 0x95e   : > { %1075 = vrot.lane.b32.xlu0 %v3370_v5, %s2924_s14 }
 0x95f   : > { %1083 = vrot.lane.b32.xlu1 %v3388_v26, %s2924_s14 }
 0x962   : > { %1079 = vrot.lane.b32.xlu0 %v3378_v8, %s2924_s14 }
 0x963   : > { %1085 = vrot.lane.b32.xlu1 %v3386_v22, %s2924_s14 }
 0x966   : > { %1081 = vrot.lane.b32.xlu0 %v3376_v7, %s2924_s14 }
 0x9d5   : > { %v1812_v2 = vpop.xlane.xlu0 %1811 }
 0x9d6   : > { %v1815_v6 = vsub.f32 %v1809_v62, %v1812_v2 }
 0x9d7   : > { %v1814_v32 = vpop.xlane.xlu1 %1813 }
 0x9d8   : > { %v1817_v15 = vmul.f32 1.442695, %v1815_v6  ;;  %v1816_v33 = vsub.f32 %v1810_v1, %v1814_v32 }
 0x9d9   : > { %v1076_v48 = vpop.permute.xlu0 %1075 }
 0x9da   : > { %2822 = vpow2.f32 %v1817_v15  ;;  %v1819_v10 = vmul.f32 1.442695, %v1816_v33  ;;  %1100 = vst.msk [vmem:[#allocation3 + $0x80] sm:$0xff] %vm927_vm2, %v1076_v48 }
 0x9db   : > { %v1078_v11 = vpop.permute.xlu1 %1077 }
 0x9dc   : > { %2824 = vpow2.f32 %v1819_v10  ;;  %1101 = vst.msk [vmem:[#allocation3 + $0x88] sm:$0xff] %vm927_vm2, %v1078_v11 }
 0x9dd   : > { %v1080_v41 = vpop.permute.xlu0 %1079 }
 0x9de   : > { %1102 = vst.msk [vmem:[#allocation3 + $0x90] sm:$0xff] %vm927_vm2, %v1080_v41 }
 0x9df   : > { %v1084_v13 = vpop.permute.xlu1 %1083 }
 0x9e0   : > { %1104 = vst.msk [vmem:[#allocation3 + $0xa0] sm:$0xff] %vm927_vm2, %v1084_v13 }
 0x9e1   : > { %v1082_v14 = vpop.permute.xlu0 %1081  ;;  %v1831_v12 = vld [vmem:[#allocation3 + $0x80] sm:$0xff] }
 0x9e2   : > { %1103 = vst.msk [vmem:[#allocation3 + $0x98] sm:$0xff] %vm927_vm2, %v1082_v14  ;;  %2615 = vmatpush3.bf16.msra.mxu1 %v1831_v12 }
 0x9e3   : > { %v1086_v18 = vpop.permute.xlu1 %1085  ;;  %2616 = vmatprep.subr.bf16.mxu1 %v2918_v9  ;;  %v1832_v31 = vld [vmem:[#allocation3 + $0x88] sm:$0xff] }
 0x9e4   : > { %v2823_v19 = vpop.eup %2822  ;;  %1105 = vst.msk [vmem:[#allocation3 + $0xa8] sm:$0xff] %vm927_vm2, %v1086_v18 }
 0x9e5   : > { %1821 = vadd.xlane.f32.xlu1 %v2823_v19  ;;  %v1833_v27 = vld [vmem:[#allocation3 + $0x90] sm:$0xff] }
 0x9e6   : > { %v2825_v23 = vpop.eup %2824  ;;  %2617 = vmatpush3.bf16.msra.mxu1 %v1832_v31 }
 0x9e7   : > { %1823 = vadd.xlane.f32.xlu0 %v2825_v23  ;;  %2618 = vmatprep.subr.bf16.mxu1 %v2918_v9  ;;  %v1835_v17 = vld [vmem:[#allocation3 + $0xa0] sm:$0xff] }
 0x9e9   : > { %v1834_v30 = vld [vmem:[#allocation3 + $0x98] sm:$0xff] }
 0x9ea   : > { %2619 = vmatpush3.bf16.msra.mxu1 %v1833_v27 }
 0x9eb   : > { %2620 = vmatprep.subr.bf16.mxu1 %v2918_v9  ;;  %v1836_v49 = vld [vmem:[#allocation3 + $0xa8] sm:$0xff] }
 0x9ee   : > { %2621 = vmatpush3.bf16.msra.mxu1 %v1834_v30 }
 0x9ef   : > { %2622 = vmatprep.subr.bf16.mxu1 %v2918_v9 }
 0x9f2   : > { %2623 = vmatpush3.bf16.msra.mxu1 %v1835_v17 }
 0x9f3   : > { %2624 = vmatprep.subr.bf16.mxu1 %v2918_v9 }
 0x9f6   : > { %1089 = vrot.lane.b32.xlu1 %v3399_v21, %s2924_s14  ;;  %2625 = vmatpush3.bf16.msra.mxu1 %v1836_v49 }
 0x9f7   : > { %2626 = vmatprep.subr.bf16.mxu1 %v2918_v9 }
 0x9fa   : > { %1110 = vrot.lane.b32.xlu1 %v3368_v28, %s2925_s15 }
 0x9fd   : > { %1087 = vrot.lane.b32.xlu0 %v3401_v42, %s2924_s14 }
 0x9fe   : > { %1114 = vrot.lane.b32.xlu1 %v3376_v7, %s2925_s15 }
 0xa01   : > { %1108 = vrot.lane.b32.xlu0 %v3370_v5, %s2925_s15 }
 0xa02   : > { %1118 = vrot.lane.b32.xlu1 %v3386_v22, %s2925_s15 }
 0xa05   : > { %1112 = vrot.lane.b32.xlu0 %v3378_v8, %s2925_s15 }
 0xa06   : > { %1122 = vrot.lane.b32.xlu1 %v3399_v21, %s2925_s15 }
 0xa09   : > { %1116 = vrot.lane.b32.xlu0 %v3388_v26, %s2925_s15 }
 0xa0d   : > { %1120 = vrot.lane.b32.xlu0 %v3401_v42, %s2925_s15  ;;  %s2926_s15 = smov 72  }
 0xa72   : > { %v1822_v16 = vpop.xlane.xlu1 %1821 }
 0xa74   : > { %v1824_v34 = vpop.xlane.xlu0 %1823 }
 0xa75   : > { %2826 = vrcp.f32 %v1824_v34 }
 0xa76   : > { %v1090_v35 = vpop.permute.xlu1 %1089  ;;  %2828 = vrcp.f32 %v1822_v16 }
 0xa77   : > { %1107 = vst.msk [vmem:[#allocation3 + $0xb8] sm:$0xff] %vm927_vm2, %v1090_v35 }
 0xa78   : > { %v1088_v43 = vpop.permute.xlu0 %1087 }
 0xa79   : > { %1106 = vst.msk [vmem:[#allocation3 + $0xb0] sm:$0xff] %vm927_vm2, %v1088_v43 }
 0xa7a   : > { %v1111_v36 = vpop.permute.xlu1 %1110 }
 0xa7b   : > { %1134 = vst.msk [vmem:[#allocation2 + $0xc8] sm:$0xff] %vm927_vm2, %v1111_v36 }
 0xa7c   : > { %v1109_v37 = vpop.permute.xlu0 %1108 }
 0xa7d   : > { %1133 = vst.msk [vmem:[#allocation2 + $0xc0] sm:$0xff] %vm927_vm2, %v1109_v37 }
 0xa7e   : > { %v1115_v58 = vpop.permute.xlu1 %1114  ;;  %v1838_v63 = vld [vmem:[#allocation3 + $0xb8] sm:$0xff] }
 0xa7f   : > { %v2827_v38 = vpop.eup %2826  ;;  %1136 = vst.msk [vmem:[#allocation2 + $0xd8] sm:$0xff] %vm927_vm2, %v1115_v58 }
 0xa80   : > { %v1113_v39 = vpop.permute.xlu0 %1112  ;;  %v1837_v53 = vld [vmem:[#allocation3 + $0xb0] sm:$0xff]  ;;  %v2829_v20 = vpop.eup %2828  ;;  %v1828_v25 = vmul.f32 %v2827_v38, %v2825_v23 }
 0xa81   : > { %1135 = vst.msk [vmem:[#allocation2 + $0xd0] sm:$0xff] %vm927_vm2, %v1113_v39  ;;  %2627 = vmatpush3.bf16.msra.mxu1 %v1837_v53  ;;  %v1827_v50 = vmul.f32 %v2829_v20, %v2823_v19  ;;  %v2355_v19 = vld [vmem:[%s3825_s7 + $0x3] ss:$0 sm:$0xff] }
 0xa82   : > { %v1119_v44 = vpop.permute.xlu1 %1118  ;;  %2628 = vmatprep.subr.bf16.mxu1 %v2918_v9  ;;  %v1956_v61 = vld [vmem:[#allocation2 + $0xc8] sm:$0xff] }
 0xa83   : > { %1138 = vst.msk [vmem:[#allocation2 + $0xe8] sm:$0xff] %vm927_vm2, %v1119_v44  ;;  %v1829_v24 = vpack.c.bf16 %v1828_v25, %v1827_v50  ;;  %v1970_v62 = vsel %vm927_vm2, %v1956_v61, 0 }
 0xa84   : > { %v1117_v47 = vpop.permute.xlu0 %1116  ;;  %v1955_v56 = vld [vmem:[#allocation2 + $0xc0] sm:$0xff] }
 0xa85   : > { %1137 = vst.msk [vmem:[#allocation2 + $0xe0] sm:$0xff] %vm927_vm2, %v1117_v47  ;;  %2629 = vmatpush3.bf16.msra.mxu1 %v1838_v63  ;;  %v1967_v57 = vsel %vm927_vm2, %v1955_v56, 0 }
 0xa86   : > { %v1123_v3 = vpop.permute.xlu1 %1122  ;;  %2634 = vmatprep.subr.bf16.mxu1 %v2918_v9 }
 0xa87   : > { %1140 = vst.msk [vmem:[#allocation2 + $0xf8] sm:$0xff] %vm927_vm2, %v1123_v3 }
 0xa88   : > { %v1121_v55 = vpop.permute.xlu0 %1120  ;;  %2631 = vmatmul.mubr.bf16.vlgmr.msra.gmra.mrb[16].mxu1 %v1829_v24  ;;  %v1957_v0 = vld [vmem:[#allocation2 + $0xd0] sm:$0xff] }
 0xa89   : > { %1139 = vst.msk [vmem:[#allocation2 + $0xf0] sm:$0xff] %vm927_vm2, %v1121_v55  ;;  %2635 = vmatpush3.bf16.msra.mxu1 %v2766_v51  ;;  %2638 = vmatprep.mubr.msk.bf16.mxu1 %vm2919_vm1, %v2918_v9  ;;  %v1973_v40 = vsel %vm927_vm2, %v1957_v0, 0 }
 0xa8a   : > { %2636 = vmatprep.subr.bf16.mxu1 %v2918_v9  ;;  %v1960_v32 = vld [vmem:[#allocation2 + $0xe8] sm:$0xff] }
 0xa8b   : > { %v1982_v15 = vsel %vm927_vm2, %v1960_v32, 0 }
 0xa8c   : > { %v1959_v2 = vld [vmem:[#allocation2 + $0xe0] sm:$0xff] }
 0xa8d   : > { %2637 = vmatpush3.bf16.msra.mxu1 %v2767_v4  ;;  %v1979_v6 = vsel %vm927_vm2, %v1959_v2, 0  ;;  %v2769_v2 = vld [vmem:[%s3828_s10 + $0x8] sm:$0xff]  }
 0xa8e   : > { %2642 = vmatprep.subr.bf16.mxu1 %v2918_v9  ;;  %v1962_v10 = vld [vmem:[#allocation2 + $0xf8] sm:$0xff] }
 0xa8f   : > { %v1988_v11 = vsel %vm927_vm2, %v1962_v10, 0 }
 0xa90   : > { %2639 = vmatmul.mubr.msk.bf16.vlgmr.msra.gmra.mrb[20].mxu1 %vm513_vm0, %v3359_v29  ;;  %v1958_v29 = vld [vmem:[#allocation2 + $0xd8] sm:$0xff]  ;;  %v1961_v33 = vld [vmem:[#allocation2 + $0xf0] sm:$0xff] }
 0xa91   : > { %2658 = vmatprep.mubr.msk.bf16.mxu1 %vm2919_vm1, %v2918_v9  ;;  %v1976_v1 = vsel %vm927_vm2, %v1958_v29, 0  ;;  %v1985_v48 = vsel %vm927_vm2, %v1961_v33, 0 }
 0xa96   : > { %2643 = vmatpush3.bf16.xpose.msra.mxu1 %v1967_v57 }
 0xa97   : > { %2644 = vmatprep.subr.bf16.mxu1 %v2918_v9 }
 0xa9e   : > { %2645 = vmatpush3.bf16.xpose.msra.mxu1 %v1970_v62 }
 0xa9f   : > { %2646 = vmatprep.subr.bf16.mxu1 %v2918_v9 }
 0xaa6   : > { %2647 = vmatpush3.bf16.xpose.msra.mxu1 %v1973_v40 }
 0xaa7   : > { %2648 = vmatprep.subr.bf16.mxu1 %v2918_v9 }
 0xaae   : > { %2649 = vmatpush3.bf16.xpose.msra.mxu1 %v1976_v1  ;;  %v2768_v1 = vld [vmem:[%s3828_s10] sm:$0xff]  }
 0xaaf   : > { %2650 = vmatprep.subr.bf16.mxu1 %v2918_v9 }
 0xab6   : > { %2651 = vmatpush3.bf16.xpose.msra.mxu1 %v1979_v6 }
 0xab7   : > { %2652 = vmatprep.subr.bf16.mxu1 %v2918_v9 }
 0xabe   : > { %2653 = vmatpush3.bf16.xpose.msra.mxu1 %v1982_v15 }
 0xabf   : > { %2654 = vmatprep.subr.bf16.mxu1 %v2918_v9 }
 0xac6   : > { %2655 = vmatpush3.bf16.xpose.msra.mxu1 %v1985_v48 }
 0xac7   : > { %2656 = vmatprep.subr.bf16.mxu1 %v2918_v9 }
 0xace   : > { %2657 = vmatpush3.bf16.xpose.msra.mxu1 %v1988_v11 }
 0xb5b   : > { %v3689_v41 = vpop.f32.mrb[16].mxu1 }
 0xb5c   : > { %v2632_v13 = vpop.f32.mrb[17].mxu1 }
 0xb5d   : > { %v3691_v14 = vpop.f32.mrb[18].mxu1  ;;  %v2364_v13 = vld [vmem:[%s3830_s12] ss:$0 sm:$0xff] }
 0xb5e   : > { %v1880_v12 = vpack.c.bf16 %v3691_v14, %v3689_v41  ;;  %v2633_v18 = vpop.f32.mrb[19].mxu1 }
 0xb63   : > { %v1946_v31 = vpop.f32.mrb[20].mxu1 }
 0xb64   : > { %v2640_v23 = vpop.f32.mrb[21].mxu1  ;;  %v1947_v30 = vadd.f32 %v2355_v19, %v1946_v31 }
 0xb65   : > { %v1949_v27 = vpop.f32.mrb[22].mxu1 }
 0xb66   : > { %v1950_v17 = vadd.f32 %v2355_v19, %v1949_v27  ;;  %v2641_v49 = vpop.f32.mrb[23].mxu1 }
 0xb68   : > { %v1953_v16 = vpack.c.bf16 %v1950_v17, %v1947_v30 }
 0xb6a   : > { %2659 = vmatmul.mubr.msk.bf16.vlgmr.msra.gmra.mrb[24].mxu1 %vm927_vm2, %v1953_v16 }
 0xc3d   : > { %v2024_v34 = vpop.f32.mrb[24].mxu1 }
 0xc3e   : > { %v2660_v35 = vpop.f32.mrb[25].mxu1  ;;  %v2031_v43 = vsel %vm1225_vm3, -1e+30, %v2024_v34 }
 0xc3f   : > { %2033 = vmax.xlane.f32.xlu0 %v2031_v43  ;;  %v2027_v36 = vpop.f32.mrb[26].mxu1 }
 0xc40   : > { %v2032_v37 = vsel %vm1225_vm3, -1e+30, %v2027_v36  ;;  %v2661_v58 = vpop.f32.mrb[27].mxu1 }
 0xc41   : > { %2035 = vmax.xlane.f32.xlu1 %v2032_v37 }
 0xc52   : > { %1143 = vrot.lane.b32.xlu1 %v3368_v28, %s2926_s15 }
 0xc55   : > { %1141 = vrot.lane.b32.xlu0 %v3370_v5, %s2926_s15 }
 0xc56   : > { %1149 = vrot.lane.b32.xlu1 %v3388_v26, %s2926_s15 }
 0xc59   : > { %1145 = vrot.lane.b32.xlu0 %v3378_v8, %s2926_s15 }
 0xc5a   : > { %1151 = vrot.lane.b32.xlu1 %v3386_v22, %s2926_s15 }
 0xc5d   : > { %1147 = vrot.lane.b32.xlu0 %v3376_v7, %s2926_s15 }
 0xccc   : > { %v2034_v60 = vpop.xlane.xlu0 %2033 }
 0xccd   : > { %v2037_v38 = vsub.f32 %v2031_v43, %v2034_v60 }
 0xcce   : > { %v2036_v39 = vpop.xlane.xlu1 %2035 }
 0xccf   : > { %v2039_v53 = vmul.f32 1.442695, %v2037_v38  ;;  %v2038_v28 = vsub.f32 %v2032_v37, %v2036_v39 }
 0xcd0   : > { %v1142_v20 = vpop.permute.xlu0 %1141 }
 0xcd1   : > { %2830 = vpow2.f32 %v2039_v53  ;;  %v2041_v5 = vmul.f32 1.442695, %v2038_v28  ;;  %1166 = vst.msk [vmem:[#allocation3 + $0xc0] sm:$0xff] %vm927_vm2, %v1142_v20 }
 0xcd2   : > { %v1144_v26 = vpop.permute.xlu1 %1143 }
 0xcd3   : > { %2832 = vpow2.f32 %v2041_v5  ;;  %1167 = vst.msk [vmem:[#allocation3 + $0xc8] sm:$0xff] %vm927_vm2, %v1144_v26 }
 0xcd4   : > { %v1146_v8 = vpop.permute.xlu0 %1145 }
 0xcd5   : > { %1168 = vst.msk [vmem:[#allocation3 + $0xd0] sm:$0xff] %vm927_vm2, %v1146_v8 }
 0xcd6   : > { %v1150_v22 = vpop.permute.xlu1 %1149 }
 0xcd7   : > { %1170 = vst.msk [vmem:[#allocation3 + $0xe0] sm:$0xff] %vm927_vm2, %v1150_v22 }
 0xcd8   : > { %v1148_v7 = vpop.permute.xlu0 %1147  ;;  %v2053_v44 = vld [vmem:[#allocation3 + $0xc0] sm:$0xff] }
 0xcd9   : > { %1169 = vst.msk [vmem:[#allocation3 + $0xd8] sm:$0xff] %vm927_vm2, %v1148_v7  ;;  %2663 = vmatpush3.bf16.msra.mxu0 %v2053_v44 }
 0xcda   : > { %v1152_v25 = vpop.permute.xlu1 %1151  ;;  %2664 = vmatprep.subr.bf16.mxu0 %v2918_v9  ;;  %v2054_v63 = vld [vmem:[#allocation3 + $0xc8] sm:$0xff] }
 0xcdb   : > { %v2831_v47 = vpop.eup %2830  ;;  %1171 = vst.msk [vmem:[#allocation3 + $0xe8] sm:$0xff] %vm927_vm2, %v1152_v25 }
 0xcdc   : > { %2043 = vadd.xlane.f32.xlu1 %v2831_v47  ;;  %v2055_v51 = vld [vmem:[#allocation3 + $0xd0] sm:$0xff] }
 0xcdd   : > { %v2833_v50 = vpop.eup %2832  ;;  %2665 = vmatpush3.bf16.msra.mxu0 %v2054_v63 }
 0xcde   : > { %2045 = vadd.xlane.f32.xlu0 %v2833_v50  ;;  %2666 = vmatprep.subr.bf16.mxu0 %v2918_v9  ;;  %v2057_v24 = vld [vmem:[#allocation3 + $0xe0] sm:$0xff] }
 0xce0   : > { %v2056_v3 = vld [vmem:[#allocation3 + $0xd8] sm:$0xff] }
 0xce1   : > { %2667 = vmatpush3.bf16.msra.mxu0 %v2055_v51 }
 0xce2   : > { %2668 = vmatprep.subr.bf16.mxu0 %v2918_v9  ;;  %v2058_v55 = vld [vmem:[#allocation3 + $0xe8] sm:$0xff] }
 0xce5   : > { %2669 = vmatpush3.bf16.msra.mxu0 %v2056_v3 }
 0xce6   : > { %2670 = vmatprep.subr.bf16.mxu0 %v2918_v9 }
 0xce9   : > { %2671 = vmatpush3.bf16.msra.mxu0 %v2057_v24 }
 0xcea   : > { %2672 = vmatprep.subr.bf16.mxu0 %v2918_v9 }
 0xced   : > { %1155 = vrot.lane.b32.xlu1 %v3399_v21, %s2926_s15  ;;  %2673 = vmatpush3.bf16.msra.mxu0 %v2058_v55 }
 0xcee   : > { %2674 = vmatprep.subr.bf16.mxu0 %v2918_v9 }
 0xcf1   : > { %1882 = vrot.lane.b32.xlu1 %v1880_v12, %s2927_s17  ;;  %s471_s17 = sand.u32 1, %s2900_s26  }
 0xcf2   : > { %s2305_s23 = sshll.u32 %s471_s17, 4 }
 0xcf3   : > { %s473_s0 = scalar_lea.vmem [#allocation5], %s2305_s23  ;;  %s2930_s23 = smov [#allocation5]  }
 0xcf4   : > { %1153 = vrot.lane.b32.xlu0 %v3401_v42, %s2926_s15  ;;  %s2929_s15 = smov 24   ;;  %s2206_s1 = sshll.u32 %s473_s0, 4  ;;  %s3768_s1 = int_to_ptr.vmem [resolvable:$true] %s2206_s1 }
 0xcf5   : > { %s2842_s14 = sshll.u32 %s2930_s23, 4  ;;  %s2843_s14 = int_to_ptr.vmem [resolvable:$false] %s2842_s14 }
 0xcf6   : > { %p2845_p1 = scmp.lt.s32.totalorder %s3768_s1, %s2843_s14 }
 0xcf8   : > { %1660 = vrot.lane.b32.xlu0 %v1658_v46, %s3832_s19  ;;  %s2838_s19 = scalar_lea.vmem %s3768_s1, 256 }
 0xcf9   : > { %p2839_p12 = scmp.ne.s32.totalorder %s3768_s1, %s2838_s19 }
 0xcfb   : > { %p2840_p13 = pnand %p2839_p12, %p3042_p4 }
 0xcfd   : > { %p2841_p0 = pneg %p2840_p13 }
 0xd69   : > { %v2044_v4 = vpop.xlane.xlu1 %2043 }
 0xd6b   : > { %v2046_v56 = vpop.xlane.xlu0 %2045 }
 0xd6c   : > { %2834 = vrcp.f32 %v2046_v56 }
 0xd6d   : > { %v1156_v21 = vpop.permute.xlu1 %1155  ;;  %2836 = vrcp.f32 %v2044_v4 }
 0xd6e   : > { %1173 = vst.msk [vmem:[#allocation3 + $0xf8] sm:$0xff] %vm927_vm2, %v1156_v21 }
 0xd6f   : > { %v1154_v57 = vpop.permute.xlu0 %1153 }
 0xd70   : > { %1172 = vst.msk [vmem:[#allocation3 + $0xf0] sm:$0xff] %vm927_vm2, %v1154_v57 }
 0xd71   : > { %v1883_v42 = vpop.permute.xlu1 %1882 }
 0xd73   : > { %v1661_v61 = vpop.permute.xlu0 %1660 }
 0xd74   : > { %1664 = vst.msk [vmem:[#allocation4] sm:$0xff] %vm1663_vm4, %v1661_v61 }
 0xd75   : > { %1886 = vst.msk [vmem:[#allocation4] sm:$0xff] %vm1885_vm5, %v1883_v42  ;;  %v2060_v46 = vld [vmem:[#allocation3 + $0xf8] sm:$0xff] }
 0xd76   : > { %v2835_v62 = vpop.eup %2834 }
 0xd77   : > { %v2059_v0 = vld [vmem:[#allocation3 + $0xf0] sm:$0xff]  ;;  %v2837_v45 = vpop.eup %2836  ;;  %v2050_v59 = vmul.f32 %v2835_v62, %v2833_v50 }
 0xd78   : > { %2675 = vmatpush3.bf16.msra.mxu0 %v2059_v0  ;;  %v2049_v40 = vmul.f32 %v2837_v45, %v2831_v47 }
 0xd79   : > { %2676 = vmatprep.subr.bf16.mxu0 %v2918_v9 }
 0xd7a   : > { %v2051_v29 = vpack.c.bf16 %v2050_v59, %v2049_v40 }
 0xd7c   : > { %2677 = vmatpush3.bf16.msra.mxu0 %v2060_v46 }
 0xd7d   : > { %2682 = vmatprep.subr.bf16.mxu0 %v2918_v9 }
 0xd7f   : > { %2679 = vmatmul.mubr.bf16.vlgmr.msra.gmra.mrb[32].mxu0 %v2051_v29 }
 0xd80   : > { %2686 = vmatprep.mubr.msk.bf16.mxu0 %vm2919_vm1, %v2918_v9  ;;  %2683 = vmatpush3.bf16.msra.mxu0 %v2768_v1 }
 0xd81   : > { %2684 = vmatprep.subr.bf16.mxu0 %v2918_v9  ;;  %v2360_v9 = vld [vmem:[%s3829_s11] ss:$0 sm:$0xff] }
 0xd84   : > { %2685 = vmatpush3.bf16.msra.mxu0 %v2769_v2 }
 0xe52   : > { %v2095_v6 = vpop.f32.mrb[32].mxu0 }
 0xe53   : > { %v2680_v32 = vpop.f32.mrb[33].mxu0 }
 0xe54   : > { %v2098_v15 = vpop.f32.mrb[34].mxu0 }
 0xe55   : > { %v2102_v33 = vpack.c.bf16 %v2098_v15, %v2095_v6  ;;  %v2681_v48 = vpop.f32.mrb[35].mxu0 }
 0xe57   : > { %2104 = vrot.lane.b32.xlu0 %v2102_v33, %s2929_s15  ;;  %s2372_s15 = sshll.u32 %s2908_s28, 8  ;;  %s3771_s28 = scalar_lea.sflag [#allocation6], %s471_s17 }
 0xe58   : > { %s3764_s2 = scalar_lea.hbm %s3831_s13, %s2372_s15  ;;  %s2844_s15 = scalar_lea.vmem %s2843_s14, 512 }
 0xe59   : > { %p2846_p2 = scmp.lt.s32.totalorder %s2844_s15, %s2838_s19 }
 0xe5b   : > { %p2847_p3 = por %p2846_p2, %p2845_p1 }
 0xe5d   : > { %p2848_p5 = pnand %p2847_p3, %p2841_p0 }
 0xec9   : > { %v2105_v10 = vpop.permute.xlu0 %2104 }
 0xeca   : > { %2108 = vst.msk [vmem:[#allocation4] sm:$0xff] %vm2107_vm6, %v2105_v10 }
 0xed1   : > { %v2109_v11 = vld [vmem:[#allocation4] sm:$0xff] }
 0xed2   : > { %2687 = vmatmul.mubr.msk.bf16.vlgmr.msra.gmra.mrb[36].mxu0 %vm513_vm0, %v2109_v11 }
 0xfa5   : > { %v2170_v41 = vpop.f32.mrb[36].mxu0 }
 0xfa6   : > { %v2171_v14 = vadd.f32 %v2360_v9, %v2170_v41  ;;  %v2688_v12 = vpop.f32.mrb[37].mxu0 }
 0xfa7   : > { %v2173_v18 = vpop.f32.mrb[38].mxu0 }
 0xfa8   : > { %v2184_v19 = vmul.f32 %v2364_v13, %v2171_v14  ;;  %v2174_v31 = vadd.f32 %v2360_v9, %v2173_v18  ;;  %v2689_v23 = vpop.f32.mrb[39].mxu0 }
 0xfaa   : > { %v2186_v27 = vadd.f32 %v2184_v19, %v3351_v52  ;;  %v2185_v30 = vmul.f32 %v2364_v13, %v2174_v31 }
 0xfac   : > { %2188 = vst.msk [vmem:[%s473_s0] sm:$0xff] %vm513_vm0, %v2186_v27  ;;  %v2187_v17 = vadd.f32 %v2185_v30, %v3353_v54 }
 0xfae   : > { %2189 = vst.msk [vmem:[%s473_s0 + $0x8] sm:$0xff] %vm513_vm0, %v2187_v17 }
 0xfaf   : > { %2851 = shalt.err (!%p2848_p5)
}
 0xfb0   : > { %s2852_s0 = scalar_lea.hbm %s3764_s2, 256  ;;  %s2856_s22 = scalar_lea.hbm %s3831_s13, 512 }
 0xfb1   : > { %p2853_p6 = scmp.ne.s32.totalorder %s3764_s2, %s2852_s0  ;;  %p2857_p10 = scmp.lt.u32.totalorder %s3764_s2, %s3831_s13 }
 0xfb2   : > { %p2858_p11 = scmp.lt.u32.totalorder %s2856_s22, %s2852_s0  ;;  %p2860_p13 = scmp.lt.u32.totalorder %s2852_s0, %s3764_s2 }
 0xfb3   : > { %p2854_p7 = pnand %p2853_p6, %p3042_p4 }
 0xfb4   : > { %p2859_p12 = por %p2858_p11, %p2857_p10 }
 0xfb5   : > { %p2855_p9 = pneg %p2854_p7 }
 0xfb6   : > { %p2861_p0 = por %p2860_p13, %p2859_p12 }
 0xfb8   : > { %p2862_p1 = pnand %p2861_p0, %p2855_p9 }
 0xfba   : > { %2865 = shalt.err (!%p2862_p1)
}
 0xfbb   : > { %s2931_s19 = smov 128   ;;  %s3841_s15 = smov 8  }
 0xfbc   : > { %2690 = dma.vmem_to_hbm [thread:$0]  (%p3042_p4), %s3768_s1, 256, %s3764_s2, %s3771_s28, %s2931_s19, %s2931_s19, %s3841_s15  }
 0xfbd PF: > { %p2696_p2 = scmp.ge.s32.totalorder %s2916_s30, 2  ;;  %s2221_s17 = sand.u32 1, %s2896_s25  }
 0xfbe   : > { %s2222_s0 = scalar_lea.sflag [#allocation6], %s2221_s17 }
 0xfbf   : > { %p2693_p3 = pnand %p2696_p2, %p3049_p8 }
 0xfc1   : > { %2891 = dma.done.wait (!%p2693_p3), %s2222_s0, 256  }
 0xfc2   : > { %2893 = vsyncadd (!%p2693_p3), %s2222_s0, 4294967040  ;;  %s26_s30 = sadd.s32 1, %s2916_s30   ;;  %s3842_s25 = smov %s2900_s26 }
 0xfc3   : > { %p23_p5 = scmp.ge.s32.totalorder %s26_s30, 4   ;;  %s3843_s26 = smov %s2904_s27 }
 0xfc4   : > { %s3844_s27 = smov %s3055_s21  ;;  %s3845_s28 = smov %s2912_s29 }
 0xfc5   : > { %s3846_s29 = smov %s3848_s16  ;;  %25 = sbr.rel (!%p23_p5) target bundleno = 8 (0x8), region = 132 }
 0xfcc   :  { %2227 = vsyncpa [#allocation6], 1 }
 0xfcd   :  { %2229 = vsyncpa [#allocation6 + $0x1], 1 }

// kernel: tpu_custom_call.1
= control target key start
LH: loop header
LB: loop body
LE: loop exit
PB: predicated region body
PF: predicated region fallthrough
CT: control target
= control target key end

     0   :  { %s3815_s0 = inlined_call_operand.vmem [shape: f32[2,16,32], index: 0, kind: input, shape index: {}]   ;;  %s3816_s1 = inlined_call_operand.vmem [shape: f32[2,128,32], index: 1, kind: input, shape index: {}]   ;;  %s3817_s2 = inlined_call_operand.vmem [shape: f32[1,32], index: 2, kind: input, shape index: {}]   ;;  %s3818_s3 = inlined_call_operand.vmem [shape: f32[1,32], index: 3, kind: input, shape index: {}]   ;;  %s3819_s4 = inlined_call_operand.vmem [shape: f32[1,32], index: 4, kind: input, shape index: {}]   ;;  %s3820_s5 = inlined_call_operand.vmem [shape: f32[1,32], index: 5, kind: input, shape index: {}]   ;;  %s3821_s6 = inlined_call_operand.vmem [shape: bf16[4,32,8], index: 6, kind: input, shape index: {}]   ;;  %s3822_s7 = inlined_call_operand.vmem [shape: f32[4,1,8], index: 7, kind: input, shape index: {}]   ;;  %s3823_s8 = inlined_call_operand.vmem [shape: bf16[32,64], index: 8, kind: input, shape index: {}]   ;;  %s3824_s9 = inlined_call_operand.vmem [shape: f32[1,64], index: 9, kind: input, shape index: {}]   ;;  %s3825_s10 = inlined_call_operand.vmem [shape: bf16[32,32], index: 10, kind: input, shape index: {}]   ;;  %s3826_s11 = inlined_call_operand.vmem [shape: f32[1,32], index: 11, kind: input, shape index: {}]   ;;  %s3827_s12 = inlined_call_operand.vmem [shape: f32[1,32], index: 12, kind: input, shape index: {}]   ;;  %s3828_s13 = inlined_call_operand.hbm [shape: f32[2,16,32], index: 13, kind: output, shape index: {}]  }
   0x1   :  { %3830 = sst [smem:[#allocation8_spill]] %s3815_s0 }
   0x2   :  { %3831 = sst [smem:[#allocation9_spill]] %s3816_s1 }
   0x3   :  { %3832 = sst [smem:[#allocation10_spill]] %s3817_s2 }
   0x4   :  { %18 = vsyncpa [#allocation6], 0 }
   0x5   :  { %20 = vsyncpa [#allocation6 + $0x1], 0  ;;  %s2999_s25 = smov 0   ;;  %s3001_s26 = smov 0  }
   0x6   :  { %s3003_s27 = smov 0   ;;  %s3005_s28 = smov 0  }
   0x7   :  { %s3007_s29 = smov 0   ;;  %s3009_s30 = smov 0  }
   0x8 LB: > { %s2297_s14 = sadd.s32 4294967295, %s2913_s30   ;;  %s2298_s15 = sadd.s32 4294967294, %s2913_s30   ;;  %s2913_s30 = sphi %s3009_s30, %s26_s30   ;;  %s2909_s29 = sphi %s3007_s29, %s3843_s29   ;;  %s2905_s28 = sphi %s3005_s28, %s3842_s28   ;;  %s2901_s27 = sphi %s3003_s27, %s3841_s27   ;;  %s2897_s26 = sphi %s3001_s26, %s3840_s26   ;;  %s2893_s25 = sphi %s2999_s25, %s3839_s25  }
   0x9   : > { %s38_s16 = sadd.s32 1, %s2909_s29  ;;  %s332_s17 = sadd.s32 1, %s2901_s27 }
   0xa   : > { %p40_p0 = scmp.ge.s32.totalorder %s38_s16, 2  ;;  %p342_p1 = scmp.ne.s32.totalorder %s2901_s27, %s2897_s26 }
   0xb   : > { %p343_p2 = scmp.eq.s32.totalorder %s2297_s14, 1  ;;  %p348_p3 = scmp.ne.s32.totalorder %s2897_s26, %s2893_s25 }
   0xc   : > { %s3845_s16 = smov (%p40_p0, %s38_s16), 0  ;;  %p349_p5 = scmp.eq.s32.totalorder %s2298_s15, 1 }
   0xd   : > { %p3039_p4 = por %p343_p2, %p342_p1  ;;  %s327_s19 = ssub.s32 %s2909_s29, %s3845_s16 }
   0xe   : > { %p2301_p6 = scmp.ge.s32.totalorder %s2913_s30, 1  ;;  %p330_p7 = scmp.eq.s32.totalorder %s327_s19, 0 }
   0xf   : > { %p3046_p8 = por %p349_p5, %p348_p3  ;;  %p421_p9 = scmp.lt.s32.totalorder %s2913_s30, 3 }
  0x10   : > { %s3052_s21 = scalar_select %p330_p7, %s2901_s27, %s332_s17  }
  0x11   : > { %p422_p10 = pnand %p2301_p6, %p421_p9 }
  0x12   : > { %p475_p11 = scmp.lt.s32.totalorder (!%p422_p10), %s2905_s28, 1  ;;  %vm513_vm0 = vcmask (!%p422_p10), 261120   ;;  %s3835_s1 = sld [smem:[#allocation9_spill]] (!%p422_p10)  ;;  %vm2916_vm1 = vmmov (!%p422_p10), 0   ;;  %vm927_vm2 = vcmask (!%p422_p10), 64512   ;;  %vm1663_vm4 = vcmask (!%p422_p10), 130112  }
  0x13   : > { %425 = sbr.rel (%p422_p10) target bundleno = 4029 (0xfbd), region = 72  ;;  %s3836_s0 = sld [smem:[#allocation8_spill]] (!%p422_p10)  ;;  %vm1885_vm5 = vcmask (!%p422_p10), 195712   ;;  %vm2107_vm6 = vcmask (!%p422_p10), 261312  }
  0x14   : > { %s3837_s2 = sld [smem:[#allocation10_spill]] (!%p422_p10)  ;;  %s2920_s14 = smov (!%p422_p10), 112  }
  0x15   : > { %s3829_s19 = smov (!%p422_p10), 8  }
  0x1a   : > { %s3056_s22 = scalar_select %p475_p11, %s2905_s28, 1 }
  0x1c   : > { %s2368_s23 = sshll.u32 %s3056_s22, 7  ;;  %s2367_s17 = sshll.u32 %s3056_s22, 4 }
  0x1d   : > { %s3062_s15 = scalar_lea.vmem %s3835_s1, %s2368_s23  ;;  %s482_s24 = scalar_lea.vmem %s3836_s0, %s2367_s17 }
  0x1e   : > { %v495_v0 = vld [vmem:[%s3062_s15] sm:$0xff]  ;;  %v497_v1 = vld [vmem:[%s3062_s15 + $0x10] sm:$0xff]  ;;  %v3067_v2 = vld [vmem:[%s3062_s15 + $0x8] sm:$0xff]  ;;  %s2918_s22 = smov 120   ;;  %s2924_s17 = smov 16  }
  0x1f   : > { %v514_v3 = vsel %vm513_vm0, %v495_v0, 0.0  ;;  %v520_v4 = vsel %vm513_vm0, %v497_v1, 0.0  ;;  %v3072_v5 = vld [vmem:[%s3062_s15 + $0x18] sm:$0xff]  ;;  %v517_v6 = vsel %vm513_vm0, %v3067_v2, 0.0  ;;  %v3079_v8 = vld [vmem:[%s3062_s15 + $0x20] sm:$0xff]  ;;  %v3082_v9 = vld [vmem:[%s3062_s15 + $0x28] sm:$0xff] }
  0x20   : > { %515 = vadd.xlane.f32.xlu0 %v514_v3  ;;  %521 = vadd.xlane.f32.xlu1 %v520_v4  ;;  %v523_v7 = vsel %vm513_vm0, %v3072_v5, 0.0  ;;  %v526_v10 = vsel %vm513_vm0, %v3079_v8, 0.0  ;;  %v529_v11 = vsel %vm513_vm0, %v3082_v9, 0.0  ;;  %v3089_v12 = vld [vmem:[%s3062_s15 + $0x30] sm:$0xff]  ;;  %v3092_v13 = vld [vmem:[%s3062_s15 + $0x38] sm:$0xff]  ;;  %v3099_v16 = vld [vmem:[%s3062_s15 + $0x40] sm:$0xff] }
  0x21   : > { %v532_v14 = vsel %vm513_vm0, %v3089_v12, 0.0  ;;  %v535_v15 = vsel %vm513_vm0, %v3092_v13, 0.0  ;;  %v3102_v17 = vld [vmem:[%s3062_s15 + $0x48] sm:$0xff]  ;;  %v538_v18 = vsel %vm513_vm0, %v3099_v16, 0.0  ;;  %v3109_v20 = vld [vmem:[%s3062_s15 + $0x50] sm:$0xff]  ;;  %v3112_v21 = vld [vmem:[%s3062_s15 + $0x58] sm:$0xff] }
  0x22   : > { %v541_v19 = vsel %vm513_vm0, %v3102_v17, 0.0  ;;  %v544_v22 = vsel %vm513_vm0, %v3109_v20, 0.0  ;;  %v547_v23 = vsel %vm513_vm0, %v3112_v21, 0.0  ;;  %v3119_v24 = vld [vmem:[%s3062_s15 + $0x60] sm:$0xff]  ;;  %v3122_v25 = vld [vmem:[%s3062_s15 + $0x68] sm:$0xff]  ;;  %v3130_v28 = vld [vmem:[%s3062_s15 + $0x70] sm:$0xff] }
  0x23   : > { %v550_v26 = vsel %vm513_vm0, %v3119_v24, 0.0  ;;  %v553_v27 = vsel %vm513_vm0, %v3122_v25, 0.0  ;;  %v3133_v29 = vld [vmem:[%s3062_s15 + $0x78] sm:$0xff]  ;;  %v556_v30 = vsel %vm513_vm0, %v3130_v28, 0.0  ;;  %v3142_v32 = vld [vmem:[%s482_s24] sm:$0xff]  ;;  %v3144_v33 = vld [vmem:[%s482_s24 + $0x8] sm:$0xff] }
  0x24   : > { %518 = vadd.xlane.f32.xlu0 %v517_v6  ;;  %524 = vadd.xlane.f32.xlu1 %v523_v7  ;;  %v559_v31 = vsel %vm513_vm0, %v3133_v29, 0.0  ;;  %v1179_v34 = vsel %vm513_vm0, %v3142_v32, 0.0  ;;  %v1182_v35 = vsel %vm513_vm0, %v3144_v33, 0.0  ;;  %s2917_s24 = smov 96   ;;  %s2922_s15 = smov 104  }
  0x28   : > { %527 = vadd.xlane.f32.xlu0 %v526_v10  ;;  %530 = vadd.xlane.f32.xlu1 %v529_v11 }
  0x2c   : > { %533 = vadd.xlane.f32.xlu0 %v532_v14  ;;  %536 = vadd.xlane.f32.xlu1 %v535_v15 }
  0x30   : > { %539 = vadd.xlane.f32.xlu0 %v538_v18  ;;  %542 = vadd.xlane.f32.xlu1 %v541_v19 }
  0x34   : > { %545 = vadd.xlane.f32.xlu0 %v544_v22  ;;  %548 = vadd.xlane.f32.xlu1 %v547_v23 }
  0x38   : > { %551 = vadd.xlane.f32.xlu0 %v550_v26  ;;  %554 = vadd.xlane.f32.xlu1 %v553_v27 }
  0x3c   : > { %557 = vadd.xlane.f32.xlu0 %v556_v30  ;;  %560 = vadd.xlane.f32.xlu1 %v559_v31 }
  0x40   : > { %1180 = vadd.xlane.f32.xlu0 %v1179_v34  ;;  %1183 = vadd.xlane.f32.xlu1 %v1182_v35 }
  0xad   : > { %v516_v36 = vpop.xlane.xlu0 %515  ;;  %v522_v37 = vpop.xlane.xlu1 %521 }
  0xae   : > { %v563_v38 = vmul.f32 0.03125, %v516_v36  ;;  %v565_v39 = vmul.f32 0.03125, %v522_v37 }
  0xb0   : > { %v3150_v40 = vsub.f32 %v495_v0, %v563_v38  ;;  %v3152_v41 = vsub.f32 %v497_v1, %v565_v39 }
  0xb1   : > { %v519_v42 = vpop.xlane.xlu0 %518  ;;  %v525_v43 = vpop.xlane.xlu1 %524 }
  0xb2   : > { %v564_v44 = vmul.f32 0.03125, %v519_v42  ;;  %v566_v45 = vmul.f32 0.03125, %v525_v43  ;;  %v595_v46 = vmul.f32 %v3150_v40, %v3150_v40  ;;  %v597_v47 = vmul.f32 %v3152_v41, %v3152_v41 }
  0xb4   : > { %v3159_v48 = vsub.f32 %v3067_v2, %v564_v44  ;;  %v3162_v49 = vsub.f32 %v3072_v5, %v566_v45  ;;  %v611_v50 = vsel %vm513_vm0, %v595_v46, 0.0  ;;  %v617_v53 = vsel %vm513_vm0, %v597_v47, 0.0 }
  0xb5   : > { %v528_v51 = vpop.xlane.xlu0 %527  ;;  %612 = vadd.xlane.f32.xlu0 %v611_v50  ;;  %v531_v52 = vpop.xlane.xlu1 %530 }
  0xb6   : > { %v567_v54 = vmul.f32 0.03125, %v528_v51  ;;  %v568_v55 = vmul.f32 0.03125, %v531_v52  ;;  %v596_v56 = vmul.f32 %v3159_v48, %v3159_v48  ;;  %v598_v57 = vmul.f32 %v3162_v49, %v3162_v49 }
  0xb8   : > { %v3171_v58 = vsub.f32 %v3079_v8, %v567_v54  ;;  %v3174_v59 = vsub.f32 %v3082_v9, %v568_v55  ;;  %v614_v60 = vsel %vm513_vm0, %v596_v56, 0.0  ;;  %v620_v63 = vsel %vm513_vm0, %v598_v57, 0.0 }
  0xb9   : > { %v534_v61 = vpop.xlane.xlu0 %533  ;;  %615 = vadd.xlane.f32.xlu1 %v614_v60  ;;  %618 = vadd.xlane.f32.xlu0 %v617_v53  ;;  %v537_v62 = vpop.xlane.xlu1 %536 }
  0xba   : > { %v569_v0 = vmul.f32 0.03125, %v534_v61  ;;  %v570_v1 = vmul.f32 0.03125, %v537_v62  ;;  %v599_v2 = vmul.f32 %v3171_v58, %v3171_v58  ;;  %v600_v3 = vmul.f32 %v3174_v59, %v3174_v59 }
  0xbc   : > { %v3183_v4 = vsub.f32 %v3089_v12, %v569_v0  ;;  %v3186_v5 = vsub.f32 %v3092_v13, %v570_v1  ;;  %v623_v6 = vsel %vm513_vm0, %v599_v2, 0.0  ;;  %v626_v9 = vsel %vm513_vm0, %v600_v3, 0.0 }
  0xbd   : > { %v540_v7 = vpop.xlane.xlu0 %539  ;;  %621 = vadd.xlane.f32.xlu1 %v620_v63  ;;  %624 = vadd.xlane.f32.xlu0 %v623_v6  ;;  %v543_v8 = vpop.xlane.xlu1 %542 }
  0xbe   : > { %v571_v10 = vmul.f32 0.03125, %v540_v7  ;;  %v572_v11 = vmul.f32 0.03125, %v543_v8  ;;  %v601_v14 = vmul.f32 %v3183_v4, %v3183_v4  ;;  %v602_v12 = vmul.f32 %v3186_v5, %v3186_v5  ;;  %v2756_v7 = vld [vmem:[%s3823_s8 + $0x8] sm:$0xff]   ;;  %v2757_v8 = vld [vmem:[%s3821_s6] sm:$0xff]  }
  0xc0   : > { %v3195_v15 = vsub.f32 %v3099_v16, %v571_v10  ;;  %v3198_v13 = vsub.f32 %v3102_v17, %v572_v11  ;;  %v629_v18 = vsel %vm513_vm0, %v601_v14, 0.0  ;;  %v632_v23 = vsel %vm513_vm0, %v602_v12, 0.0  ;;  %v2758_v10 = vld [vmem:[%s3821_s6 + $0x8] sm:$0xff]  }
  0xc1   : > { %v546_v19 = vpop.xlane.xlu0 %545  ;;  %627 = vadd.xlane.f32.xlu1 %v626_v9  ;;  %630 = vadd.xlane.f32.xlu0 %v629_v18  ;;  %v549_v22 = vpop.xlane.xlu1 %548  ;;  %v2915_v9 = vmov 0.0  }
  0xc2   : > { %v573_v26 = vmul.f32 0.03125, %v546_v19  ;;  %v574_v27 = vmul.f32 0.03125, %v549_v22  ;;  %v603_v30 = vmul.f32 %v3195_v15, %v3195_v15  ;;  %v604_v16 = vmul.f32 %v3198_v13, %v3198_v13  ;;  %2487 = vmatprep.subr.bf16.mxu1 %v2915_v9  ;;  %2491 = vmatprep.mubr.msk.bf16.mxu1 %vm2916_vm1, %v2915_v9 }
  0xc3   : > { %2488 = vmatpush3.bf16.msra.mxu1 %v2757_v8 }
  0xc4   : > { %v3207_v31 = vsub.f32 %v3109_v20, %v573_v26  ;;  %v3210_v17 = vsub.f32 %v3112_v21, %v574_v27  ;;  %v635_v34 = vsel %vm513_vm0, %v603_v30, 0.0  ;;  %v638_v37 = vsel %vm513_vm0, %v604_v16, 0.0  ;;  %2489 = vmatprep.subr.bf16.mxu1 %v2915_v9 }
  0xc5   : > { %v552_v35 = vpop.xlane.xlu0 %551  ;;  %633 = vadd.xlane.f32.xlu1 %v632_v23  ;;  %636 = vadd.xlane.f32.xlu0 %v635_v34  ;;  %v555_v36 = vpop.xlane.xlu1 %554 }
  0xc6   : > { %v575_v38 = vmul.f32 0.03125, %v552_v35  ;;  %v576_v39 = vmul.f32 0.03125, %v555_v36  ;;  %v605_v42 = vmul.f32 %v3207_v31, %v3207_v31  ;;  %v606_v20 = vmul.f32 %v3210_v17, %v3210_v17 }
  0xc7   : > { %2490 = vmatpush3.bf16.msra.mxu1 %v2758_v10 }
  0xc8   : > { %v3219_v43 = vsub.f32 %v3119_v24, %v575_v38  ;;  %v3222_v21 = vsub.f32 %v3122_v25, %v576_v39  ;;  %v641_v44 = vsel %vm513_vm0, %v605_v42, 0.0  ;;  %v644_v47 = vsel %vm513_vm0, %v606_v20, 0.0  ;;  %2515 = vmatprep.subr.bf16.mxu1 %v2915_v9 }
  0xc9   : > { %v558_v45 = vpop.xlane.xlu0 %557  ;;  %639 = vadd.xlane.f32.xlu1 %v638_v37  ;;  %642 = vadd.xlane.f32.xlu0 %v641_v44  ;;  %v561_v46 = vpop.xlane.xlu1 %560 }
  0xca   : > { %v577_v50 = vmul.f32 0.03125, %v558_v45  ;;  %v578_v51 = vmul.f32 0.03125, %v561_v46  ;;  %v607_v52 = vmul.f32 %v3219_v43, %v3219_v43  ;;  %v608_v24 = vmul.f32 %v3222_v21, %v3222_v21 }
  0xcc   : > { %v3231_v53 = vsub.f32 %v3130_v28, %v577_v50  ;;  %v3234_v25 = vsub.f32 %v3133_v29, %v578_v51  ;;  %v647_v54 = vsel %vm513_vm0, %v607_v52, 0.0  ;;  %v650_v56 = vsel %vm513_vm0, %v608_v24, 0.0 }
  0xcd   : > { %645 = vadd.xlane.f32.xlu1 %v644_v47  ;;  %648 = vadd.xlane.f32.xlu0 %v647_v54  ;;  %v1181_v55 = vpop.xlane.xlu0 %1180  ;;  %v1184_v57 = vpop.xlane.xlu1 %1183  ;;  %v3278_v54 = vld [vmem:[%s3819_s4] ss:$0 sm:$0xff] }
  0xce   : > { %v1186_v60 = vmul.f32 0.03125, %v1181_v55  ;;  %v1187_v61 = vmul.f32 0.03125, %v1184_v57  ;;  %v609_v62 = vmul.f32 %v3231_v53, %v3231_v53  ;;  %v610_v28 = vmul.f32 %v3234_v25, %v3234_v25 }
  0xd0   : > { %v3243_v63 = vsub.f32 %v3142_v32, %v1186_v60  ;;  %v3246_v29 = vsub.f32 %v3144_v33, %v1187_v61  ;;  %v653_v0 = vsel %vm513_vm0, %v609_v62, 0.0  ;;  %v656_v1 = vsel %vm513_vm0, %v610_v28, 0.0  ;;  %v2755_v33 = vld [vmem:[%s3823_s8] sm:$0xff]  }
  0xd1   : > { %651 = vadd.xlane.f32.xlu1 %v650_v56  ;;  %654 = vadd.xlane.f32.xlu0 %v653_v0 }
  0xd2   : > { %v1190_v2 = vmul.f32 %v3243_v63, %v3243_v63  ;;  %v1191_v3 = vmul.f32 %v3246_v29, %v3246_v29  ;;  %2467 = vmatprep.subr.bf16.mxu0 %v2755_v33 }
  0xd3   : > { %2468 = vmatpush3.bf16.msra.mxu0 %v2755_v33 }
  0xd4   : > { %v1192_v6 = vsel %vm513_vm0, %v1190_v2, 0.0  ;;  %v1195_v32 = vsel %vm513_vm0, %v1191_v3, 0.0  ;;  %2469 = vmatprep.subr.bf16.mxu0 %v2756_v7  ;;  %v3286_v3 = vld [vmem:[%s3820_s5] ss:$0 sm:$0xff] }
  0xd5   : > { %657 = vadd.xlane.f32.xlu1 %v656_v1  ;;  %1193 = vadd.xlane.f32.xlu0 %v1192_v6 }
  0xd7   : > { %2470 = vmatpush3.bf16.msra.mxu0 %v2756_v7 }
  0xd8   : > { %2495 = vmatprep.subr.bf16.mxu0 %v2915_v9 }
  0xd9   : > { %1196 = vadd.xlane.f32.xlu1 %v1195_v32 }
 0x142   : > { %v613_v11 = vpop.xlane.xlu0 %612 }
 0x143   : > { %v659_v14 = vmul.f32 0.03125, %v613_v11 }
 0x145   : > { %v675_v12 = vadd.f32 1e-05, %v659_v14 }
 0x146   : > { %v616_v18 = vpop.xlane.xlu1 %615  ;;  %v619_v19 = vpop.xlane.xlu0 %618 }
 0x147   : > { %2767 = vrsqrt.f32 %v675_v12  ;;  %v660_v22 = vmul.f32 0.03125, %v616_v18  ;;  %v661_v23 = vmul.f32 0.03125, %v619_v19 }
 0x149   : > { %v676_v26 = vadd.f32 1e-05, %v660_v22  ;;  %v677_v27 = vadd.f32 1e-05, %v661_v23 }
 0x14a   : > { %v622_v30 = vpop.xlane.xlu1 %621  ;;  %v625_v16 = vpop.xlane.xlu0 %624 }
 0x14b   : > { %2769 = vrsqrt.f32 %v676_v26  ;;  %v662_v34 = vmul.f32 0.03125, %v622_v30  ;;  %v663_v35 = vmul.f32 0.03125, %v625_v16 }
 0x14c   : > { %2771 = vrsqrt.f32 %v677_v27 }
 0x14d   : > { %v678_v36 = vadd.f32 1e-05, %v662_v34  ;;  %v679_v37 = vadd.f32 1e-05, %v663_v35 }
 0x14e   : > { %v628_v38 = vpop.xlane.xlu1 %627  ;;  %v631_v39 = vpop.xlane.xlu0 %630 }
 0x14f   : > { %2773 = vrsqrt.f32 %v678_v36  ;;  %v664_v42 = vmul.f32 0.03125, %v628_v38  ;;  %v665_v20 = vmul.f32 0.03125, %v631_v39 }
 0x150   : > { %2775 = vrsqrt.f32 %v679_v37 }
 0x151   : > { %v2768_v44 = vpop.eup %2767  ;;  %v680_v45 = vadd.f32 1e-05, %v664_v42  ;;  %v681_v46 = vadd.f32 1e-05, %v665_v20 }
 0x152   : > { %v634_v47 = vpop.xlane.xlu1 %633  ;;  %v637_v50 = vpop.xlane.xlu0 %636  ;;  %v707_v51 = vmul.f32 %v2768_v44, %v3150_v40 }
 0x153   : > { %2777 = vrsqrt.f32 %v680_v45  ;;  %v666_v52 = vmul.f32 0.03125, %v634_v47  ;;  %v667_v24 = vmul.f32 0.03125, %v637_v50 }
 0x154   : > { %2779 = vrsqrt.f32 %v681_v46  ;;  %v729_v0 = vmul.f32 %v3278_v54, %v707_v51 }
 0x155   : > { %v2770_v55 = vpop.eup %2769  ;;  %v682_v56 = vadd.f32 1e-05, %v666_v52  ;;  %v683_v57 = vadd.f32 1e-05, %v667_v24 }
 0x156   : > { %v2772_v60 = vpop.eup %2771  ;;  %v640_v61 = vpop.xlane.xlu1 %639  ;;  %v708_v28 = vmul.f32 %v2770_v55, %v3159_v48 }
 0x157   : > { %v643_v62 = vpop.xlane.xlu0 %642  ;;  %v709_v40 = vmul.f32 %v2772_v60, %v3152_v41  ;;  %2781 = vrsqrt.f32 %v682_v56  ;;  %v668_v1 = vmul.f32 0.03125, %v640_v61  ;;  %v751_v41 = vadd.f32 %v3286_v3, %v729_v0 }
 0x158   : > { %v669_v2 = vmul.f32 0.03125, %v643_v62  ;;  %2783 = vrsqrt.f32 %v683_v57  ;;  %v730_v6 = vmul.f32 %v3278_v54, %v708_v28 }
 0x159   : > { %v2774_v32 = vpop.eup %2773  ;;  %v684_v33 = vadd.f32 1e-05, %v668_v1  ;;  %v731_v12 = vmul.f32 %v3278_v54, %v709_v40 }
 0x15a   : > { %v685_v7 = vadd.f32 1e-05, %v669_v2  ;;  %v2776_v8 = vpop.eup %2775  ;;  %v710_v48 = vmul.f32 %v2774_v32, %v3162_v49  ;;  %v646_v10 = vpop.xlane.xlu1 %645  ;;  %v752_v14 = vadd.f32 %v3286_v3, %v730_v6 }
 0x15b   : > { %v649_v11 = vpop.xlane.xlu0 %648  ;;  %v711_v18 = vmul.f32 %v2776_v8, %v3171_v58  ;;  %2785 = vrsqrt.f32 %v684_v33  ;;  %v670_v19 = vmul.f32 0.03125, %v646_v10  ;;  %v753_v37 = vadd.f32 %v3286_v3, %v731_v12 }
 0x15c   : > { %v671_v22 = vmul.f32 0.03125, %v649_v11  ;;  %2787 = vrsqrt.f32 %v685_v7  ;;  %v767_v23 = vpack.c.bf16 %v752_v14, %v751_v41  ;;  %v732_v26 = vmul.f32 %v3278_v54, %v710_v48 }
 0x15d   : > { %v2778_v27 = vpop.eup %2777  ;;  %v686_v30 = vadd.f32 1e-05, %v670_v19  ;;  %v733_v38 = vmul.f32 %v3278_v54, %v711_v18 }
 0x15e   : > { %v687_v49 = vadd.f32 1e-05, %v671_v22  ;;  %v2780_v16 = vpop.eup %2779  ;;  %v712_v34 = vmul.f32 %v2778_v27, %v3174_v59  ;;  %v652_v35 = vpop.xlane.xlu1 %651  ;;  %2471 = vmatprep.mubr.msk.bf16.mxu0 %vm513_vm0, %v767_v23  ;;  %v754_v58 = vadd.f32 %v3286_v3, %v732_v26 }
 0x15f   : > { %v655_v36 = vpop.xlane.xlu0 %654  ;;  %v713_v39 = vmul.f32 %v2780_v16, %v3183_v4  ;;  %2789 = vrsqrt.f32 %v686_v30  ;;  %v672_v42 = vmul.f32 0.03125, %v652_v35  ;;  %v755_v55 = vadd.f32 %v3286_v3, %v733_v38 }
 0x160   : > { %v673_v20 = vmul.f32 0.03125, %v655_v36  ;;  %2791 = vrsqrt.f32 %v687_v49  ;;  %v768_v44 = vpack.c.bf16 %v754_v58, %v753_v37  ;;  %v734_v45 = vmul.f32 %v3278_v54, %v712_v34 }
 0x161   : > { %v2782_v59 = vpop.eup %2781  ;;  %v688_v46 = vadd.f32 1e-05, %v672_v42  ;;  %v735_v56 = vmul.f32 %v3278_v54, %v713_v39 }
 0x162   : > { %v689_v47 = vadd.f32 1e-05, %v673_v20  ;;  %v2784_v50 = vpop.eup %2783  ;;  %v714_v51 = vmul.f32 %v2782_v59, %v3186_v5  ;;  %v658_v52 = vpop.xlane.xlu1 %657  ;;  %2472 = vmatmul.mubr.msk.bf16.vlgmr.msra.gmra.mrb[0].mxu0 %vm513_vm0, %v768_v44  ;;  %v756_v4 = vadd.f32 %v3286_v3, %v734_v45 }
 0x163   : > { %v1194_v24 = vpop.xlane.xlu0 %1193  ;;  %v715_v57 = vmul.f32 %v2784_v50, %v3195_v15  ;;  %2793 = vrsqrt.f32 %v688_v46  ;;  %v674_v60 = vmul.f32 0.03125, %v658_v52  ;;  %v757_v32 = vadd.f32 %v3286_v3, %v735_v56 }
 0x164   : > { %v1198_v61 = vmul.f32 0.03125, %v1194_v24  ;;  %2795 = vrsqrt.f32 %v689_v47  ;;  %v769_v62 = vpack.c.bf16 %v756_v4, %v755_v55  ;;  %v736_v28 = vmul.f32 %v3278_v54, %v714_v51  ;;  %v2309_v24 = vld [vmem:[%s3824_s9] ss:$0 sm:$0xff] }
 0x165   : > { %v2786_v5 = vpop.eup %2785  ;;  %v690_v0 = vadd.f32 1e-05, %v674_v60  ;;  %v737_v33 = vmul.f32 %v3278_v54, %v715_v57 }
 0x166   : > { %v1200_v40 = vadd.f32 1e-05, %v1198_v61  ;;  %v2788_v1 = vpop.eup %2787  ;;  %v716_v2 = vmul.f32 %v2786_v5, %v3198_v13  ;;  %v1197_v6 = vpop.xlane.xlu1 %1196  ;;  %2475 = vmatprep.mubr.msk.bf16.mxu0 %vm513_vm0, %v769_v62  ;;  %v758_v15 = vadd.f32 %v3286_v3, %v736_v28 }
 0x167   : > { %v717_v7 = vmul.f32 %v2788_v1, %v3207_v31  ;;  %2797 = vrsqrt.f32 %v690_v0  ;;  %v1199_v8 = vmul.f32 0.03125, %v1197_v6  ;;  %v759_v12 = vadd.f32 %v3286_v3, %v737_v33 }
 0x168   : > { %2799 = vrsqrt.f32 %v1200_v40  ;;  %v770_v48 = vpack.c.bf16 %v758_v15, %v757_v32  ;;  %v738_v10 = vmul.f32 %v3278_v54, %v716_v2 }
 0x169   : > { %v2790_v11 = vpop.eup %2789  ;;  %v1201_v41 = vadd.f32 1e-05, %v1199_v8  ;;  %v739_v19 = vmul.f32 %v3278_v54, %v717_v7 }
 0x16a   : > { %v2792_v13 = vpop.eup %2791  ;;  %v718_v14 = vmul.f32 %v2790_v11, %v3210_v17  ;;  %2476 = vmatmul.mubr.msk.bf16.gmra.mrb[4].mxu0 %vm513_vm0, %v770_v48  ;;  %v760_v18 = vadd.f32 %v3286_v3, %v738_v10 }
 0x16b   : > { %v719_v31 = vmul.f32 %v2792_v13, %v3219_v43  ;;  %2801 = vrsqrt.f32 %v1201_v41  ;;  %v761_v17 = vadd.f32 %v3286_v3, %v739_v19 }
 0x16c   : > { %v771_v22 = vpack.c.bf16 %v760_v18, %v759_v12  ;;  %v740_v23 = vmul.f32 %v3278_v54, %v718_v14 }
 0x16d   : > { %v2794_v26 = vpop.eup %2793  ;;  %v741_v16 = vmul.f32 %v3278_v54, %v719_v31 }
 0x16e   : > { %v2796_v27 = vpop.eup %2795  ;;  %v720_v30 = vmul.f32 %v2794_v26, %v3222_v21  ;;  %2479 = vmatprep.mubr.msk.bf16.mxu0 %vm513_vm0, %v771_v22  ;;  %v762_v49 = vadd.f32 %v3286_v3, %v740_v23 }
 0x16f   : > { %v721_v34 = vmul.f32 %v2796_v27, %v3231_v53  ;;  %v763_v21 = vadd.f32 %v3286_v3, %v741_v16  ;;  %v2320_v53 = vld [vmem:[%s3837_s2] ss:$0 sm:$0xff] }
 0x170   : > { %v772_v35 = vpack.c.bf16 %v762_v49, %v761_v17  ;;  %v742_v43 = vmul.f32 %v3278_v54, %v720_v30 }
 0x171   : > { %v2798_v36 = vpop.eup %2797  ;;  %v743_v39 = vmul.f32 %v3278_v54, %v721_v34 }
 0x172   : > { %v2800_v37 = vpop.eup %2799  ;;  %v722_v58 = vmul.f32 %v2798_v36, %v3234_v25  ;;  %2480 = vmatmul.mubr.msk.bf16.gmra.mrb[8].mxu0 %vm513_vm0, %v772_v35  ;;  %v764_v38 = vadd.f32 %v3286_v3, %v742_v43 }
 0x173   : > { %v1204_v42 = vmul.f32 %v2800_v37, %v3243_v63  ;;  %v765_v59 = vadd.f32 %v3286_v3, %v743_v39  ;;  %v2321_v63 = vld [vmem:[%s3818_s3] ss:$0 sm:$0xff] }
 0x174   : > { %v773_v20 = vpack.c.bf16 %v764_v38, %v763_v21  ;;  %v744_v44 = vmul.f32 %v3278_v54, %v722_v58  ;;  %v2322_v37 = vld [vmem:[%s3822_s7] ss:$0 sm:$0xff] }
 0x175   : > { %v2802_v45 = vpop.eup %2801  ;;  %v1212_v47 = vmul.f32 %v2320_v53, %v1204_v42 }
 0x176   : > { %v1205_v25 = vmul.f32 %v2802_v45, %v3246_v29  ;;  %2483 = vmatprep.mubr.msk.bf16.mxu0 %vm513_vm0, %v773_v20  ;;  %v766_v46 = vadd.f32 %v3286_v3, %v744_v44 }
 0x177   : > { %v3348_v52 = vadd.f32 %v2321_v63, %v1212_v47 }
 0x178   : > { %v774_v50 = vpack.c.bf16 %v766_v46, %v765_v59  ;;  %v1213_v51 = vmul.f32 %v2320_v53, %v1205_v25 }
 0x17a   : > { %2484 = vmatmul.mubr.msk.bf16.gmra.mrb[12].mxu0 %vm513_vm0, %v774_v50  ;;  %v3350_v54 = vadd.f32 %v2321_v63, %v1213_v51 }
 0x17b   : > { %2511 = vmatprep.mubr.msk.bf16.mxu0 %vm2916_vm1, %v2915_v9 }
 0x17c   : > { %v3356_v29 = vpack.c.bf16 %v3350_v54, %v3348_v52 }
 0x17e   : > { %2492 = vmatmul.mubr.msk.bf16.vlgmr.msra.gmra.mrb[0].mxu1 %vm513_vm0, %v3356_v29 }
 0x17f   : > { %2531 = vmatprep.mubr.msk.bf16.mxu1 %vm2916_vm1, %v2915_v9 }
 0x235   : > { %v2473_v3 = vpop.f32.mrb[0].mxu0 }
 0x236   : > { %v856_v55 = vpop.f32.mrb[1].mxu0  ;;  %v865_v56 = vadd.f32 %v2473_v3, %v2309_v24 }
 0x237   : > { %v2474_v4 = vpop.f32.mrb[2].mxu0  ;;  %v857_v61 = vadd.f32 %v2309_v24, %v856_v55 }
 0x238   : > { %v868_v57 = vadd.f32 %v2474_v4, %v2309_v24  ;;  %v859_v60 = vpop.f32.mrb[3].mxu0 }
 0x239   : > { %v860_v62 = vadd.f32 %v2309_v24, %v859_v60 }
 0x23a   : > { %v3365_v28 = vpack.c.bf16 %v868_v57, %v865_v56  ;;  %v1223_v57 = vlaneseq }
 0x23b   : > { %v3367_v5 = vpack.c.bf16 %v860_v62, %v857_v61 }
 0x23c   : > { %929 = vst.msk [vmem:[#allocation2 + $0x8] sm:$0xff] %vm927_vm2, %v3365_v28  ;;  %v3419_v60 = vand.u32 127, %v1223_v57 }
 0x23d   : > { %928 = vst.msk [vmem:[#allocation2] sm:$0xff] %vm927_vm2, %v3367_v5  ;;  %v2477_v0 = vpop.f32.mrb[4].mxu0 }
 0x23e   : > { %v872_v40 = vpop.f32.mrb[5].mxu0  ;;  %v881_v2 = vadd.f32 %v2477_v0, %v2309_v24  ;;  %vm1225_vm3 = vcmp.ge.s32.totalorder %v3419_v60, 8 }
 0x23f   : > { %v2478_v1 = vpop.f32.mrb[6].mxu0  ;;  %v873_v15 = vadd.f32 %v2309_v24, %v872_v40 }
 0x240   : > { %v884_v6 = vadd.f32 %v2478_v1, %v2309_v24  ;;  %v875_v32 = vpop.f32.mrb[7].mxu0 }
 0x241   : > { %v876_v33 = vadd.f32 %v2309_v24, %v875_v32 }
 0x242   : > { %v3373_v7 = vpack.c.bf16 %v884_v6, %v881_v2 }
 0x243   : > { %v3375_v8 = vpack.c.bf16 %v876_v33, %v873_v15  ;;  %v1295_v23 = vld [vmem:[#allocation2 + $0x8] sm:$0xff] }
 0x244   : > { %931 = vst.msk [vmem:[#allocation2 + $0x18] sm:$0xff] %vm927_vm2, %v3373_v7  ;;  %v1294_v48 = vld [vmem:[#allocation2] sm:$0xff]  ;;  %v1310_v30 = vsel %vm927_vm2, %v1295_v23, 0 }
 0x245   : > { %930 = vst.msk [vmem:[#allocation2 + $0x10] sm:$0xff] %vm927_vm2, %v3375_v8  ;;  %v2481_v10 = vpop.f32.mrb[8].mxu0  ;;  %v1307_v11 = vsel %vm927_vm2, %v1294_v48, 0 }
 0x246   : > { %v888_v41 = vpop.f32.mrb[9].mxu0  ;;  %2496 = vmatpush3.bf16.xpose.msra.mxu0 %v1307_v11  ;;  %v897_v14 = vadd.f32 %v2481_v10, %v2309_v24 }
 0x247   : > { %v2482_v13 = vpop.f32.mrb[10].mxu0  ;;  %2497 = vmatprep.subr.bf16.mxu0 %v2915_v9  ;;  %v889_v19 = vadd.f32 %v2309_v24, %v888_v41 }
 0x248   : > { %v900_v12 = vadd.f32 %v2482_v13, %v2309_v24  ;;  %v891_v18 = vpop.f32.mrb[11].mxu0 }
 0x249   : > { %v892_v31 = vadd.f32 %v2309_v24, %v891_v18 }
 0x24a   : > { %v3383_v22 = vpack.c.bf16 %v900_v12, %v897_v14 }
 0x24b   : > { %v3385_v26 = vpack.c.bf16 %v892_v31, %v889_v19  ;;  %v1297_v46 = vld [vmem:[#allocation2 + $0x18] sm:$0xff] }
 0x24c   : > { %933 = vst.msk [vmem:[#allocation2 + $0x28] sm:$0xff] %vm927_vm2, %v3383_v22  ;;  %v1296_v39 = vld [vmem:[#allocation2 + $0x10] sm:$0xff]  ;;  %v1316_v47 = vsel %vm927_vm2, %v1297_v46, 0 }
 0x24d   : > { %932 = vst.msk [vmem:[#allocation2 + $0x20] sm:$0xff] %vm927_vm2, %v3385_v26  ;;  %v2485_v27 = vpop.f32.mrb[12].mxu0  ;;  %v1313_v25 = vsel %vm927_vm2, %v1296_v39, 0 }
 0x24e   : > { %v904_v17 = vpop.f32.mrb[13].mxu0  ;;  %2498 = vmatpush3.bf16.xpose.msra.mxu0 %v1310_v30  ;;  %v913_v16 = vadd.f32 %v2485_v27, %v2309_v24 }
 0x24f   : > { %v2486_v49 = vpop.f32.mrb[14].mxu0  ;;  %2499 = vmatprep.subr.bf16.mxu0 %v2915_v9  ;;  %v905_v43 = vadd.f32 %v2309_v24, %v904_v17 }
 0x250   : > { %v916_v34 = vadd.f32 %v2486_v49, %v2309_v24  ;;  %v907_v35 = vpop.f32.mrb[15].mxu0 }
 0x251   : > { %v908_v36 = vadd.f32 %v2309_v24, %v907_v35  ;;  %v1286_v58 = vpop.f32.mrb[0].mxu1 }
 0x252   : > { %v3396_v21 = vpack.c.bf16 %v916_v34, %v913_v16  ;;  %v2493_v38 = vpop.f32.mrb[1].mxu1  ;;  %v1287_v20 = vadd.f32 %v2322_v37, %v1286_v58 }
 0x253   : > { %v3398_v42 = vpack.c.bf16 %v908_v36, %v905_v43  ;;  %v1289_v53 = vpop.f32.mrb[2].mxu1  ;;  %v1299_v51 = vld [vmem:[#allocation2 + $0x28] sm:$0xff] }
 0x254   : > { %935 = vst.msk [vmem:[#allocation2 + $0x38] sm:$0xff] %vm927_vm2, %v3396_v21  ;;  %v1290_v44 = vadd.f32 %v2322_v37, %v1289_v53  ;;  %v2494_v45 = vpop.f32.mrb[3].mxu1  ;;  %v1298_v63 = vld [vmem:[#allocation2 + $0x20] sm:$0xff]  ;;  %v1322_v3 = vsel %vm927_vm2, %v1299_v51, 0 }
 0x255   : > { %934 = vst.msk [vmem:[#allocation2 + $0x30] sm:$0xff] %vm927_vm2, %v3398_v42  ;;  %v1319_v50 = vsel %vm927_vm2, %v1298_v63, 0  ;;  %v2759_v63 = vld [vmem:[%s3821_s6 + $0x10] sm:$0xff]  }
 0x256   : > { %v1293_v59 = vpack.c.bf16 %v1290_v44, %v1287_v20  ;;  %2500 = vmatpush3.bf16.xpose.msra.mxu0 %v1313_v25 }
 0x257   : > { %2501 = vmatprep.subr.bf16.mxu0 %v2915_v9 }
 0x25b   : > { %v1301_v4 = vld [vmem:[#allocation2 + $0x38] sm:$0xff] }
 0x25c   : > { %v1300_v24 = vld [vmem:[#allocation2 + $0x30] sm:$0xff]  ;;  %v1328_v56 = vsel %vm927_vm2, %v1301_v4, 0 }
 0x25d   : > { %v1325_v55 = vsel %vm927_vm2, %v1300_v24, 0  ;;  %v2760_v24 = vld [vmem:[%s3821_s6 + $0x18] sm:$0xff]  }
 0x25e   : > { %2502 = vmatpush3.bf16.xpose.msra.mxu0 %v1316_v47 }
 0x25f   : > { %2503 = vmatprep.subr.bf16.mxu0 %v2915_v9 }
 0x266   : > { %2504 = vmatpush3.bf16.xpose.msra.mxu0 %v1319_v50 }
 0x267   : > { %2505 = vmatprep.subr.bf16.mxu0 %v2915_v9 }
 0x26e   : > { %2506 = vmatpush3.bf16.xpose.msra.mxu0 %v1322_v3 }
 0x26f   : > { %2507 = vmatprep.subr.bf16.mxu0 %v2915_v9 }
 0x276   : > { %2508 = vmatpush3.bf16.xpose.msra.mxu0 %v1325_v55 }
 0x277   : > { %2509 = vmatprep.subr.bf16.mxu0 %v2915_v9 }
 0x27e   : > { %2510 = vmatpush3.bf16.xpose.msra.mxu0 %v1328_v56 }
 0x27f   : > { %2563 = vmatprep.subr.bf16.mxu0 %v2915_v9 }
 0x285   : > { %2512 = vmatmul.mubr.msk.bf16.vlgmr.msra.gmra.mrb[16].mxu0 %vm927_vm2, %v1293_v59 }
 0x286   : > { %2579 = vmatprep.mubr.msk.bf16.mxu0 %vm2916_vm1, %v2915_v9 }
 0x358   : > { %v1364_v61 = vpop.f32.mrb[16].mxu0 }
 0x359   : > { %v2513_v62 = vpop.f32.mrb[17].mxu0  ;;  %v1371_v0 = vsel %vm1225_vm3, -1e+30, %v1364_v61 }
 0x35a   : > { %1373 = vmax.xlane.f32.xlu0 %v1371_v0  ;;  %v1367_v40 = vpop.f32.mrb[18].mxu0 }
 0x35b   : > { %v2514_v1 = vpop.f32.mrb[19].mxu0  ;;  %v1372_v2 = vsel %vm1225_vm3, -1e+30, %v1367_v40 }
 0x35c   : > { %1375 = vmax.xlane.f32.xlu1 %v1372_v2 }
 0x36d   : > { %946 = vrot.lane.b32.xlu1 %v3365_v28, %s2917_s24 }
 0x370   : > { %944 = vrot.lane.b32.xlu0 %v3367_v5, %s2917_s24 }
 0x371   : > { %948 = vrot.lane.b32.xlu1 %v3375_v8, %s2917_s24 }
 0x374   : > { %950 = vrot.lane.b32.xlu0 %v3373_v7, %s2917_s24 }
 0x375   : > { %952 = vrot.lane.b32.xlu1 %v3385_v26, %s2917_s24 }
 0x379   : > { %954 = vrot.lane.b32.xlu1 %v3383_v22, %s2917_s24 }
 0x3e7   : > { %v1374_v6 = vpop.xlane.xlu0 %1373 }
 0x3e8   : > { %v1377_v32 = vsub.f32 %v1371_v0, %v1374_v6 }
 0x3e9   : > { %v1376_v15 = vpop.xlane.xlu1 %1375 }
 0x3ea   : > { %v1379_v33 = vmul.f32 1.442695, %v1377_v32  ;;  %v1378_v48 = vsub.f32 %v1372_v2, %v1376_v15 }
 0x3eb   : > { %v945_v10 = vpop.permute.xlu0 %944 }
 0x3ec   : > { %2803 = vpow2.f32 %v1379_v33  ;;  %v1381_v11 = vmul.f32 1.442695, %v1378_v48  ;;  %968 = vst.msk [vmem:[#allocation3] sm:$0xff] %vm927_vm2, %v945_v10 }
 0x3ed   : > { %v947_v41 = vpop.permute.xlu1 %946 }
 0x3ee   : > { %2805 = vpow2.f32 %v1381_v11  ;;  %969 = vst.msk [vmem:[#allocation3 + $0x8] sm:$0xff] %vm927_vm2, %v947_v41 }
 0x3ef   : > { %v951_v13 = vpop.permute.xlu0 %950 }
 0x3f0   : > { %971 = vst.msk [vmem:[#allocation3 + $0x18] sm:$0xff] %vm927_vm2, %v951_v13 }
 0x3f1   : > { %v949_v14 = vpop.permute.xlu1 %948 }
 0x3f2   : > { %970 = vst.msk [vmem:[#allocation3 + $0x10] sm:$0xff] %vm927_vm2, %v949_v14 }
 0x3f3   : > { %v1392_v12 = vld [vmem:[#allocation3] sm:$0xff] }
 0x3f4   : > { %2516 = vmatpush3.bf16.msra.mxu1 %v1392_v12 }
 0x3f5   : > { %v953_v18 = vpop.permute.xlu1 %952  ;;  %2517 = vmatprep.subr.bf16.mxu1 %v2915_v9  ;;  %v1393_v31 = vld [vmem:[#allocation3 + $0x8] sm:$0xff] }
 0x3f6   : > { %v2804_v19 = vpop.eup %2803  ;;  %972 = vst.msk [vmem:[#allocation3 + $0x20] sm:$0xff] %vm927_vm2, %v953_v18  ;;  %v2332_v18 = vld [vmem:[%s3822_s7 + $0x1] ss:$0 sm:$0xff] }
 0x3f7   : > { %1383 = vadd.xlane.f32.xlu1 %v2804_v19  ;;  %v1395_v17 = vld [vmem:[#allocation3 + $0x18] sm:$0xff] }
 0x3f8   : > { %v2806_v23 = vpop.eup %2805  ;;  %2518 = vmatpush3.bf16.msra.mxu1 %v1393_v31 }
 0x3f9   : > { %1385 = vadd.xlane.f32.xlu0 %v2806_v23  ;;  %v955_v27 = vpop.permute.xlu1 %954  ;;  %2519 = vmatprep.subr.bf16.mxu1 %v2915_v9  ;;  %v1394_v30 = vld [vmem:[#allocation3 + $0x10] sm:$0xff] }
 0x3fa   : > { %973 = vst.msk [vmem:[#allocation3 + $0x28] sm:$0xff] %vm927_vm2, %v955_v27 }
 0x3fc   : > { %2520 = vmatpush3.bf16.msra.mxu1 %v1394_v30 }
 0x3fd   : > { %2521 = vmatprep.subr.bf16.mxu1 %v2915_v9  ;;  %v1396_v49 = vld [vmem:[#allocation3 + $0x20] sm:$0xff] }
 0x400   : > { %2522 = vmatpush3.bf16.msra.mxu1 %v1395_v17 }
 0x401   : > { %2523 = vmatprep.subr.bf16.mxu1 %v2915_v9  ;;  %v1397_v16 = vld [vmem:[#allocation3 + $0x28] sm:$0xff] }
 0x404   : > { %2524 = vmatpush3.bf16.msra.mxu1 %v1396_v49 }
 0x405   : > { %2525 = vmatprep.subr.bf16.mxu1 %v2915_v9 }
 0x408   : > { %958 = vrot.lane.b32.xlu1 %v3396_v21, %s2917_s24  ;;  %2526 = vmatpush3.bf16.msra.mxu1 %v1397_v16 }
 0x409   : > { %2527 = vmatprep.subr.bf16.mxu1 %v2915_v9 }
 0x40c   : > { %978 = vrot.lane.b32.xlu1 %v3365_v28, %s2918_s22 }
 0x40f   : > { %956 = vrot.lane.b32.xlu0 %v3398_v42, %s2917_s24 }
 0x410   : > { %982 = vrot.lane.b32.xlu1 %v3373_v7, %s2918_s22 }
 0x413   : > { %976 = vrot.lane.b32.xlu0 %v3367_v5, %s2918_s22 }
 0x414   : > { %986 = vrot.lane.b32.xlu1 %v3383_v22, %s2918_s22 }
 0x417   : > { %980 = vrot.lane.b32.xlu0 %v3375_v8, %s2918_s22 }
 0x418   : > { %990 = vrot.lane.b32.xlu1 %v3396_v21, %s2918_s22 }
 0x41b   : > { %984 = vrot.lane.b32.xlu0 %v3385_v26, %s2918_s22 }
 0x41f   : > { %988 = vrot.lane.b32.xlu0 %v3398_v42, %s2918_s22  ;;  %s2919_s22 = smov 88  }
 0x484   : > { %v1384_v34 = vpop.xlane.xlu1 %1383 }
 0x486   : > { %v1386_v35 = vpop.xlane.xlu0 %1385 }
 0x487   : > { %2807 = vrcp.f32 %v1386_v35 }
 0x488   : > { %v959_v43 = vpop.permute.xlu1 %958  ;;  %2809 = vrcp.f32 %v1384_v34 }
 0x489   : > { %975 = vst.msk [vmem:[#allocation3 + $0x38] sm:$0xff] %vm927_vm2, %v959_v43 }
 0x48a   : > { %v957_v36 = vpop.permute.xlu0 %956 }
 0x48b   : > { %974 = vst.msk [vmem:[#allocation3 + $0x30] sm:$0xff] %vm927_vm2, %v957_v36 }
 0x48c   : > { %v979_v37 = vpop.permute.xlu1 %978 }
 0x48d   : > { %1002 = vst.msk [vmem:[#allocation2 + $0x48] sm:$0xff] %vm927_vm2, %v979_v37 }
 0x48e   : > { %v977_v58 = vpop.permute.xlu0 %976 }
 0x48f   : > { %1001 = vst.msk [vmem:[#allocation2 + $0x40] sm:$0xff] %vm927_vm2, %v977_v58 }
 0x490   : > { %v983_v38 = vpop.permute.xlu1 %982  ;;  %v1399_v46 = vld [vmem:[#allocation3 + $0x38] sm:$0xff] }
 0x491   : > { %v2808_v39 = vpop.eup %2807  ;;  %1004 = vst.msk [vmem:[#allocation2 + $0x58] sm:$0xff] %vm927_vm2, %v983_v38 }
 0x492   : > { %v981_v53 = vpop.permute.xlu0 %980  ;;  %v1398_v20 = vld [vmem:[#allocation3 + $0x30] sm:$0xff]  ;;  %v2810_v44 = vpop.eup %2809  ;;  %v1390_v25 = vmul.f32 %v2808_v39, %v2806_v23 }
 0x493   : > { %1003 = vst.msk [vmem:[#allocation2 + $0x50] sm:$0xff] %vm927_vm2, %v981_v53  ;;  %2528 = vmatpush3.bf16.msra.mxu1 %v1398_v20  ;;  %v1389_v47 = vmul.f32 %v2810_v44, %v2804_v19 }
 0x494   : > { %v987_v45 = vpop.permute.xlu1 %986  ;;  %2529 = vmatprep.subr.bf16.mxu1 %v2915_v9  ;;  %v1512_v56 = vld [vmem:[#allocation2 + $0x48] sm:$0xff] }
 0x495   : > { %1006 = vst.msk [vmem:[#allocation2 + $0x68] sm:$0xff] %vm927_vm2, %v987_v45  ;;  %v1391_v51 = vpack.c.bf16 %v1390_v25, %v1389_v47  ;;  %v1526_v57 = vsel %vm927_vm2, %v1512_v56, 0 }
 0x496   : > { %v985_v59 = vpop.permute.xlu0 %984  ;;  %v1511_v55 = vld [vmem:[#allocation2 + $0x40] sm:$0xff] }
 0x497   : > { %1005 = vst.msk [vmem:[#allocation2 + $0x60] sm:$0xff] %vm927_vm2, %v985_v59  ;;  %2530 = vmatpush3.bf16.msra.mxu1 %v1399_v46  ;;  %v1523_v4 = vsel %vm927_vm2, %v1511_v55, 0 }
 0x498   : > { %v991_v50 = vpop.permute.xlu1 %990  ;;  %2535 = vmatprep.subr.bf16.mxu1 %v2915_v9  ;;  %v1514_v0 = vld [vmem:[#allocation2 + $0x58] sm:$0xff] }
 0x499   : > { %1008 = vst.msk [vmem:[#allocation2 + $0x78] sm:$0xff] %vm927_vm2, %v991_v50  ;;  %v1532_v40 = vsel %vm927_vm2, %v1514_v0, 0 }
 0x49a   : > { %v989_v3 = vpop.permute.xlu0 %988  ;;  %2532 = vmatmul.mubr.bf16.vlgmr.msra.gmra.mrb[4].mxu1 %v1391_v51  ;;  %v1513_v61 = vld [vmem:[#allocation2 + $0x50] sm:$0xff] }
 0x49b   : > { %1007 = vst.msk [vmem:[#allocation2 + $0x70] sm:$0xff] %vm927_vm2, %v989_v3  ;;  %2536 = vmatpush3.bf16.msra.mxu1 %v2759_v63  ;;  %2539 = vmatprep.mubr.msk.bf16.mxu1 %vm2916_vm1, %v2915_v9  ;;  %v1529_v62 = vsel %vm927_vm2, %v1513_v61, 0 }
 0x49c   : > { %2537 = vmatprep.subr.bf16.mxu1 %v2915_v9  ;;  %v1516_v6 = vld [vmem:[#allocation2 + $0x68] sm:$0xff] }
 0x49d   : > { %v1538_v32 = vsel %vm927_vm2, %v1516_v6, 0 }
 0x49e   : > { %v1515_v1 = vld [vmem:[#allocation2 + $0x60] sm:$0xff] }
 0x49f   : > { %2538 = vmatpush3.bf16.msra.mxu1 %v2760_v24  ;;  %v1535_v2 = vsel %vm927_vm2, %v1515_v1, 0 }
 0x4a0   : > { %2543 = vmatprep.subr.bf16.mxu1 %v2915_v9  ;;  %v1518_v48 = vld [vmem:[#allocation2 + $0x78] sm:$0xff] }
 0x4a1   : > { %v1544_v10 = vsel %vm927_vm2, %v1518_v48, 0 }
 0x4a2   : > { %2540 = vmatmul.mubr.msk.bf16.vlgmr.msra.gmra.mrb[8].mxu1 %vm513_vm0, %v3356_v29  ;;  %v1517_v15 = vld [vmem:[#allocation2 + $0x70] sm:$0xff] }
 0x4a3   : > { %2559 = vmatprep.mubr.msk.bf16.mxu1 %vm2916_vm1, %v2915_v9  ;;  %v1541_v33 = vsel %vm927_vm2, %v1517_v15, 0 }
 0x4a8   : > { %2544 = vmatpush3.bf16.xpose.msra.mxu1 %v1523_v4 }
 0x4a9   : > { %2545 = vmatprep.subr.bf16.mxu1 %v2915_v9 }
 0x4b0   : > { %2546 = vmatpush3.bf16.xpose.msra.mxu1 %v1526_v57 }
 0x4b1   : > { %2547 = vmatprep.subr.bf16.mxu1 %v2915_v9 }
 0x4b8   : > { %2548 = vmatpush3.bf16.xpose.msra.mxu1 %v1529_v62 }
 0x4b9   : > { %2549 = vmatprep.subr.bf16.mxu1 %v2915_v9 }
 0x4c0   : > { %2550 = vmatpush3.bf16.xpose.msra.mxu1 %v1532_v40 }
 0x4c1   : > { %2551 = vmatprep.subr.bf16.mxu1 %v2915_v9 }
 0x4c8   : > { %2552 = vmatpush3.bf16.xpose.msra.mxu1 %v1535_v2 }
 0x4c9   : > { %2553 = vmatprep.subr.bf16.mxu1 %v2915_v9 }
 0x4d0   : > { %2554 = vmatpush3.bf16.xpose.msra.mxu1 %v1538_v32 }
 0x4d1   : > { %2555 = vmatprep.subr.bf16.mxu1 %v2915_v9 }
 0x4d8   : > { %2556 = vmatpush3.bf16.xpose.msra.mxu1 %v1541_v33 }
 0x4d9   : > { %2557 = vmatprep.subr.bf16.mxu1 %v2915_v9 }
 0x4e0   : > { %2558 = vmatpush3.bf16.xpose.msra.mxu1 %v1544_v10 }
 0x4e1   : > { %2611 = vmatprep.subr.bf16.mxu1 %v2915_v9 }
 0x56d   : > { %v1434_v11 = vpop.f32.mrb[4].mxu1 }
 0x56e   : > { %v2533_v41 = vpop.f32.mrb[5].mxu1 }
 0x56f   : > { %v1437_v13 = vpop.f32.mrb[6].mxu1 }
 0x570   : > { %v1441_v14 = vpack.c.bf16 %v1437_v13, %v1434_v11  ;;  %v2534_v12 = vpop.f32.mrb[7].mxu1 }
 0x571   : > { %v2761_v12 = vld [vmem:[%s3821_s6 + $0x20] sm:$0xff]  }
 0x572   : > { %1442 = vst.msk [vmem:[#allocation4] sm:$0xff] %vm927_vm2, %v1441_v14 }
 0x575   : > { %v1502_v19 = vpop.f32.mrb[8].mxu1 }
 0x576   : > { %v2541_v31 = vpop.f32.mrb[9].mxu1  ;;  %v1503_v27 = vadd.f32 %v2332_v18, %v1502_v19 }
 0x577   : > { %v1505_v23 = vpop.f32.mrb[10].mxu1 }
 0x578   : > { %v1506_v30 = vadd.f32 %v2332_v18, %v1505_v23  ;;  %v2542_v17 = vpop.f32.mrb[11].mxu1  ;;  %v2762_v23 = vld [vmem:[%s3821_s6 + $0x28] sm:$0xff]  }
 0x57a   : > { %v1509_v49 = vpack.c.bf16 %v1506_v30, %v1503_v27 }
 0x57c   : > { %2560 = vmatmul.mubr.msk.bf16.vlgmr.msra.gmra.mrb[12].mxu1 %vm927_vm2, %v1509_v49 }
 0x57d   : > { %2627 = vmatprep.mubr.msk.bf16.mxu1 %vm2916_vm1, %v2915_v9 }
 0x64f   : > { %v1580_v16 = vpop.f32.mrb[12].mxu1 }
 0x650   : > { %v2561_v34 = vpop.f32.mrb[13].mxu1  ;;  %v1587_v35 = vsel %vm1225_vm3, -1e+30, %v1580_v16 }
 0x651   : > { %1589 = vmax.xlane.f32.xlu0 %v1587_v35  ;;  %v1583_v43 = vpop.f32.mrb[14].mxu1 }
 0x652   : > { %v2562_v36 = vpop.f32.mrb[15].mxu1  ;;  %v1588_v37 = vsel %vm1225_vm3, -1e+30, %v1583_v43 }
 0x653   : > { %1591 = vmax.xlane.f32.xlu1 %v1588_v37 }
 0x664   : > { %1011 = vrot.lane.b32.xlu1 %v3365_v28, %s2919_s22 }
 0x667   : > { %1009 = vrot.lane.b32.xlu0 %v3367_v5, %s2919_s22 }
 0x668   : > { %1017 = vrot.lane.b32.xlu1 %v3385_v26, %s2919_s22 }
 0x66b   : > { %1013 = vrot.lane.b32.xlu0 %v3375_v8, %s2919_s22 }
 0x66c   : > { %1019 = vrot.lane.b32.xlu1 %v3383_v22, %s2919_s22 }
 0x66f   : > { %1015 = vrot.lane.b32.xlu0 %v3373_v7, %s2919_s22 }
 0x6de   : > { %v1590_v58 = vpop.xlane.xlu0 %1589 }
 0x6df   : > { %v1593_v38 = vsub.f32 %v1587_v35, %v1590_v58 }
 0x6e0   : > { %v1592_v39 = vpop.xlane.xlu1 %1591 }
 0x6e1   : > { %v1595_v53 = vmul.f32 1.442695, %v1593_v38  ;;  %v1594_v20 = vsub.f32 %v1588_v37, %v1592_v39 }
 0x6e2   : > { %v1010_v44 = vpop.permute.xlu0 %1009 }
 0x6e3   : > { %2811 = vpow2.f32 %v1595_v53  ;;  %v1597_v45 = vmul.f32 1.442695, %v1594_v20  ;;  %1034 = vst.msk [vmem:[#allocation3 + $0x40] sm:$0xff] %vm927_vm2, %v1010_v44 }
 0x6e4   : > { %v1012_v25 = vpop.permute.xlu1 %1011 }
 0x6e5   : > { %2813 = vpow2.f32 %v1597_v45  ;;  %1035 = vst.msk [vmem:[#allocation3 + $0x48] sm:$0xff] %vm927_vm2, %v1012_v25 }
 0x6e6   : > { %v1014_v59 = vpop.permute.xlu0 %1013 }
 0x6e7   : > { %1036 = vst.msk [vmem:[#allocation3 + $0x50] sm:$0xff] %vm927_vm2, %v1014_v59 }
 0x6e8   : > { %v1018_v46 = vpop.permute.xlu1 %1017 }
 0x6e9   : > { %1038 = vst.msk [vmem:[#allocation3 + $0x60] sm:$0xff] %vm927_vm2, %v1018_v46 }
 0x6ea   : > { %v1016_v47 = vpop.permute.xlu0 %1015  ;;  %v1609_v63 = vld [vmem:[#allocation3 + $0x40] sm:$0xff] }
 0x6eb   : > { %1037 = vst.msk [vmem:[#allocation3 + $0x58] sm:$0xff] %vm927_vm2, %v1016_v47  ;;  %2564 = vmatpush3.bf16.msra.mxu0 %v1609_v63  ;;  %v2342_v63 = vld [vmem:[%s3822_s7 + $0x2] ss:$0 sm:$0xff] }
 0x6ec   : > { %v1020_v50 = vpop.permute.xlu1 %1019  ;;  %2565 = vmatprep.subr.bf16.mxu0 %v2915_v9  ;;  %v1610_v3 = vld [vmem:[#allocation3 + $0x48] sm:$0xff] }
 0x6ed   : > { %v2812_v51 = vpop.eup %2811  ;;  %1039 = vst.msk [vmem:[#allocation3 + $0x68] sm:$0xff] %vm927_vm2, %v1020_v50 }
 0x6ee   : > { %1599 = vadd.xlane.f32.xlu1 %v2812_v51  ;;  %v1611_v55 = vld [vmem:[#allocation3 + $0x50] sm:$0xff] }
 0x6ef   : > { %v2814_v24 = vpop.eup %2813  ;;  %2566 = vmatpush3.bf16.msra.mxu0 %v1610_v3 }
 0x6f0   : > { %1601 = vadd.xlane.f32.xlu0 %v2814_v24  ;;  %2567 = vmatprep.subr.bf16.mxu0 %v2915_v9  ;;  %v1613_v56 = vld [vmem:[#allocation3 + $0x60] sm:$0xff] }
 0x6f2   : > { %v1612_v4 = vld [vmem:[#allocation3 + $0x58] sm:$0xff] }
 0x6f3   : > { %2568 = vmatpush3.bf16.msra.mxu0 %v1611_v55 }
 0x6f4   : > { %2569 = vmatprep.subr.bf16.mxu0 %v2915_v9  ;;  %v1614_v57 = vld [vmem:[#allocation3 + $0x68] sm:$0xff] }
 0x6f7   : > { %2570 = vmatpush3.bf16.msra.mxu0 %v1612_v4 }
 0x6f8   : > { %2571 = vmatprep.subr.bf16.mxu0 %v2915_v9 }
 0x6fb   : > { %2572 = vmatpush3.bf16.msra.mxu0 %v1613_v56 }
 0x6fc   : > { %2573 = vmatprep.subr.bf16.mxu0 %v2915_v9 }
 0x6ff   : > { %1023 = vrot.lane.b32.xlu1 %v3396_v21, %s2919_s22  ;;  %2574 = vmatpush3.bf16.msra.mxu0 %v1614_v57 }
 0x700   : > { %2575 = vmatprep.subr.bf16.mxu0 %v2915_v9 }
 0x703   : > { %1044 = vrot.lane.b32.xlu1 %v3365_v28, %s2920_s14 }
 0x706   : > { %1021 = vrot.lane.b32.xlu0 %v3398_v42, %s2919_s22 }
 0x707   : > { %1048 = vrot.lane.b32.xlu1 %v3373_v7, %s2920_s14 }
 0x70a   : > { %1042 = vrot.lane.b32.xlu0 %v3367_v5, %s2920_s14 }
 0x70b   : > { %1052 = vrot.lane.b32.xlu1 %v3383_v22, %s2920_s14 }
 0x70e   : > { %1046 = vrot.lane.b32.xlu0 %v3375_v8, %s2920_s14 }
 0x70f   : > { %1056 = vrot.lane.b32.xlu1 %v3396_v21, %s2920_s14 }
 0x712   : > { %1050 = vrot.lane.b32.xlu0 %v3385_v26, %s2920_s14 }
 0x716   : > { %1054 = vrot.lane.b32.xlu0 %v3398_v42, %s2920_s14  ;;  %s2921_s14 = smov 80  }
 0x77b   : > { %v1600_v61 = vpop.xlane.xlu1 %1599 }
 0x77d   : > { %v1602_v62 = vpop.xlane.xlu0 %1601 }
 0x77e   : > { %2815 = vrcp.f32 %v1602_v62 }
 0x77f   : > { %v1024_v0 = vpop.permute.xlu1 %1023  ;;  %2817 = vrcp.f32 %v1600_v61 }
 0x780   : > { %1041 = vst.msk [vmem:[#allocation3 + $0x78] sm:$0xff] %vm927_vm2, %v1024_v0 }
 0x781   : > { %v1022_v40 = vpop.permute.xlu0 %1021 }
 0x782   : > { %1040 = vst.msk [vmem:[#allocation3 + $0x70] sm:$0xff] %vm927_vm2, %v1022_v40 }
 0x783   : > { %v1045_v1 = vpop.permute.xlu1 %1044 }
 0x784   : > { %1068 = vst.msk [vmem:[#allocation2 + $0x88] sm:$0xff] %vm927_vm2, %v1045_v1 }
 0x785   : > { %v1043_v2 = vpop.permute.xlu0 %1042 }
 0x786   : > { %1067 = vst.msk [vmem:[#allocation2 + $0x80] sm:$0xff] %vm927_vm2, %v1043_v2 }
 0x787   : > { %v1049_v6 = vpop.permute.xlu1 %1048  ;;  %v1616_v13 = vld [vmem:[#allocation3 + $0x78] sm:$0xff] }
 0x788   : > { %v2816_v32 = vpop.eup %2815  ;;  %1070 = vst.msk [vmem:[#allocation2 + $0x98] sm:$0xff] %vm927_vm2, %v1049_v6 }
 0x789   : > { %v1047_v15 = vpop.permute.xlu0 %1046  ;;  %v1615_v33 = vld [vmem:[#allocation3 + $0x70] sm:$0xff]  ;;  %v2818_v48 = vpop.eup %2817  ;;  %v1606_v11 = vmul.f32 %v2816_v32, %v2814_v24 }
 0x78a   : > { %1069 = vst.msk [vmem:[#allocation2 + $0x90] sm:$0xff] %vm927_vm2, %v1047_v15  ;;  %2576 = vmatpush3.bf16.msra.mxu0 %v1615_v33  ;;  %v1605_v14 = vmul.f32 %v2818_v48, %v2812_v51 }
 0x78b   : > { %v1053_v10 = vpop.permute.xlu1 %1052  ;;  %2577 = vmatprep.subr.bf16.mxu0 %v2915_v9  ;;  %v1734_v17 = vld [vmem:[#allocation2 + $0x88] sm:$0xff] }
 0x78c   : > { %1072 = vst.msk [vmem:[#allocation2 + $0xa8] sm:$0xff] %vm927_vm2, %v1053_v10  ;;  %v1607_v19 = vpack.c.bf16 %v1606_v11, %v1605_v14  ;;  %v1748_v49 = vsel %vm927_vm2, %v1734_v17, 0 }
 0x78d   : > { %v1051_v41 = vpop.permute.xlu0 %1050  ;;  %v1733_v27 = vld [vmem:[#allocation2 + $0x80] sm:$0xff] }
 0x78e   : > { %1071 = vst.msk [vmem:[#allocation2 + $0xa0] sm:$0xff] %vm927_vm2, %v1051_v41  ;;  %2578 = vmatpush3.bf16.msra.mxu0 %v1616_v13  ;;  %v1745_v30 = vsel %vm927_vm2, %v1733_v27, 0 }
 0x78f   : > { %v1057_v18 = vpop.permute.xlu1 %1056  ;;  %2583 = vmatprep.subr.bf16.mxu0 %v2915_v9  ;;  %v1736_v35 = vld [vmem:[#allocation2 + $0x98] sm:$0xff] }
 0x790   : > { %1074 = vst.msk [vmem:[#allocation2 + $0xb8] sm:$0xff] %vm927_vm2, %v1057_v18  ;;  %v1754_v43 = vsel %vm927_vm2, %v1736_v35, 0 }
 0x791   : > { %v1055_v31 = vpop.permute.xlu0 %1054  ;;  %2580 = vmatmul.mubr.bf16.vlgmr.msra.gmra.mrb[20].mxu0 %v1607_v19  ;;  %v1735_v16 = vld [vmem:[#allocation2 + $0x90] sm:$0xff] }
 0x792   : > { %1073 = vst.msk [vmem:[#allocation2 + $0xb0] sm:$0xff] %vm927_vm2, %v1055_v31  ;;  %2584 = vmatpush3.bf16.msra.mxu0 %v2761_v12  ;;  %2587 = vmatprep.mubr.msk.bf16.mxu0 %vm2916_vm1, %v2915_v9  ;;  %v1751_v34 = vsel %vm927_vm2, %v1735_v16, 0 }
 0x793   : > { %2585 = vmatprep.subr.bf16.mxu0 %v2915_v9  ;;  %v1738_v58 = vld [vmem:[#allocation2 + $0xa8] sm:$0xff] }
 0x794   : > { %v1760_v38 = vsel %vm927_vm2, %v1738_v58, 0 }
 0x795   : > { %v1737_v36 = vld [vmem:[#allocation2 + $0xa0] sm:$0xff] }
 0x796   : > { %2586 = vmatpush3.bf16.msra.mxu0 %v2762_v23  ;;  %v1757_v37 = vsel %vm927_vm2, %v1737_v36, 0 }
 0x797   : > { %2591 = vmatprep.subr.bf16.mxu0 %v2915_v9  ;;  %v1740_v20 = vld [vmem:[#allocation2 + $0xb8] sm:$0xff] }
 0x798   : > { %v1766_v44 = vsel %vm927_vm2, %v1740_v20, 0 }
 0x799   : > { %2588 = vmatmul.mubr.msk.bf16.vlgmr.msra.gmra.mrb[24].mxu0 %vm513_vm0, %v3356_v29  ;;  %v1739_v39 = vld [vmem:[#allocation2 + $0xb0] sm:$0xff] }
 0x79a   : > { %2607 = vmatprep.mubr.msk.bf16.mxu0 %vm2916_vm1, %v2915_v9  ;;  %v1763_v53 = vsel %vm927_vm2, %v1739_v39, 0 }
 0x79f   : > { %2592 = vmatpush3.bf16.xpose.msra.mxu0 %v1745_v30 }
 0x7a0   : > { %2593 = vmatprep.subr.bf16.mxu0 %v2915_v9 }
 0x7a7   : > { %2594 = vmatpush3.bf16.xpose.msra.mxu0 %v1748_v49 }
 0x7a8   : > { %2595 = vmatprep.subr.bf16.mxu0 %v2915_v9 }
 0x7af   : > { %2596 = vmatpush3.bf16.xpose.msra.mxu0 %v1751_v34 }
 0x7b0   : > { %2597 = vmatprep.subr.bf16.mxu0 %v2915_v9 }
 0x7b7   : > { %2598 = vmatpush3.bf16.xpose.msra.mxu0 %v1754_v43 }
 0x7b8   : > { %2599 = vmatprep.subr.bf16.mxu0 %v2915_v9 }
 0x7bf   : > { %2600 = vmatpush3.bf16.xpose.msra.mxu0 %v1757_v37 }
 0x7c0   : > { %2601 = vmatprep.subr.bf16.mxu0 %v2915_v9 }
 0x7c7   : > { %2602 = vmatpush3.bf16.xpose.msra.mxu0 %v1760_v38 }
 0x7c8   : > { %2603 = vmatprep.subr.bf16.mxu0 %v2915_v9 }
 0x7cf   : > { %2604 = vmatpush3.bf16.xpose.msra.mxu0 %v1763_v53 }
 0x7d0   : > { %2605 = vmatprep.subr.bf16.mxu0 %v2915_v9 }
 0x7d7   : > { %2606 = vmatpush3.bf16.xpose.msra.mxu0 %v1766_v44 }
 0x7d8   : > { %2659 = vmatprep.subr.bf16.mxu0 %v2915_v9 }
 0x864   : > { %v3593_v45 = vpop.f32.mrb[20].mxu0 }
 0x865   : > { %v2581_v25 = vpop.f32.mrb[21].mxu0 }
 0x866   : > { %v3595_v59 = vpop.f32.mrb[22].mxu0 }
 0x867   : > { %v1658_v46 = vpack.c.bf16 %v3595_v59, %v3593_v45  ;;  %v2582_v47 = vpop.f32.mrb[23].mxu0 }
 0x86c   : > { %v1724_v50 = vpop.f32.mrb[24].mxu0 }
 0x86d   : > { %v2589_v51 = vpop.f32.mrb[25].mxu0  ;;  %v1725_v24 = vadd.f32 %v2342_v63, %v1724_v50 }
 0x86e   : > { %v1727_v3 = vpop.f32.mrb[26].mxu0  ;;  %v2763_v51 = vld [vmem:[%s3821_s6 + $0x30] sm:$0xff]  }
 0x86f   : > { %v1728_v55 = vadd.f32 %v2342_v63, %v1727_v3  ;;  %v2590_v4 = vpop.f32.mrb[27].mxu0 }
 0x870   : > { %v2764_v4 = vld [vmem:[%s3821_s6 + $0x38] sm:$0xff]  }
 0x871   : > { %v1731_v56 = vpack.c.bf16 %v1728_v55, %v1725_v24 }
 0x873   : > { %2608 = vmatmul.mubr.msk.bf16.vlgmr.msra.gmra.mrb[28].mxu0 %vm927_vm2, %v1731_v56 }
 0x874   : > { %2675 = vmatprep.mubr.msk.bf16.mxu0 %vm2916_vm1, %v2915_v9 }
 0x946   : > { %v1802_v57 = vpop.f32.mrb[28].mxu0 }
 0x947   : > { %v2609_v61 = vpop.f32.mrb[29].mxu0  ;;  %v1809_v62 = vsel %vm1225_vm3, -1e+30, %v1802_v57 }
 0x948   : > { %1811 = vmax.xlane.f32.xlu0 %v1809_v62  ;;  %v1805_v0 = vpop.f32.mrb[30].mxu0 }
 0x949   : > { %v2610_v40 = vpop.f32.mrb[31].mxu0  ;;  %v1810_v1 = vsel %vm1225_vm3, -1e+30, %v1805_v0 }
 0x94a   : > { %1813 = vmax.xlane.f32.xlu1 %v1810_v1 }
 0x95b   : > { %1077 = vrot.lane.b32.xlu1 %v3365_v28, %s2921_s14 }
 0x95e   : > { %1075 = vrot.lane.b32.xlu0 %v3367_v5, %s2921_s14 }
 0x95f   : > { %1083 = vrot.lane.b32.xlu1 %v3385_v26, %s2921_s14 }
 0x962   : > { %1079 = vrot.lane.b32.xlu0 %v3375_v8, %s2921_s14 }
 0x963   : > { %1085 = vrot.lane.b32.xlu1 %v3383_v22, %s2921_s14 }
 0x966   : > { %1081 = vrot.lane.b32.xlu0 %v3373_v7, %s2921_s14 }
 0x9d5   : > { %v1812_v2 = vpop.xlane.xlu0 %1811 }
 0x9d6   : > { %v1815_v6 = vsub.f32 %v1809_v62, %v1812_v2 }
 0x9d7   : > { %v1814_v32 = vpop.xlane.xlu1 %1813 }
 0x9d8   : > { %v1817_v15 = vmul.f32 1.442695, %v1815_v6  ;;  %v1816_v33 = vsub.f32 %v1810_v1, %v1814_v32 }
 0x9d9   : > { %v1076_v48 = vpop.permute.xlu0 %1075 }
 0x9da   : > { %2819 = vpow2.f32 %v1817_v15  ;;  %v1819_v10 = vmul.f32 1.442695, %v1816_v33  ;;  %1100 = vst.msk [vmem:[#allocation3 + $0x80] sm:$0xff] %vm927_vm2, %v1076_v48 }
 0x9db   : > { %v1078_v11 = vpop.permute.xlu1 %1077 }
 0x9dc   : > { %2821 = vpow2.f32 %v1819_v10  ;;  %1101 = vst.msk [vmem:[#allocation3 + $0x88] sm:$0xff] %vm927_vm2, %v1078_v11 }
 0x9dd   : > { %v1080_v41 = vpop.permute.xlu0 %1079 }
 0x9de   : > { %1102 = vst.msk [vmem:[#allocation3 + $0x90] sm:$0xff] %vm927_vm2, %v1080_v41 }
 0x9df   : > { %v1084_v13 = vpop.permute.xlu1 %1083 }
 0x9e0   : > { %1104 = vst.msk [vmem:[#allocation3 + $0xa0] sm:$0xff] %vm927_vm2, %v1084_v13 }
 0x9e1   : > { %v1082_v14 = vpop.permute.xlu0 %1081  ;;  %v1831_v12 = vld [vmem:[#allocation3 + $0x80] sm:$0xff] }
 0x9e2   : > { %1103 = vst.msk [vmem:[#allocation3 + $0x98] sm:$0xff] %vm927_vm2, %v1082_v14  ;;  %2612 = vmatpush3.bf16.msra.mxu1 %v1831_v12 }
 0x9e3   : > { %v1086_v18 = vpop.permute.xlu1 %1085  ;;  %2613 = vmatprep.subr.bf16.mxu1 %v2915_v9  ;;  %v1832_v31 = vld [vmem:[#allocation3 + $0x88] sm:$0xff] }
 0x9e4   : > { %v2820_v19 = vpop.eup %2819  ;;  %1105 = vst.msk [vmem:[#allocation3 + $0xa8] sm:$0xff] %vm927_vm2, %v1086_v18 }
 0x9e5   : > { %1821 = vadd.xlane.f32.xlu1 %v2820_v19  ;;  %v1833_v27 = vld [vmem:[#allocation3 + $0x90] sm:$0xff] }
 0x9e6   : > { %v2822_v23 = vpop.eup %2821  ;;  %2614 = vmatpush3.bf16.msra.mxu1 %v1832_v31 }
 0x9e7   : > { %1823 = vadd.xlane.f32.xlu0 %v2822_v23  ;;  %2615 = vmatprep.subr.bf16.mxu1 %v2915_v9  ;;  %v1835_v17 = vld [vmem:[#allocation3 + $0xa0] sm:$0xff] }
 0x9e9   : > { %v1834_v30 = vld [vmem:[#allocation3 + $0x98] sm:$0xff] }
 0x9ea   : > { %2616 = vmatpush3.bf16.msra.mxu1 %v1833_v27 }
 0x9eb   : > { %2617 = vmatprep.subr.bf16.mxu1 %v2915_v9  ;;  %v1836_v49 = vld [vmem:[#allocation3 + $0xa8] sm:$0xff] }
 0x9ee   : > { %2618 = vmatpush3.bf16.msra.mxu1 %v1834_v30 }
 0x9ef   : > { %2619 = vmatprep.subr.bf16.mxu1 %v2915_v9 }
 0x9f2   : > { %2620 = vmatpush3.bf16.msra.mxu1 %v1835_v17 }
 0x9f3   : > { %2621 = vmatprep.subr.bf16.mxu1 %v2915_v9 }
 0x9f6   : > { %1089 = vrot.lane.b32.xlu1 %v3396_v21, %s2921_s14  ;;  %2622 = vmatpush3.bf16.msra.mxu1 %v1836_v49 }
 0x9f7   : > { %2623 = vmatprep.subr.bf16.mxu1 %v2915_v9 }
 0x9fa   : > { %1110 = vrot.lane.b32.xlu1 %v3365_v28, %s2922_s15 }
 0x9fd   : > { %1087 = vrot.lane.b32.xlu0 %v3398_v42, %s2921_s14 }
 0x9fe   : > { %1114 = vrot.lane.b32.xlu1 %v3373_v7, %s2922_s15 }
 0xa01   : > { %1108 = vrot.lane.b32.xlu0 %v3367_v5, %s2922_s15 }
 0xa02   : > { %1118 = vrot.lane.b32.xlu1 %v3383_v22, %s2922_s15 }
 0xa05   : > { %1112 = vrot.lane.b32.xlu0 %v3375_v8, %s2922_s15 }
 0xa06   : > { %1122 = vrot.lane.b32.xlu1 %v3396_v21, %s2922_s15 }
 0xa09   : > { %1116 = vrot.lane.b32.xlu0 %v3385_v26, %s2922_s15 }
 0xa0d   : > { %1120 = vrot.lane.b32.xlu0 %v3398_v42, %s2922_s15  ;;  %s2923_s15 = smov 72  }
 0xa72   : > { %v1822_v16 = vpop.xlane.xlu1 %1821 }
 0xa74   : > { %v1824_v34 = vpop.xlane.xlu0 %1823 }
 0xa75   : > { %2823 = vrcp.f32 %v1824_v34 }
 0xa76   : > { %v1090_v35 = vpop.permute.xlu1 %1089  ;;  %2825 = vrcp.f32 %v1822_v16 }
 0xa77   : > { %1107 = vst.msk [vmem:[#allocation3 + $0xb8] sm:$0xff] %vm927_vm2, %v1090_v35 }
 0xa78   : > { %v1088_v43 = vpop.permute.xlu0 %1087 }
 0xa79   : > { %1106 = vst.msk [vmem:[#allocation3 + $0xb0] sm:$0xff] %vm927_vm2, %v1088_v43 }
 0xa7a   : > { %v1111_v36 = vpop.permute.xlu1 %1110 }
 0xa7b   : > { %1134 = vst.msk [vmem:[#allocation2 + $0xc8] sm:$0xff] %vm927_vm2, %v1111_v36 }
 0xa7c   : > { %v1109_v37 = vpop.permute.xlu0 %1108 }
 0xa7d   : > { %1133 = vst.msk [vmem:[#allocation2 + $0xc0] sm:$0xff] %vm927_vm2, %v1109_v37 }
 0xa7e   : > { %v1115_v58 = vpop.permute.xlu1 %1114  ;;  %v1838_v63 = vld [vmem:[#allocation3 + $0xb8] sm:$0xff] }
 0xa7f   : > { %v2824_v38 = vpop.eup %2823  ;;  %1136 = vst.msk [vmem:[#allocation2 + $0xd8] sm:$0xff] %vm927_vm2, %v1115_v58 }
 0xa80   : > { %v1113_v39 = vpop.permute.xlu0 %1112  ;;  %v1837_v53 = vld [vmem:[#allocation3 + $0xb0] sm:$0xff]  ;;  %v2826_v20 = vpop.eup %2825  ;;  %v1828_v25 = vmul.f32 %v2824_v38, %v2822_v23 }
 0xa81   : > { %1135 = vst.msk [vmem:[#allocation2 + $0xd0] sm:$0xff] %vm927_vm2, %v1113_v39  ;;  %2624 = vmatpush3.bf16.msra.mxu1 %v1837_v53  ;;  %v1827_v50 = vmul.f32 %v2826_v20, %v2820_v19  ;;  %v2352_v19 = vld [vmem:[%s3822_s7 + $0x3] ss:$0 sm:$0xff] }
 0xa82   : > { %v1119_v44 = vpop.permute.xlu1 %1118  ;;  %2625 = vmatprep.subr.bf16.mxu1 %v2915_v9  ;;  %v1956_v61 = vld [vmem:[#allocation2 + $0xc8] sm:$0xff] }
 0xa83   : > { %1138 = vst.msk [vmem:[#allocation2 + $0xe8] sm:$0xff] %vm927_vm2, %v1119_v44  ;;  %v1829_v24 = vpack.c.bf16 %v1828_v25, %v1827_v50  ;;  %v1970_v62 = vsel %vm927_vm2, %v1956_v61, 0 }
 0xa84   : > { %v1117_v47 = vpop.permute.xlu0 %1116  ;;  %v1955_v56 = vld [vmem:[#allocation2 + $0xc0] sm:$0xff] }
 0xa85   : > { %1137 = vst.msk [vmem:[#allocation2 + $0xe0] sm:$0xff] %vm927_vm2, %v1117_v47  ;;  %2626 = vmatpush3.bf16.msra.mxu1 %v1838_v63  ;;  %v1967_v57 = vsel %vm927_vm2, %v1955_v56, 0 }
 0xa86   : > { %v1123_v3 = vpop.permute.xlu1 %1122  ;;  %2631 = vmatprep.subr.bf16.mxu1 %v2915_v9 }
 0xa87   : > { %1140 = vst.msk [vmem:[#allocation2 + $0xf8] sm:$0xff] %vm927_vm2, %v1123_v3 }
 0xa88   : > { %v1121_v55 = vpop.permute.xlu0 %1120  ;;  %2628 = vmatmul.mubr.bf16.vlgmr.msra.gmra.mrb[16].mxu1 %v1829_v24  ;;  %v1957_v0 = vld [vmem:[#allocation2 + $0xd0] sm:$0xff] }
 0xa89   : > { %1139 = vst.msk [vmem:[#allocation2 + $0xf0] sm:$0xff] %vm927_vm2, %v1121_v55  ;;  %2632 = vmatpush3.bf16.msra.mxu1 %v2763_v51  ;;  %2635 = vmatprep.mubr.msk.bf16.mxu1 %vm2916_vm1, %v2915_v9  ;;  %v1973_v40 = vsel %vm927_vm2, %v1957_v0, 0 }
 0xa8a   : > { %2633 = vmatprep.subr.bf16.mxu1 %v2915_v9  ;;  %v1960_v32 = vld [vmem:[#allocation2 + $0xe8] sm:$0xff] }
 0xa8b   : > { %v1982_v15 = vsel %vm927_vm2, %v1960_v32, 0 }
 0xa8c   : > { %v1959_v2 = vld [vmem:[#allocation2 + $0xe0] sm:$0xff] }
 0xa8d   : > { %2634 = vmatpush3.bf16.msra.mxu1 %v2764_v4  ;;  %v1979_v6 = vsel %vm927_vm2, %v1959_v2, 0  ;;  %v2766_v2 = vld [vmem:[%s3825_s10 + $0x8] sm:$0xff]  }
 0xa8e   : > { %2639 = vmatprep.subr.bf16.mxu1 %v2915_v9  ;;  %v1962_v10 = vld [vmem:[#allocation2 + $0xf8] sm:$0xff] }
 0xa8f   : > { %v1988_v11 = vsel %vm927_vm2, %v1962_v10, 0 }
 0xa90   : > { %2636 = vmatmul.mubr.msk.bf16.vlgmr.msra.gmra.mrb[20].mxu1 %vm513_vm0, %v3356_v29  ;;  %v1958_v29 = vld [vmem:[#allocation2 + $0xd8] sm:$0xff]  ;;  %v1961_v33 = vld [vmem:[#allocation2 + $0xf0] sm:$0xff] }
 0xa91   : > { %2655 = vmatprep.mubr.msk.bf16.mxu1 %vm2916_vm1, %v2915_v9  ;;  %v1976_v1 = vsel %vm927_vm2, %v1958_v29, 0  ;;  %v1985_v48 = vsel %vm927_vm2, %v1961_v33, 0 }
 0xa96   : > { %2640 = vmatpush3.bf16.xpose.msra.mxu1 %v1967_v57 }
 0xa97   : > { %2641 = vmatprep.subr.bf16.mxu1 %v2915_v9 }
 0xa9e   : > { %2642 = vmatpush3.bf16.xpose.msra.mxu1 %v1970_v62 }
 0xa9f   : > { %2643 = vmatprep.subr.bf16.mxu1 %v2915_v9 }
 0xaa6   : > { %2644 = vmatpush3.bf16.xpose.msra.mxu1 %v1973_v40 }
 0xaa7   : > { %2645 = vmatprep.subr.bf16.mxu1 %v2915_v9 }
 0xaae   : > { %2646 = vmatpush3.bf16.xpose.msra.mxu1 %v1976_v1  ;;  %v2765_v1 = vld [vmem:[%s3825_s10] sm:$0xff]  }
 0xaaf   : > { %2647 = vmatprep.subr.bf16.mxu1 %v2915_v9 }
 0xab6   : > { %2648 = vmatpush3.bf16.xpose.msra.mxu1 %v1979_v6 }
 0xab7   : > { %2649 = vmatprep.subr.bf16.mxu1 %v2915_v9 }
 0xabe   : > { %2650 = vmatpush3.bf16.xpose.msra.mxu1 %v1982_v15 }
 0xabf   : > { %2651 = vmatprep.subr.bf16.mxu1 %v2915_v9 }
 0xac6   : > { %2652 = vmatpush3.bf16.xpose.msra.mxu1 %v1985_v48 }
 0xac7   : > { %2653 = vmatprep.subr.bf16.mxu1 %v2915_v9 }
 0xace   : > { %2654 = vmatpush3.bf16.xpose.msra.mxu1 %v1988_v11 }
 0xb5b   : > { %v3686_v41 = vpop.f32.mrb[16].mxu1 }
 0xb5c   : > { %v2629_v13 = vpop.f32.mrb[17].mxu1 }
 0xb5d   : > { %v3688_v14 = vpop.f32.mrb[18].mxu1  ;;  %v2361_v13 = vld [vmem:[%s3827_s12] ss:$0 sm:$0xff] }
 0xb5e   : > { %v1880_v12 = vpack.c.bf16 %v3688_v14, %v3686_v41  ;;  %v2630_v18 = vpop.f32.mrb[19].mxu1 }
 0xb63   : > { %v1946_v31 = vpop.f32.mrb[20].mxu1 }
 0xb64   : > { %v2637_v23 = vpop.f32.mrb[21].mxu1  ;;  %v1947_v30 = vadd.f32 %v2352_v19, %v1946_v31 }
 0xb65   : > { %v1949_v27 = vpop.f32.mrb[22].mxu1 }
 0xb66   : > { %v1950_v17 = vadd.f32 %v2352_v19, %v1949_v27  ;;  %v2638_v49 = vpop.f32.mrb[23].mxu1 }
 0xb68   : > { %v1953_v16 = vpack.c.bf16 %v1950_v17, %v1947_v30 }
 0xb6a   : > { %2656 = vmatmul.mubr.msk.bf16.vlgmr.msra.gmra.mrb[24].mxu1 %vm927_vm2, %v1953_v16 }
 0xc3d   : > { %v2024_v34 = vpop.f32.mrb[24].mxu1 }
 0xc3e   : > { %v2657_v35 = vpop.f32.mrb[25].mxu1  ;;  %v2031_v43 = vsel %vm1225_vm3, -1e+30, %v2024_v34 }
 0xc3f   : > { %2033 = vmax.xlane.f32.xlu0 %v2031_v43  ;;  %v2027_v36 = vpop.f32.mrb[26].mxu1 }
 0xc40   : > { %v2032_v37 = vsel %vm1225_vm3, -1e+30, %v2027_v36  ;;  %v2658_v58 = vpop.f32.mrb[27].mxu1 }
 0xc41   : > { %2035 = vmax.xlane.f32.xlu1 %v2032_v37 }
 0xc52   : > { %1143 = vrot.lane.b32.xlu1 %v3365_v28, %s2923_s15 }
 0xc55   : > { %1141 = vrot.lane.b32.xlu0 %v3367_v5, %s2923_s15 }
 0xc56   : > { %1149 = vrot.lane.b32.xlu1 %v3385_v26, %s2923_s15 }
 0xc59   : > { %1145 = vrot.lane.b32.xlu0 %v3375_v8, %s2923_s15 }
 0xc5a   : > { %1151 = vrot.lane.b32.xlu1 %v3383_v22, %s2923_s15 }
 0xc5d   : > { %1147 = vrot.lane.b32.xlu0 %v3373_v7, %s2923_s15 }
 0xccc   : > { %v2034_v60 = vpop.xlane.xlu0 %2033 }
 0xccd   : > { %v2037_v38 = vsub.f32 %v2031_v43, %v2034_v60 }
 0xcce   : > { %v2036_v39 = vpop.xlane.xlu1 %2035 }
 0xccf   : > { %v2039_v53 = vmul.f32 1.442695, %v2037_v38  ;;  %v2038_v28 = vsub.f32 %v2032_v37, %v2036_v39 }
 0xcd0   : > { %v1142_v20 = vpop.permute.xlu0 %1141 }
 0xcd1   : > { %2827 = vpow2.f32 %v2039_v53  ;;  %v2041_v5 = vmul.f32 1.442695, %v2038_v28  ;;  %1166 = vst.msk [vmem:[#allocation3 + $0xc0] sm:$0xff] %vm927_vm2, %v1142_v20 }
 0xcd2   : > { %v1144_v26 = vpop.permute.xlu1 %1143 }
 0xcd3   : > { %2829 = vpow2.f32 %v2041_v5  ;;  %1167 = vst.msk [vmem:[#allocation3 + $0xc8] sm:$0xff] %vm927_vm2, %v1144_v26 }
 0xcd4   : > { %v1146_v8 = vpop.permute.xlu0 %1145 }
 0xcd5   : > { %1168 = vst.msk [vmem:[#allocation3 + $0xd0] sm:$0xff] %vm927_vm2, %v1146_v8 }
 0xcd6   : > { %v1150_v22 = vpop.permute.xlu1 %1149 }
 0xcd7   : > { %1170 = vst.msk [vmem:[#allocation3 + $0xe0] sm:$0xff] %vm927_vm2, %v1150_v22 }
 0xcd8   : > { %v1148_v7 = vpop.permute.xlu0 %1147  ;;  %v2053_v44 = vld [vmem:[#allocation3 + $0xc0] sm:$0xff] }
 0xcd9   : > { %1169 = vst.msk [vmem:[#allocation3 + $0xd8] sm:$0xff] %vm927_vm2, %v1148_v7  ;;  %2660 = vmatpush3.bf16.msra.mxu0 %v2053_v44 }
 0xcda   : > { %v1152_v25 = vpop.permute.xlu1 %1151  ;;  %2661 = vmatprep.subr.bf16.mxu0 %v2915_v9  ;;  %v2054_v63 = vld [vmem:[#allocation3 + $0xc8] sm:$0xff] }
 0xcdb   : > { %v2828_v47 = vpop.eup %2827  ;;  %1171 = vst.msk [vmem:[#allocation3 + $0xe8] sm:$0xff] %vm927_vm2, %v1152_v25 }
 0xcdc   : > { %2043 = vadd.xlane.f32.xlu1 %v2828_v47  ;;  %v2055_v51 = vld [vmem:[#allocation3 + $0xd0] sm:$0xff] }
 0xcdd   : > { %v2830_v50 = vpop.eup %2829  ;;  %2662 = vmatpush3.bf16.msra.mxu0 %v2054_v63 }
 0xcde   : > { %2045 = vadd.xlane.f32.xlu0 %v2830_v50  ;;  %2663 = vmatprep.subr.bf16.mxu0 %v2915_v9  ;;  %v2057_v24 = vld [vmem:[#allocation3 + $0xe0] sm:$0xff] }
 0xce0   : > { %v2056_v3 = vld [vmem:[#allocation3 + $0xd8] sm:$0xff] }
 0xce1   : > { %2664 = vmatpush3.bf16.msra.mxu0 %v2055_v51 }
 0xce2   : > { %2665 = vmatprep.subr.bf16.mxu0 %v2915_v9  ;;  %v2058_v55 = vld [vmem:[#allocation3 + $0xe8] sm:$0xff] }
 0xce5   : > { %2666 = vmatpush3.bf16.msra.mxu0 %v2056_v3 }
 0xce6   : > { %2667 = vmatprep.subr.bf16.mxu0 %v2915_v9 }
 0xce9   : > { %2668 = vmatpush3.bf16.msra.mxu0 %v2057_v24 }
 0xcea   : > { %2669 = vmatprep.subr.bf16.mxu0 %v2915_v9 }
 0xced   : > { %1155 = vrot.lane.b32.xlu1 %v3396_v21, %s2923_s15  ;;  %2670 = vmatpush3.bf16.msra.mxu0 %v2058_v55 }
 0xcee   : > { %2671 = vmatprep.subr.bf16.mxu0 %v2915_v9 }
 0xcf1   : > { %1882 = vrot.lane.b32.xlu1 %v1880_v12, %s2924_s17  ;;  %s471_s17 = sand.u32 1, %s2897_s26  }
 0xcf2   : > { %s2302_s23 = sshll.u32 %s471_s17, 4 }
 0xcf3   : > { %s473_s0 = scalar_lea.vmem [#allocation5], %s2302_s23  ;;  %s2927_s23 = smov [#allocation5]  }
 0xcf4   : > { %1153 = vrot.lane.b32.xlu0 %v3398_v42, %s2923_s15  ;;  %s2926_s15 = smov 24   ;;  %s2206_s1 = sshll.u32 %s473_s0, 4  ;;  %s3765_s1 = int_to_ptr.vmem [resolvable:$true] %s2206_s1 }
 0xcf5   : > { %s2839_s14 = sshll.u32 %s2927_s23, 4  ;;  %s2840_s14 = int_to_ptr.vmem [resolvable:$false] %s2839_s14 }
 0xcf6   : > { %p2842_p1 = scmp.lt.s32.totalorder %s3765_s1, %s2840_s14 }
 0xcf8   : > { %1660 = vrot.lane.b32.xlu0 %v1658_v46, %s3829_s19  ;;  %s2835_s19 = scalar_lea.vmem %s3765_s1, 256 }
 0xcf9   : > { %p2836_p12 = scmp.ne.s32.totalorder %s3765_s1, %s2835_s19 }
 0xcfb   : > { %p2837_p13 = pnand %p2836_p12, %p3039_p4 }
 0xcfd   : > { %p2838_p0 = pneg %p2837_p13 }
 0xd69   : > { %v2044_v4 = vpop.xlane.xlu1 %2043 }
 0xd6b   : > { %v2046_v56 = vpop.xlane.xlu0 %2045 }
 0xd6c   : > { %2831 = vrcp.f32 %v2046_v56 }
 0xd6d   : > { %v1156_v21 = vpop.permute.xlu1 %1155  ;;  %2833 = vrcp.f32 %v2044_v4 }
 0xd6e   : > { %1173 = vst.msk [vmem:[#allocation3 + $0xf8] sm:$0xff] %vm927_vm2, %v1156_v21 }
 0xd6f   : > { %v1154_v57 = vpop.permute.xlu0 %1153 }
 0xd70   : > { %1172 = vst.msk [vmem:[#allocation3 + $0xf0] sm:$0xff] %vm927_vm2, %v1154_v57 }
 0xd71   : > { %v1883_v42 = vpop.permute.xlu1 %1882 }
 0xd73   : > { %v1661_v61 = vpop.permute.xlu0 %1660 }
 0xd74   : > { %1664 = vst.msk [vmem:[#allocation4] sm:$0xff] %vm1663_vm4, %v1661_v61 }
 0xd75   : > { %1886 = vst.msk [vmem:[#allocation4] sm:$0xff] %vm1885_vm5, %v1883_v42  ;;  %v2060_v46 = vld [vmem:[#allocation3 + $0xf8] sm:$0xff] }
 0xd76   : > { %v2832_v62 = vpop.eup %2831 }
 0xd77   : > { %v2059_v0 = vld [vmem:[#allocation3 + $0xf0] sm:$0xff]  ;;  %v2834_v45 = vpop.eup %2833  ;;  %v2050_v59 = vmul.f32 %v2832_v62, %v2830_v50 }
 0xd78   : > { %2672 = vmatpush3.bf16.msra.mxu0 %v2059_v0  ;;  %v2049_v40 = vmul.f32 %v2834_v45, %v2828_v47 }
 0xd79   : > { %2673 = vmatprep.subr.bf16.mxu0 %v2915_v9 }
 0xd7a   : > { %v2051_v29 = vpack.c.bf16 %v2050_v59, %v2049_v40 }
 0xd7c   : > { %2674 = vmatpush3.bf16.msra.mxu0 %v2060_v46 }
 0xd7d   : > { %2679 = vmatprep.subr.bf16.mxu0 %v2915_v9 }
 0xd7f   : > { %2676 = vmatmul.mubr.bf16.vlgmr.msra.gmra.mrb[32].mxu0 %v2051_v29 }
 0xd80   : > { %2683 = vmatprep.mubr.msk.bf16.mxu0 %vm2916_vm1, %v2915_v9  ;;  %2680 = vmatpush3.bf16.msra.mxu0 %v2765_v1 }
 0xd81   : > { %2681 = vmatprep.subr.bf16.mxu0 %v2915_v9  ;;  %v2357_v9 = vld [vmem:[%s3826_s11] ss:$0 sm:$0xff] }
 0xd84   : > { %2682 = vmatpush3.bf16.msra.mxu0 %v2766_v2 }
 0xe52   : > { %v2095_v6 = vpop.f32.mrb[32].mxu0 }
 0xe53   : > { %v2677_v32 = vpop.f32.mrb[33].mxu0 }
 0xe54   : > { %v2098_v15 = vpop.f32.mrb[34].mxu0 }
 0xe55   : > { %v2102_v33 = vpack.c.bf16 %v2098_v15, %v2095_v6  ;;  %v2678_v48 = vpop.f32.mrb[35].mxu0 }
 0xe57   : > { %2104 = vrot.lane.b32.xlu0 %v2102_v33, %s2926_s15  ;;  %s2369_s15 = sshll.u32 %s2905_s28, 8  ;;  %s3768_s28 = scalar_lea.sflag [#allocation6], %s471_s17 }
 0xe58   : > { %s3761_s2 = scalar_lea.hbm %s3828_s13, %s2369_s15  ;;  %s2841_s15 = scalar_lea.vmem %s2840_s14, 512 }
 0xe59   : > { %p2843_p2 = scmp.lt.s32.totalorder %s2841_s15, %s2835_s19 }
 0xe5b   : > { %p2844_p3 = por %p2843_p2, %p2842_p1 }
 0xe5d   : > { %p2845_p5 = pnand %p2844_p3, %p2838_p0 }
 0xec9   : > { %v2105_v10 = vpop.permute.xlu0 %2104 }
 0xeca   : > { %2108 = vst.msk [vmem:[#allocation4] sm:$0xff] %vm2107_vm6, %v2105_v10 }
 0xed1   : > { %v2109_v11 = vld [vmem:[#allocation4] sm:$0xff] }
 0xed2   : > { %2684 = vmatmul.mubr.msk.bf16.vlgmr.msra.gmra.mrb[36].mxu0 %vm513_vm0, %v2109_v11 }
 0xfa5   : > { %v2170_v41 = vpop.f32.mrb[36].mxu0 }
 0xfa6   : > { %v2171_v14 = vadd.f32 %v2357_v9, %v2170_v41  ;;  %v2685_v12 = vpop.f32.mrb[37].mxu0 }
 0xfa7   : > { %v2173_v18 = vpop.f32.mrb[38].mxu0 }
 0xfa8   : > { %v2184_v19 = vmul.f32 %v2361_v13, %v2171_v14  ;;  %v2174_v31 = vadd.f32 %v2357_v9, %v2173_v18  ;;  %v2686_v23 = vpop.f32.mrb[39].mxu0 }
 0xfaa   : > { %v2186_v27 = vadd.f32 %v2184_v19, %v3348_v52  ;;  %v2185_v30 = vmul.f32 %v2361_v13, %v2174_v31 }
 0xfac   : > { %2188 = vst.msk [vmem:[%s473_s0] sm:$0xff] %vm513_vm0, %v2186_v27  ;;  %v2187_v17 = vadd.f32 %v2185_v30, %v3350_v54 }
 0xfae   : > { %2189 = vst.msk [vmem:[%s473_s0 + $0x8] sm:$0xff] %vm513_vm0, %v2187_v17 }
 0xfaf   : > { %2848 = shalt.err (!%p2845_p5)
}
 0xfb0   : > { %s2849_s0 = scalar_lea.hbm %s3761_s2, 256  ;;  %s2853_s22 = scalar_lea.hbm %s3828_s13, 512 }
 0xfb1   : > { %p2850_p6 = scmp.ne.s32.totalorder %s3761_s2, %s2849_s0  ;;  %p2854_p10 = scmp.lt.u32.totalorder %s3761_s2, %s3828_s13 }
 0xfb2   : > { %p2855_p11 = scmp.lt.u32.totalorder %s2853_s22, %s2849_s0  ;;  %p2857_p13 = scmp.lt.u32.totalorder %s2849_s0, %s3761_s2 }
 0xfb3   : > { %p2851_p7 = pnand %p2850_p6, %p3039_p4 }
 0xfb4   : > { %p2856_p12 = por %p2855_p11, %p2854_p10 }
 0xfb5   : > { %p2852_p9 = pneg %p2851_p7 }
 0xfb6   : > { %p2858_p0 = por %p2857_p13, %p2856_p12 }
 0xfb8   : > { %p2859_p1 = pnand %p2858_p0, %p2852_p9 }
 0xfba   : > { %2862 = shalt.err (!%p2859_p1)
}
 0xfbb   : > { %s2928_s19 = smov 128   ;;  %s3838_s15 = smov 8  }
 0xfbc   : > { %2687 = dma.vmem_to_hbm [thread:$0]  (%p3039_p4), %s3765_s1, 256, %s3761_s2, %s3768_s28, %s2928_s19, %s2928_s19, %s3838_s15  }
 0xfbd PF: > { %p2693_p2 = scmp.ge.s32.totalorder %s2913_s30, 2  ;;  %s2221_s17 = sand.u32 1, %s2893_s25  }
 0xfbe   : > { %s2222_s0 = scalar_lea.sflag [#allocation6], %s2221_s17 }
 0xfbf   : > { %p2690_p3 = pnand %p2693_p2, %p3046_p8 }
 0xfc1   : > { %2888 = dma.done.wait (!%p2690_p3), %s2222_s0, 256  }
 0xfc2   : > { %2890 = vsyncadd (!%p2690_p3), %s2222_s0, 4294967040  ;;  %s26_s30 = sadd.s32 1, %s2913_s30   ;;  %s3839_s25 = smov %s2897_s26 }
 0xfc3   : > { %p23_p5 = scmp.ge.s32.totalorder %s26_s30, 4   ;;  %s3840_s26 = smov %s2901_s27 }
 0xfc4   : > { %s3841_s27 = smov %s3052_s21  ;;  %s3842_s28 = smov %s2909_s29 }
 0xfc5   : > { %s3843_s29 = smov %s3845_s16  ;;  %25 = sbr.rel (!%p23_p5) target bundleno = 8 (0x8), region = 132 }
 0xfcc   :  { %2227 = vsyncpa [#allocation6], 1 }
 0xfcd   :  { %2229 = vsyncpa [#allocation6 + $0x1], 1 }

</bundles_post_ra>
